<compile_context>
chip_gen: v7x
topology: tpu7x:2x2x1
jax: 0.10.0
libtpu: 0.0.40
codegen_flags: <defaults>
</compile_context>

<pallas_src>
import functools

import jax
import jax.numpy as jnp
from jax.experimental import pallas as pl
from jax.experimental.pallas import tpu as pltpu

CLOUD_CLASS = 3                      # seg_classes['clouds']
RATIO_DENOM = 256.0 * 256.0 * 3.0    # hard-coded in the reference module


def _fused_inpaint_kernel(dy, dx, H, W, max_ratio, full_img_inpaint,
                          scal_ref, seg_ref, data_ref, w_ref, b_ref,
                          out_cube_ref, out_mask_ref):
    """Fused cloud/shadow augmentation.

    scal_ref : SMEM (2,)  f32   [p, eps]
    seg_ref  : VMEM (1, H*W) i32
    data_ref : VMEM (C, H*W) f32
    w_ref    : VMEM (9, Cout, Cin) f32   (3x3 conv taps)
    b_ref    : VMEM (Cout, 1) f32
    outputs  : (C, H*W) f32 cube, (1, H*W) i32 mask
    """
    N = H * W
    Cout = b_ref.shape[0]

    # ---- scalar gate p > eps (SMEM scalars -> cheap scf.if) ------------------
    p_gt_eps = scal_ref[0] > scal_ref[1]

    seg = seg_ref[...]                                      # (1, N) int32
    cloud = seg == CLOUD_CLASS                              # (1, N) bool

    # torch.sum(mask): mask keeps the class value (3) at cloud pixels.
    cloud_sum = jnp.sum(jnp.where(cloud, jnp.float32(CLOUD_CLASS),
                                  jnp.float32(0.0)), keepdims=True)   # (1, 1)
    ratio = cloud_sum / jnp.float32(RATIO_DENOM)            # (1, 1)

    # Flat-index helpers.  Row tests need no division (row >= r <=> idx >= r*W);
    # column index via bit-and for power-of-two W (demo / reference sizes).
    idx = jax.lax.broadcasted_iota(jnp.int32, (1, N), 1)
    if W & (W - 1) == 0:
        col = jnp.bitwise_and(idx, W - 1)
    else:
        col = jax.lax.rem(idx, W)

    @pl.when(p_gt_eps)
    def _augment():
        # ---- shadow mask: clouds shifted by (dy, dx), zero padded, minus clouds
        rolled = pltpu.roll(cloud.astype(jnp.int32), dy * W + dx, axis=1)
        in_bounds = jnp.logical_and(idx >= dy * W, col >= dx)
        shadow = jnp.logical_and(jnp.logical_and(in_bounds, rolled != 0),
                                 jnp.logical_not(cloud))    # (1, N) bool

        new_mask = shadow.astype(jnp.int32) + seg           # (1, N) int32

        # ---- corrupted bands: zero under the shadow ---------------------------
        corr = jnp.where(shadow, jnp.float32(0.0), data_ref[...])     # (C, N)

        # TODO(synk): the reference runs a pretrained smp.UnetPlusPlus
        # (timm-efficientnet-b0, in=8, classes=8) loaded from disk; a
        # deterministic 3x3 conv (8->8, pad 1) stands in for its conv hot path.
        # im2col is never materialized: 9 accumulated MXU matmuls over
        # lane-rolled views of the VMEM-resident corrupted tensor.
        acc = jnp.broadcast_to(b_ref[...], (Cout, N))       # bias init, hoisted
        for k in range(9):
            ky, kx = k // 3, k % 3
            sy, sx = 1 - ky, 1 - kx                         # tap shift
            xk = corr
            if sy != 0 or sx != 0:
                xk = pltpu.roll(xk, (sy * W + sx) % N, axis=1)
                conds = []
                if sy > 0:
                    conds.append(idx >= sy * W)
                if sy < 0:
                    conds.append(idx < (H + sy) * W)
                if sx > 0:
                    conds.append(col >= sx)
                if sx < 0:
                    conds.append(col < W + sx)
                m = conds[0]
                for c in conds[1:]:
                    m = jnp.logical_and(m, c)
                xk = jnp.where(m, xk, jnp.float32(0.0))
            acc = acc + jnp.dot(w_ref[k], xk,
                                preferred_element_type=jnp.float32)

        clipped = jnp.clip(acc, 0.0, 1.0)
        if full_img_inpaint:
            inpainted = clipped
        else:
            # corrupted is already 0 under the shadow -> corrupted + masked clip
            inpainted = jnp.where(shadow, clipped, corr)

        # ---- clouds_ratio <= max_ratio gate (vector select) -------------------
        keep = jnp.broadcast_to(ratio, (1, N)) <= jnp.float32(max_ratio)
        out_cube_ref[...] = jnp.where(keep, inpainted, data_ref[...])
        out_mask_ref[...] = jnp.where(keep, new_mask, seg)

    @pl.when(jnp.logical_not(p_gt_eps))
    def _passthrough():
        out_cube_ref[...] = data_ref[...]
        out_mask_ref[...] = seg


def inpaint_shadow4cloud_aug(datacube, seglabel, conv_w, conv_b,
                             p=1.0, eps=0.25, *,
                             dx=11, dy=13, full_img_inpaint=False,
                             max_ratio_of_clouds=0.5):
    """datacube (C,H,W) f32, seglabel (H,W) i32 -> (out_cube (C,H,W) f32, out_mask (H,W) i32)."""
    C, H, W = datacube.shape
    Cout, Cin, KH, KW = conv_w.shape
    assert (KH, KW) == (3, 3) and Cin == C and Cout == C
    assert 0 <= int(dy) < H and 0 <= int(dx) < W
    N = H * W

    # Lane-dense flat views (free, bit-compatible reshapes).
    data_flat = datacube.reshape(C, N).astype(jnp.float32)
    seg_flat = seglabel.reshape(1, N).astype(jnp.int32)
    # conv taps reordered once to (9, Cout, Cin) (tiny weight, negligible).
    w9 = jnp.transpose(conv_w, (2, 3, 0, 1)).reshape(KH * KW, Cout, Cin)
    w9 = w9.astype(jnp.float32)
    b2 = conv_b.reshape(Cout, 1).astype(jnp.float32)
    # p/eps as runtime SMEM scalars (eps is a per-call draw in the reference).
    scal = jnp.stack([jnp.asarray(p, jnp.float32).reshape(()),
                      jnp.asarray(eps, jnp.float32).reshape(())])

    kern = functools.partial(_fused_inpaint_kernel, int(dy), int(dx), H, W,
                             float(max_ratio_of_clouds), bool(full_img_inpaint))

    vmem = pl.BlockSpec(memory_space=pltpu.MemorySpace.VMEM)
    smem = pl.BlockSpec(memory_space=pltpu.MemorySpace.SMEM)

    out_cube_flat, out_mask_flat = pl.pallas_call(
        kern,
        out_shape=(jax.ShapeDtypeStruct((C, N), jnp.float32),
                   jax.ShapeDtypeStruct((1, N), jnp.int32)),
        in_specs=[smem, vmem, vmem, vmem, vmem],
        out_specs=(vmem, vmem),
        # out_cube aliases datacube, out_mask aliases seglabel.
        input_output_aliases={2: 0, 1: 1},
    )(scal, seg_flat, data_flat, w9, b2)

    return out_cube_flat.reshape(C, H, W), out_mask_flat.reshape(H, W)


# ----------------------------- pure-JAX reference -----------------------------
def _reference(datacube, seglabel, conv_w, conv_b, p, eps, *, dx, dy,
               full_img_inpaint=False, max_ratio_of_clouds=0.5):
    C, H, W = datacube.shape
    seg = seglabel.astype(jnp.int32)
    cloud = jnp.where(seg == CLOUD_CLASS, seg, 0)
    clouds_ratio = jnp.sum(cloud.astype(jnp.float32)) / RATIO_DENOM
    shadow = jnp.zeros((H, W), jnp.int32).at[dy:, dx:].set(cloud[: H - dy, : W - dx])
    shadow = jnp.where(shadow != 0, 1, 0)
    shadow = jnp.where(cloud != 0, 0, shadow)
    new_mask = shadow + seg
    shadow_on = (shadow != 0)[None, :, :]
    corrupted = jnp.where(shadow_on, 0.0, datacube).astype(jnp.float32)
    conv = jax.lax.conv_general_dilated(
        corrupted[None], conv_w.astype(jnp.float32), window_strides=(1, 1),
        padding="SAME", dimension_numbers=("NCHW", "OIHW", "NCHW"))[0]
    conv = jnp.clip(conv + conv_b[:, None, None], 0.0, 1.0)
    if full_img_inpaint:
        inpainted = conv
    else:
        inpainted = corrupted + jnp.where(shadow_on, conv, 0.0)
    take = jnp.logical_and(clouds_ratio <= max_ratio_of_clouds,
                           jnp.asarray(p, jnp.float32) > jnp.asarray(eps, jnp.float32))
    return jnp.where(take, inpainted, datacube), jnp.where(take, new_mask, seg)


if __name__ == "__main__":
    key = jax.random.PRNGKey(0)
    kd, ks, kw, kb, ke = jax.random.split(key, 5)

    C, H, W = 8, 64, 64
    datacube = jax.random.uniform(kd, (C, H, W), dtype=jnp.float32)
    seglabel = jax.random.randint(ks, (H, W), 0, 4, dtype=jnp.int32)

    # deterministic stand-in conv parameters (in_channels=8, classes=8, 3x3)
    conv_w = jax.random.normal(kw, (C, C, 3, 3), dtype=jnp.float32) * 0.05
    conv_b = jax.random.normal(kb, (C,), dtype=jnp.float32) * 0.01

    p = jnp.float32(1.0)
    eps = jax.random.uniform(ke, (), dtype=jnp.float32)   # per-call draw (np.random.random())
    dx, dy = 11, 13                                        # module fixes these at __init__

    fn = jax.jit(inpaint_shadow4cloud_aug,
                 static_argnames=("dx", "dy", "full_img_inpaint",
                                  "max_ratio_of_clouds"))
    out_cube, out_mask = fn(datacube, seglabel, conv_w, conv_b, p, eps,
                            dx=dx, dy=dy)
    jax.block_until_ready(out_cube)
    jax.block_until_ready(out_mask)

    assert out_cube.shape == (C, H, W) and out_cube.dtype == jnp.float32
    assert out_mask.shape == (H, W) and out_mask.dtype == jnp.int32

    ref_cube, ref_mask = _reference(datacube, seglabel, conv_w, conv_b, p, eps,
                                    dx=dx, dy=dy)
    assert bool(jnp.array_equal(out_mask, ref_mask))
    # loose tolerance covers MXU vs XLA default f32-matmul precision differences
    assert bool(jnp.allclose(out_cube, ref_cube, atol=2e-2)), \
        float(jnp.max(jnp.abs(out_cube - ref_cube)))
    print("KERNEL_OK")
</pallas_src>

<mosaic_0001>
module attributes {stable_mosaic.version = 11 : i64} {
  func.func @_fused_inpaint_kernel(%arg0: memref<2xf32, #tpu.memory_space<smem>>, %arg1: memref<1x4096xi32, #tpu.memory_space<vmem>>, %arg2: memref<8x4096xf32, #tpu.memory_space<vmem>>, %arg3: memref<9x8x8xf32, #tpu.memory_space<vmem>>, %arg4: memref<8x1xf32, #tpu.memory_space<vmem>>, %arg5: memref<8x4096xf32, #tpu.memory_space<vmem>>, %arg6: memref<1x4096xi32, #tpu.memory_space<vmem>>) attributes {dimension_semantics = [], scalar_prefetch = 0 : i64, scratch_operands = 0 : i64, tpu.core_type = #tpu.core_type<tc>} {
    %c0 = arith.constant 0 : index
    %0 = memref.load %arg0[%c0] : memref<2xf32, #tpu.memory_space<smem>>
    %c1 = arith.constant 1 : index
    %1 = memref.load %arg0[%c1] : memref<2xf32, #tpu.memory_space<smem>>
    %2 = arith.cmpf ogt, %0, %1 : f32
    %c0_0 = arith.constant 0 : index
    %c0_1 = arith.constant 0 : index
    %3 = vector.load %arg1[%c0_0, %c0_1] : memref<1x4096xi32, #tpu.memory_space<vmem>>, vector<1x4096xi32>
    %c3_i32 = arith.constant 3 : i32
    %4 = vector.broadcast %c3_i32 : i32 to vector<1x4096xi32>
    %5 = arith.cmpi eq, %3, %4 : vector<1x4096xi32>
    %cst = arith.constant 3.000000e+00 : f32
    %cst_2 = arith.constant 0.000000e+00 : f32
    %6 = vector.broadcast %cst : f32 to vector<1x4096xf32>
    %7 = vector.broadcast %cst_2 : f32 to vector<1x4096xf32>
    %8 = arith.select %5, %6, %7 : vector<1x4096xi1>, vector<1x4096xf32>
    %9 = vector.shape_cast %8 : vector<1x4096xf32> to vector<1x1x4096xf32>
    %cst_3 = arith.constant dense<0.000000e+00> : vector<1xf32>
    %10 = vector.multi_reduction <add>, %9, %cst_3 [1, 2] : vector<1x1x4096xf32> to vector<1xf32>
    %11 = vector.shape_cast %10 : vector<1xf32> to vector<1x1x1xf32>
    %12 = vector.extract %11[0, 0, 0] : f32 from vector<1x1x1xf32>
    %13 = vector.broadcast %12 : f32 to vector<1x1xf32>
    %cst_4 = arith.constant 1.966080e+05 : f32
    %14 = vector.broadcast %cst_4 : f32 to vector<1x1xf32>
    %15 = arith.divf %13, %14 : vector<1x1xf32>
    %16 = tpu.iota {dimensions = array<i32: 1>} : vector<1x4096xi32>
    %c63_i32 = arith.constant 63 : i32
    %17 = vector.broadcast %c63_i32 : i32 to vector<1x4096xi32>
    %18 = arith.andi %16, %17 : vector<1x4096xi32>
    %19 = arith.extui %2 : i1 to i32
    %c0_i32 = arith.constant 0 : i32
    %20 = arith.cmpi ne, %19, %c0_i32 : i32
    scf.if %20 {
      %24 = arith.extui %5 : vector<1x4096xi1> to vector<1x4096xi32>
      %c843_i32 = arith.constant 843 : i32
      %25 = tpu.dynamic_rotate %24 by %c843_i32 dim 1 : vector<1x4096xi32>, i32 -> vector<1x4096xi32>
      %c832_i32 = arith.constant 832 : i32
      %26 = vector.broadcast %c832_i32 : i32 to vector<1x4096xi32>
      %27 = arith.cmpi sge, %16, %26 : vector<1x4096xi32>
      %c11_i32 = arith.constant 11 : i32
      %28 = vector.broadcast %c11_i32 : i32 to vector<1x4096xi32>
      %29 = arith.cmpi sge, %18, %28 : vector<1x4096xi32>
      %30 = arith.andi %27, %29 : vector<1x4096xi1>
      %c0_i32_6 = arith.constant 0 : i32
      %31 = vector.broadcast %c0_i32_6 : i32 to vector<1x4096xi32>
      %32 = arith.cmpi ne, %25, %31 : vector<1x4096xi32>
      %33 = arith.andi %30, %32 : vector<1x4096xi1>
      %cst_7 = arith.constant dense<true> : vector<1x4096xi1>
      %34 = arith.xori %5, %cst_7 : vector<1x4096xi1>
      %35 = arith.andi %33, %34 : vector<1x4096xi1>
      %36 = arith.extui %35 : vector<1x4096xi1> to vector<1x4096xi32>
      %37 = arith.addi %36, %3 : vector<1x4096xi32>
      %c0_8 = arith.constant 0 : index
      %c0_9 = arith.constant 0 : index
      %38 = vector.load %arg2[%c0_8, %c0_9] : memref<8x4096xf32, #tpu.memory_space<vmem>>, vector<8x4096xf32>
      %cst_10 = arith.constant 0.000000e+00 : f32
      %39 = vector.shape_cast %35 : vector<1x4096xi1> to vector<1x4096xi1>
      %40 = vector.broadcast %39 : vector<1x4096xi1> to vector<8x4096xi1>
      %41 = vector.broadcast %cst_10 : f32 to vector<8x4096xf32>
      %42 = arith.select %40, %41, %38 : vector<8x4096xi1>, vector<8x4096xf32>
      %c0_11 = arith.constant 0 : index
      %c0_12 = arith.constant 0 : index
      %43 = vector.load %arg4[%c0_11, %c0_12] : memref<8x1xf32, #tpu.memory_space<vmem>>, vector<8x1xf32>
      %44 = vector.shape_cast %43 : vector<8x1xf32> to vector<8x1xf32>
      %45 = vector.broadcast %44 : vector<8x1xf32> to vector<8x4096xf32>
      %c65_i32 = arith.constant 65 : i32
      %46 = tpu.dynamic_rotate %42 by %c65_i32 dim 1 : vector<8x4096xf32>, i32 -> vector<8x4096xf32>
      %c64_i32 = arith.constant 64 : i32
      %47 = vector.broadcast %c64_i32 : i32 to vector<1x4096xi32>
      %48 = arith.cmpi sge, %16, %47 : vector<1x4096xi32>
      %c1_i32 = arith.constant 1 : i32
      %49 = vector.broadcast %c1_i32 : i32 to vector<1x4096xi32>
      %50 = arith.cmpi sge, %18, %49 : vector<1x4096xi32>
      %51 = arith.andi %48, %50 : vector<1x4096xi1>
      %cst_13 = arith.constant 0.000000e+00 : f32
      %52 = vector.shape_cast %51 : vector<1x4096xi1> to vector<1x4096xi1>
      %53 = vector.broadcast %52 : vector<1x4096xi1> to vector<8x4096xi1>
      %54 = vector.broadcast %cst_13 : f32 to vector<8x4096xf32>
      %55 = arith.select %53, %46, %54 : vector<8x4096xi1>, vector<8x4096xf32>
      %c0_14 = arith.constant 0 : index
      %c0_15 = arith.constant 0 : index
      %c0_16 = arith.constant 0 : index
      %56 = vector.load %arg3[%c0_14, %c0_15, %c0_16] : memref<9x8x8xf32, #tpu.memory_space<vmem>>, vector<1x8x8xf32>
      %57 = vector.shape_cast %56 : vector<1x8x8xf32> to vector<8x8xf32>
      %cst_17 = arith.constant dense<0.000000e+00> : vector<8x4096xf32>
      %58 = tpu.matmul %57, %55, %cst_17 {dimension_numbers = #tpu.dot_dimension_numbers<[1], [0], [0], [1], [0, 0, 1, 1], [], []>} : vector<8x8xf32>, vector<8x4096xf32>, vector<8x4096xf32> -> vector<8x4096xf32>
      %59 = arith.addf %45, %58 : vector<8x4096xf32>
      %c64_i32_18 = arith.constant 64 : i32
      %60 = tpu.dynamic_rotate %42 by %c64_i32_18 dim 1 : vector<8x4096xf32>, i32 -> vector<8x4096xf32>
      %c64_i32_19 = arith.constant 64 : i32
      %61 = vector.broadcast %c64_i32_19 : i32 to vector<1x4096xi32>
      %62 = arith.cmpi sge, %16, %61 : vector<1x4096xi32>
      %cst_20 = arith.constant 0.000000e+00 : f32
      %63 = vector.shape_cast %62 : vector<1x4096xi1> to vector<1x4096xi1>
      %64 = vector.broadcast %63 : vector<1x4096xi1> to vector<8x4096xi1>
      %65 = vector.broadcast %cst_20 : f32 to vector<8x4096xf32>
      %66 = arith.select %64, %60, %65 : vector<8x4096xi1>, vector<8x4096xf32>
      %c1_21 = arith.constant 1 : index
      %c0_22 = arith.constant 0 : index
      %c0_23 = arith.constant 0 : index
      %67 = vector.load %arg3[%c1_21, %c0_22, %c0_23] : memref<9x8x8xf32, #tpu.memory_space<vmem>>, vector<1x8x8xf32>
      %68 = vector.shape_cast %67 : vector<1x8x8xf32> to vector<8x8xf32>
      %cst_24 = arith.constant dense<0.000000e+00> : vector<8x4096xf32>
      %69 = tpu.matmul %68, %66, %cst_24 {dimension_numbers = #tpu.dot_dimension_numbers<[1], [0], [0], [1], [0, 0, 1, 1], [], []>} : vector<8x8xf32>, vector<8x4096xf32>, vector<8x4096xf32> -> vector<8x4096xf32>
      %70 = arith.addf %59, %69 : vector<8x4096xf32>
      %c63_i32_25 = arith.constant 63 : i32
      %71 = tpu.dynamic_rotate %42 by %c63_i32_25 dim 1 : vector<8x4096xf32>, i32 -> vector<8x4096xf32>
      %c64_i32_26 = arith.constant 64 : i32
      %72 = vector.broadcast %c64_i32_26 : i32 to vector<1x4096xi32>
      %73 = arith.cmpi sge, %16, %72 : vector<1x4096xi32>
      %c63_i32_27 = arith.constant 63 : i32
      %74 = vector.broadcast %c63_i32_27 : i32 to vector<1x4096xi32>
      %75 = arith.cmpi slt, %18, %74 : vector<1x4096xi32>
      %76 = arith.andi %73, %75 : vector<1x4096xi1>
      %cst_28 = arith.constant 0.000000e+00 : f32
      %77 = vector.shape_cast %76 : vector<1x4096xi1> to vector<1x4096xi1>
      %78 = vector.broadcast %77 : vector<1x4096xi1> to vector<8x4096xi1>
      %79 = vector.broadcast %cst_28 : f32 to vector<8x4096xf32>
      %80 = arith.select %78, %71, %79 : vector<8x4096xi1>, vector<8x4096xf32>
      %c2 = arith.constant 2 : index
      %c0_29 = arith.constant 0 : index
      %c0_30 = arith.constant 0 : index
      %81 = vector.load %arg3[%c2, %c0_29, %c0_30] : memref<9x8x8xf32, #tpu.memory_space<vmem>>, vector<1x8x8xf32>
      %82 = vector.shape_cast %81 : vector<1x8x8xf32> to vector<8x8xf32>
      %cst_31 = arith.constant dense<0.000000e+00> : vector<8x4096xf32>
      %83 = tpu.matmul %82, %80, %cst_31 {dimension_numbers = #tpu.dot_dimension_numbers<[1], [0], [0], [1], [0, 0, 1, 1], [], []>} : vector<8x8xf32>, vector<8x4096xf32>, vector<8x4096xf32> -> vector<8x4096xf32>
      %84 = arith.addf %70, %83 : vector<8x4096xf32>
      %c1_i32_32 = arith.constant 1 : i32
      %85 = tpu.dynamic_rotate %42 by %c1_i32_32 dim 1 : vector<8x4096xf32>, i32 -> vector<8x4096xf32>
      %c1_i32_33 = arith.constant 1 : i32
      %86 = vector.broadcast %c1_i32_33 : i32 to vector<1x4096xi32>
      %87 = arith.cmpi sge, %18, %86 : vector<1x4096xi32>
      %cst_34 = arith.constant 0.000000e+00 : f32
      %88 = vector.shape_cast %87 : vector<1x4096xi1> to vector<1x4096xi1>
      %89 = vector.broadcast %88 : vector<1x4096xi1> to vector<8x4096xi1>
      %90 = vector.broadcast %cst_34 : f32 to vector<8x4096xf32>
      %91 = arith.select %89, %85, %90 : vector<8x4096xi1>, vector<8x4096xf32>
      %c3 = arith.constant 3 : index
      %c0_35 = arith.constant 0 : index
      %c0_36 = arith.constant 0 : index
      %92 = vector.load %arg3[%c3, %c0_35, %c0_36] : memref<9x8x8xf32, #tpu.memory_space<vmem>>, vector<1x8x8xf32>
      %93 = vector.shape_cast %92 : vector<1x8x8xf32> to vector<8x8xf32>
      %cst_37 = arith.constant dense<0.000000e+00> : vector<8x4096xf32>
      %94 = tpu.matmul %93, %91, %cst_37 {dimension_numbers = #tpu.dot_dimension_numbers<[1], [0], [0], [1], [0, 0, 1, 1], [], []>} : vector<8x8xf32>, vector<8x4096xf32>, vector<8x4096xf32> -> vector<8x4096xf32>
      %95 = arith.addf %84, %94 : vector<8x4096xf32>
      %c4 = arith.constant 4 : index
      %c0_38 = arith.constant 0 : index
      %c0_39 = arith.constant 0 : index
      %96 = vector.load %arg3[%c4, %c0_38, %c0_39] : memref<9x8x8xf32, #tpu.memory_space<vmem>>, vector<1x8x8xf32>
      %97 = vector.shape_cast %96 : vector<1x8x8xf32> to vector<8x8xf32>
      %cst_40 = arith.constant dense<0.000000e+00> : vector<8x4096xf32>
      %98 = tpu.matmul %97, %42, %cst_40 {dimension_numbers = #tpu.dot_dimension_numbers<[1], [0], [0], [1], [0, 0, 1, 1], [], []>} : vector<8x8xf32>, vector<8x4096xf32>, vector<8x4096xf32> -> vector<8x4096xf32>
      %99 = arith.addf %95, %98 : vector<8x4096xf32>
      %c4095_i32 = arith.constant 4095 : i32
      %100 = tpu.dynamic_rotate %42 by %c4095_i32 dim 1 : vector<8x4096xf32>, i32 -> vector<8x4096xf32>
      %c63_i32_41 = arith.constant 63 : i32
      %101 = vector.broadcast %c63_i32_41 : i32 to vector<1x4096xi32>
      %102 = arith.cmpi slt, %18, %101 : vector<1x4096xi32>
      %cst_42 = arith.constant 0.000000e+00 : f32
      %103 = vector.shape_cast %102 : vector<1x4096xi1> to vector<1x4096xi1>
      %104 = vector.broadcast %103 : vector<1x4096xi1> to vector<8x4096xi1>
      %105 = vector.broadcast %cst_42 : f32 to vector<8x4096xf32>
      %106 = arith.select %104, %100, %105 : vector<8x4096xi1>, vector<8x4096xf32>
      %c5 = arith.constant 5 : index
      %c0_43 = arith.constant 0 : index
      %c0_44 = arith.constant 0 : index
      %107 = vector.load %arg3[%c5, %c0_43, %c0_44] : memref<9x8x8xf32, #tpu.memory_space<vmem>>, vector<1x8x8xf32>
      %108 = vector.shape_cast %107 : vector<1x8x8xf32> to vector<8x8xf32>
      %cst_45 = arith.constant dense<0.000000e+00> : vector<8x4096xf32>
      %109 = tpu.matmul %108, %106, %cst_45 {dimension_numbers = #tpu.dot_dimension_numbers<[1], [0], [0], [1], [0, 0, 1, 1], [], []>} : vector<8x8xf32>, vector<8x4096xf32>, vector<8x4096xf32> -> vector<8x4096xf32>
      %110 = arith.addf %99, %109 : vector<8x4096xf32>
      %c4033_i32 = arith.constant 4033 : i32
      %111 = tpu.dynamic_rotate %42 by %c4033_i32 dim 1 : vector<8x4096xf32>, i32 -> vector<8x4096xf32>
      %c4032_i32 = arith.constant 4032 : i32
      %112 = vector.broadcast %c4032_i32 : i32 to vector<1x4096xi32>
      %113 = arith.cmpi slt, %16, %112 : vector<1x4096xi32>
      %c1_i32_46 = arith.constant 1 : i32
      %114 = vector.broadcast %c1_i32_46 : i32 to vector<1x4096xi32>
      %115 = arith.cmpi sge, %18, %114 : vector<1x4096xi32>
      %116 = arith.andi %113, %115 : vector<1x4096xi1>
      %cst_47 = arith.constant 0.000000e+00 : f32
      %117 = vector.shape_cast %116 : vector<1x4096xi1> to vector<1x4096xi1>
      %118 = vector.broadcast %117 : vector<1x4096xi1> to vector<8x4096xi1>
      %119 = vector.broadcast %cst_47 : f32 to vector<8x4096xf32>
      %120 = arith.select %118, %111, %119 : vector<8x4096xi1>, vector<8x4096xf32>
      %c6 = arith.constant 6 : index
      %c0_48 = arith.constant 0 : index
      %c0_49 = arith.constant 0 : index
      %121 = vector.load %arg3[%c6, %c0_48, %c0_49] : memref<9x8x8xf32, #tpu.memory_space<vmem>>, vector<1x8x8xf32>
      %122 = vector.shape_cast %121 : vector<1x8x8xf32> to vector<8x8xf32>
      %cst_50 = arith.constant dense<0.000000e+00> : vector<8x4096xf32>
      %123 = tpu.matmul %122, %120, %cst_50 {dimension_numbers = #tpu.dot_dimension_numbers<[1], [0], [0], [1], [0, 0, 1, 1], [], []>} : vector<8x8xf32>, vector<8x4096xf32>, vector<8x4096xf32> -> vector<8x4096xf32>
      %124 = arith.addf %110, %123 : vector<8x4096xf32>
      %c4032_i32_51 = arith.constant 4032 : i32
      %125 = tpu.dynamic_rotate %42 by %c4032_i32_51 dim 1 : vector<8x4096xf32>, i32 -> vector<8x4096xf32>
      %c4032_i32_52 = arith.constant 4032 : i32
      %126 = vector.broadcast %c4032_i32_52 : i32 to vector<1x4096xi32>
      %127 = arith.cmpi slt, %16, %126 : vector<1x4096xi32>
      %cst_53 = arith.constant 0.000000e+00 : f32
      %128 = vector.shape_cast %127 : vector<1x4096xi1> to vector<1x4096xi1>
      %129 = vector.broadcast %128 : vector<1x4096xi1> to vector<8x4096xi1>
      %130 = vector.broadcast %cst_53 : f32 to vector<8x4096xf32>
      %131 = arith.select %129, %125, %130 : vector<8x4096xi1>, vector<8x4096xf32>
      %c7 = arith.constant 7 : index
      %c0_54 = arith.constant 0 : index
      %c0_55 = arith.constant 0 : index
      %132 = vector.load %arg3[%c7, %c0_54, %c0_55] : memref<9x8x8xf32, #tpu.memory_space<vmem>>, vector<1x8x8xf32>
      %133 = vector.shape_cast %132 : vector<1x8x8xf32> to vector<8x8xf32>
      %cst_56 = arith.constant dense<0.000000e+00> : vector<8x4096xf32>
      %134 = tpu.matmul %133, %131, %cst_56 {dimension_numbers = #tpu.dot_dimension_numbers<[1], [0], [0], [1], [0, 0, 1, 1], [], []>} : vector<8x8xf32>, vector<8x4096xf32>, vector<8x4096xf32> -> vector<8x4096xf32>
      %135 = arith.addf %124, %134 : vector<8x4096xf32>
      %c4031_i32 = arith.constant 4031 : i32
      %136 = tpu.dynamic_rotate %42 by %c4031_i32 dim 1 : vector<8x4096xf32>, i32 -> vector<8x4096xf32>
      %c4032_i32_57 = arith.constant 4032 : i32
      %137 = vector.broadcast %c4032_i32_57 : i32 to vector<1x4096xi32>
      %138 = arith.cmpi slt, %16, %137 : vector<1x4096xi32>
      %c63_i32_58 = arith.constant 63 : i32
      %139 = vector.broadcast %c63_i32_58 : i32 to vector<1x4096xi32>
      %140 = arith.cmpi slt, %18, %139 : vector<1x4096xi32>
      %141 = arith.andi %138, %140 : vector<1x4096xi1>
      %cst_59 = arith.constant 0.000000e+00 : f32
      %142 = vector.shape_cast %141 : vector<1x4096xi1> to vector<1x4096xi1>
      %143 = vector.broadcast %142 : vector<1x4096xi1> to vector<8x4096xi1>
      %144 = vector.broadcast %cst_59 : f32 to vector<8x4096xf32>
      %145 = arith.select %143, %136, %144 : vector<8x4096xi1>, vector<8x4096xf32>
      %c8 = arith.constant 8 : index
      %c0_60 = arith.constant 0 : index
      %c0_61 = arith.constant 0 : index
      %146 = vector.load %arg3[%c8, %c0_60, %c0_61] : memref<9x8x8xf32, #tpu.memory_space<vmem>>, vector<1x8x8xf32>
      %147 = vector.shape_cast %146 : vector<1x8x8xf32> to vector<8x8xf32>
      %cst_62 = arith.constant dense<0.000000e+00> : vector<8x4096xf32>
      %148 = tpu.matmul %147, %145, %cst_62 {dimension_numbers = #tpu.dot_dimension_numbers<[1], [0], [0], [1], [0, 0, 1, 1], [], []>} : vector<8x8xf32>, vector<8x4096xf32>, vector<8x4096xf32> -> vector<8x4096xf32>
      %149 = arith.addf %135, %148 : vector<8x4096xf32>
      %cst_63 = arith.constant 0.000000e+00 : f32
      %cst_64 = arith.constant 1.000000e+00 : f32
      %150 = vector.broadcast %cst_63 : f32 to vector<8x4096xf32>
      %151 = arith.maximumf %150, %149 : vector<8x4096xf32>
      %152 = vector.broadcast %cst_64 : f32 to vector<8x4096xf32>
      %153 = arith.minimumf %152, %151 : vector<8x4096xf32>
      %154 = vector.shape_cast %35 : vector<1x4096xi1> to vector<1x4096xi1>
      %155 = vector.broadcast %154 : vector<1x4096xi1> to vector<8x4096xi1>
      %156 = arith.select %155, %153, %42 : vector<8x4096xi1>, vector<8x4096xf32>
      %157 = vector.shape_cast %15 : vector<1x1xf32> to vector<1x1xf32>
      %158 = vector.broadcast %157 : vector<1x1xf32> to vector<1x4096xf32>
      %cst_65 = arith.constant 5.000000e-01 : f32
      %159 = vector.broadcast %cst_65 : f32 to vector<1x4096xf32>
      %160 = arith.cmpf ole, %158, %159 : vector<1x4096xf32>
      %c0_66 = arith.constant 0 : index
      %c0_67 = arith.constant 0 : index
      %161 = vector.load %arg2[%c0_66, %c0_67] : memref<8x4096xf32, #tpu.memory_space<vmem>>, vector<8x4096xf32>
      %162 = vector.shape_cast %160 : vector<1x4096xi1> to vector<1x4096xi1>
      %163 = vector.broadcast %162 : vector<1x4096xi1> to vector<8x4096xi1>
      %164 = arith.select %163, %156, %161 : vector<8x4096xi1>, vector<8x4096xf32>
      %c0_68 = arith.constant 0 : index
      %c0_69 = arith.constant 0 : index
      %165 = vector.load %arg5[%c0_68, %c0_69] : memref<8x4096xf32, #tpu.memory_space<vmem>>, vector<8x4096xf32>
      tpu.vector_store %arg5[%c0_68, %c0_69], %164 {strides = array<i32>} : memref<8x4096xf32, #tpu.memory_space<vmem>>, vector<8x4096xf32>,
      %166 = arith.select %160, %37, %3 : vector<1x4096xi1>, vector<1x4096xi32>
      %c0_70 = arith.constant 0 : index
      %c0_71 = arith.constant 0 : index
      %167 = vector.load %arg6[%c0_70, %c0_71] : memref<1x4096xi32, #tpu.memory_space<vmem>>, vector<1x4096xi32>
      tpu.vector_store %arg6[%c0_70, %c0_71], %166 {strides = array<i32>} : memref<1x4096xi32, #tpu.memory_space<vmem>>, vector<1x4096xi32>,
    } else {
    }
    %true = arith.constant true
    %21 = arith.xori %2, %true : i1
    %22 = arith.extui %21 : i1 to i32
    %c0_i32_5 = arith.constant 0 : i32
    %23 = arith.cmpi ne, %22, %c0_i32_5 : i32
    scf.if %23 {
      %c0_6 = arith.constant 0 : index
      %c0_7 = arith.constant 0 : index
      %24 = vector.load %arg2[%c0_6, %c0_7] : memref<8x4096xf32, #tpu.memory_space<vmem>>, vector<8x4096xf32>
      %c0_8 = arith.constant 0 : index
      %c0_9 = arith.constant 0 : index
      %25 = vector.load %arg5[%c0_8, %c0_9] : memref<8x4096xf32, #tpu.memory_space<vmem>>, vector<8x4096xf32>
      tpu.vector_store %arg5[%c0_8, %c0_9], %24 {strides = array<i32>} : memref<8x4096xf32, #tpu.memory_space<vmem>>, vector<8x4096xf32>,
      %c0_10 = arith.constant 0 : index
      %c0_11 = arith.constant 0 : index
      %26 = vector.load %arg6[%c0_10, %c0_11] : memref<1x4096xi32, #tpu.memory_space<vmem>>, vector<1x4096xi32>
      tpu.vector_store %arg6[%c0_10, %c0_11], %3 {strides = array<i32>} : memref<1x4096xi32, #tpu.memory_space<vmem>>, vector<1x4096xi32>,
    } else {
    }
    return
  }
}

</mosaic_0001>

<bundles_post_ra>
// kernel: inpaint_shadow4cloud_aug.1
= control target key start
LH: loop header
LB: loop body
LE: loop exit
PB: predicated region body
PF: predicated region fallthrough
CT: control target
= control target key end

     0   :  { %12 = vsyncpa [#allocation3], 0  ;;  %s19226_s0 = inlined_call_operand.vmem [shape: f32[2], index: 0, kind: input, shape index: {}]   ;;  %s19227_s1 = inlined_call_operand.vmem [shape: s32[1,4096], index: 1, kind: input, shape index: {}, may-alias: {1,6}]   ;;  %s19228_s2 = inlined_call_operand.vmem [shape: f32[8,4096], index: 2, kind: input, shape index: {}, may-alias: {2,5}]   ;;  %s19229_s3 = inlined_call_operand.vmem [shape: f32[9,8,8], index: 3, kind: input, shape index: {}]   ;;  %s19230_s4 = inlined_call_operand.vmem [shape: f32[8,1], index: 4, kind: input, shape index: {}]   ;;  %s19231_s5 = inlined_call_operand.vmem [shape: f32[8,4096], index: 5, kind: output, shape index: {0}, may-alias: {2,5}]   ;;  %s19232_s6 = inlined_call_operand.vmem [shape: s32[1,4096], index: 6, kind: output, shape index: {1}, may-alias: {1,6}]  }
   0x1   :  { %s19_s23 = sshll.u32 %s19226_s0, 4  ;;  %s20_s23 = int_to_ptr.vmem [resolvable:$true] %s19_s23 }
   0x2   :  { %s14671_s24 = scalar_lea.vmem %s20_s23, 16  ;;  %p14676_p1 = scmp.lt.s32.totalorder %s20_s23, %s20_s23 }
   0x3   :  { %p14672_p0 = scmp.ne.s32.totalorder %s20_s23, %s14671_s24  ;;  %p14677_p2 = scmp.lt.s32.totalorder %s14671_s24, %s14671_s24 }
   0x5   :  { %p14678_p3 = por %p14677_p2, %p14676_p1 }
   0x7   :  { %p14679_p4 = pnand %p14678_p3, %p14672_p0 }
   0x9   :  { %14682 = shalt.err (!%p14679_p4)
}
   0xa   :  { %s14685_s25 = smov [#allocation2]  }
   0xb   :  { %22 = dma.vmem_to_smem %s20_s23, 16, %s14685_s25, [#allocation3]  }
   0xc   :  { %14683 = dma.done.wait [#allocation3], 16  }
   0xd   :  { %14684 = vsyncadd [#allocation3], 4294967280 }
   0xe   :  { %34 = sfence }
   0xf   :  { %s14735_s26 = sld [smem:[#allocation2]]  ;;  %s14737_s27 = sld [smem:[#allocation2 + $0x1]]  ;;  %v54_v0 = vlaneseq  ;;  %v14742_v1 = vld [vmem:[%s19227_s1] sm:$0xff]  ;;  %v14752_v3 = vld [vmem:[%s19227_s1 + $0x8] sm:$0xff]  ;;  %v19233_v7 = vmov 0.0   ;;  %v14772_v10 = vld [vmem:[%s19227_s1 + $0x10] sm:$0xff] }
  0x10   :  { %19656 = vst [vmem:[#allocation5_spill] sm:$0xff] %v14742_v1  ;;  %vm42_vm0 = vcmp.eq.s32.totalorder %v14742_v1, 3  ;;  %19657 = vst [vmem:[#allocation6_spill] sm:$0xff] %v14752_v3  ;;  %vm43_vm1 = vcmp.eq.s32.totalorder %v14752_v3, 3  ;;  %vm214_vm2 = vcmask 1040384   ;;  %vm44_vm3 = vcmp.eq.s32.totalorder %v14772_v10, 3 }
  0x11   :  { %v14744_v2 = vshrl.u32 %v54_v0, 7  ;;  %v46_v8 = vsel %vm42_vm0, 3.0, %v19233_v7  ;;  %19658 = vst [vmem:[#allocation7_spill] sm:$0xff] %v14772_v10  ;;  %v47_v19 = vsel %vm43_vm1, 3.0, %v19233_v7  ;;  %v14802_v24 = vsel %vm44_vm3, 3.0, %v19233_v7 }
  0x12   :  { %v14821_v43 = vand.u32 127, %v54_v0 }
  0x13   :  { %v14755_v4 = vsub.s32 0, %v14744_v2  ;;  %v14758_v5 = vsub.s32 1, %v14744_v2  ;;  %v14761_v6 = vsub.s32 2, %v14744_v2  ;;  %v14767_v9 = vsub.s32 3, %v14744_v2 }
  0x14   :  { %v14779_v14 = vsub.s32 4, %v14744_v2  ;;  %v14782_v15 = vsub.s32 5, %v14744_v2  ;;  %v14785_v16 = vsub.s32 6, %v14744_v2  ;;  %v14790_v18 = vsub.s32 7, %v14744_v2 }
  0x15   :  { %p37_p5 = scmp.gt.f32.partialorder %s14735_s26, %s14737_s27  ;;  %v57_v11 = vrot.slane %v46_v8, %v14755_v4  ;;  %v61_v12 = vrot.slane %v46_v8, %v14758_v5  ;;  %v65_v13 = vrot.slane %v46_v8, %v14761_v6  ;;  %v69_v17 = vrot.slane %v46_v8, %v14767_v9 }
  0x16   :  { %v73_v20 = vrot.slane %v46_v8, %v14779_v14  ;;  %v77_v25 = vrot.slane %v46_v8, %v14782_v15  ;;  %v81_v26 = vrot.slane %v46_v8, %v14785_v16  ;;  %v85_v28 = vrot.slane %v46_v8, %v14790_v18 }
  0x17   :  { %v215_v21 = vsel %vm214_vm2, %v57_v11, 0.0  ;;  %v216_v22 = vsel %vm214_vm2, %v61_v12, 0.0  ;;  %v218_v23 = vsel %vm214_vm2, %v65_v13, 0.0  ;;  %v89_v29 = vrot.slane %v47_v19, %v14755_v4 }
  0x18   :  { %v217_v27 = vadd.f32 %v216_v22, %v215_v21  ;;  %v93_v30 = vrot.slane %v47_v19, %v14758_v5  ;;  %v220_v31 = vsel %vm214_vm2, %v69_v17, 0.0  ;;  %v97_v32 = vrot.slane %v47_v19, %v14761_v6 }
  0x19   :  { %v101_v33 = vrot.slane %v47_v19, %v14767_v9  ;;  %v105_v34 = vrot.slane %v47_v19, %v14779_v14  ;;  %v109_v36 = vrot.slane %v47_v19, %v14782_v15  ;;  %v113_v37 = vrot.slane %v47_v19, %v14785_v16 }
  0x1a   :  { %v219_v35 = vadd.f32 %v218_v23, %v217_v27  ;;  %v117_v38 = vrot.slane %v47_v19, %v14790_v18  ;;  %v222_v39 = vsel %vm214_vm2, %v73_v20, 0.0  ;;  %v121_v40 = vrot.slane %v14802_v24, %v14755_v4 }
  0x1b   :  { %v224_v44 = vsel %vm214_vm2, %v77_v25, 0.0  ;;  %v226_v45 = vsel %vm214_vm2, %v81_v26, 0.0  ;;  %v228_v46 = vsel %vm214_vm2, %v85_v28, 0.0  ;;  %v230_v47 = vsel %vm214_vm2, %v89_v29, 0.0 }
  0x1c   :  { %v221_v42 = vadd.f32 %v220_v31, %v219_v35  ;;  %v232_v49 = vsel %vm214_vm2, %v93_v30, 0.0  ;;  %v234_v50 = vsel %vm214_vm2, %v97_v32, 0.0  ;;  %v236_v51 = vsel %vm214_vm2, %v101_v33, 0.0 }
  0x1d   :  { %v238_v52 = vsel %vm214_vm2, %v105_v34, 0.0  ;;  %v14832_v53 = vsel %vm214_vm2, %v109_v36, 0.0  ;;  %v14835_v54 = vsel %vm214_vm2, %v113_v37, 0.0  ;;  %v14838_v55 = vsel %vm214_vm2, %v117_v38, 0.0 }
  0x1e   :  { %v223_v48 = vadd.f32 %v222_v39, %v221_v42  ;;  %v14841_v57 = vadd.s32 128, %v14821_v43  ;;  %v14844_v58 = vadd.s32 256, %v14821_v43  ;;  %v14847_v59 = vadd.s32 384, %v14821_v43 }
  0x1f   :  { %v14850_v60 = vadd.s32 512, %v14821_v43  ;;  %v14853_v61 = vadd.s32 640, %v14821_v43  ;;  %v14856_v62 = vadd.s32 768, %v14821_v43  ;;  %v298_v63 = vadd.s32 896, %v14821_v43 }
  0x20   :  { %v225_v56 = vadd.f32 %v224_v44, %v223_v48  ;;  %19659 = vst [vmem:[#allocation8_spill] sm:$0xff] %v14841_v57  ;;  %19660 = vst [vmem:[#allocation9_spill] sm:$0xff] %v14844_v58  ;;  %v299_v8 = vadd.s32 1024, %v14821_v43  ;;  %v300_v11 = vadd.s32 1152, %v14821_v43  ;;  %v301_v12 = vadd.s32 1280, %v14821_v43 }
  0x21   :  { %19661 = vst [vmem:[#allocation10_spill] sm:$0xff] %v14847_v59  ;;  %19662 = vst [vmem:[#allocation11_spill] sm:$0xff] %v14850_v60  ;;  %v302_v13 = vadd.s32 1408, %v14821_v43  ;;  %v303_v17 = vadd.s32 1536, %v14821_v43  ;;  %v304_v19 = vadd.s32 1664, %v14821_v43  ;;  %v305_v20 = vadd.s32 1792, %v14821_v43 }
  0x22   :  { %19663 = vst [vmem:[#allocation12_spill] sm:$0xff] %v14853_v61  ;;  %v227_v0 = vadd.f32 %v226_v45, %v225_v56  ;;  %v306_v22 = vadd.s32 1920, %v14821_v43  ;;  %v307_v23 = vadd.s32 2048, %v14821_v43  ;;  %v308_v25 = vadd.s32 2176, %v14821_v43 }
  0x23   :  { %v309_v26 = vadd.s32 2304, %v14821_v43  ;;  %v310_v27 = vadd.s32 2432, %v14821_v43  ;;  %v311_v28 = vadd.s32 2560, %v14821_v43  ;;  %v312_v29 = vadd.s32 2688, %v14821_v43 }
  0x24   :  { %v229_v21 = vadd.f32 %v228_v46, %v227_v0  ;;  %v313_v31 = vadd.s32 2816, %v14821_v43  ;;  %v314_v32 = vadd.s32 2944, %v14821_v43  ;;  %v315_v33 = vadd.s32 3072, %v14821_v43 }
  0x25   :  { %v316_v34 = vadd.s32 3200, %v14821_v43  ;;  %v317_v35 = vadd.s32 3328, %v14821_v43  ;;  %v318_v36 = vadd.s32 3456, %v14821_v43  ;;  %v319_v37 = vadd.s32 3584, %v14821_v43 }
  0x26   :  { %v231_v30 = vadd.f32 %v230_v47, %v229_v21  ;;  %v320_v39 = vadd.s32 3712, %v14821_v43  ;;  %v321_v42 = vadd.s32 3840, %v14821_v43  ;;  %v14883_v44 = vadd.s32 3968, %v14821_v43 }
  0x27   :  { %v14892_v21 = vand.u32 63, %v14856_v62  ;;  %v14896_v7 = vand.u32 63, %v299_v8  ;;  %v14898_v41 = vand.u32 63, %v300_v11  ;;  %v14900_v45 = vand.u32 63, %v301_v12 }
  0x28   :  { %v233_v38 = vadd.f32 %v232_v49, %v231_v30  ;;  %19664 = vst [vmem:[#allocation13_spill] sm:$0xff] %v14883_v44  ;;  %v14894_v30 = vand.u32 63, %v298_v63  ;;  %v14902_v47 = vand.u32 63, %v302_v13  ;;  %v14904_v48 = vand.u32 63, %v303_v17 }
  0x29   :  { %19665 = vst [vmem:[#allocation14_spill] sm:$0xff] %v14892_v21  ;;  %19667 = vst [vmem:[#allocation16_spill] sm:$0xff] %v14896_v7  ;;  %v14910_v0 = vand.u32 63, %v306_v22  ;;  %v14912_v49 = vand.u32 63, %v307_v23  ;;  %v14914_v63 = vand.u32 63, %v308_v25  ;;  %v14916_v11 = vand.u32 63, %v309_v26 }
  0x2a   :  { %v235_v56 = vadd.f32 %v234_v50, %v233_v38  ;;  %19666 = vst [vmem:[#allocation15_spill] sm:$0xff] %v14894_v30  ;;  %19668 = vst [vmem:[#allocation17_spill] sm:$0xff] %v14898_v41  ;;  %v14906_v50 = vand.u32 63, %v304_v19  ;;  %v14908_v38 = vand.u32 63, %v305_v20  ;;  %v14918_v12 = vand.u32 63, %v310_v27 }
  0x2b   :  { %19669 = vst [vmem:[#allocation18_spill] sm:$0xff] %v14900_v45  ;;  %19670 = vst [vmem:[#allocation19_spill] sm:$0xff] %v14902_v47  ;;  %v14922_v13 = vand.u32 63, %v312_v29  ;;  %v14924_v17 = vand.u32 63, %v313_v31  ;;  %v14926_v19 = vand.u32 63, %v314_v32  ;;  %v14928_v20 = vand.u32 63, %v315_v33 }
  0x2c   :  { %v237_v46 = vadd.f32 %v236_v51, %v235_v56  ;;  %19671 = vst [vmem:[#allocation20_spill] sm:$0xff] %v14904_v48  ;;  %19672 = vst [vmem:[#allocation21_spill] sm:$0xff] %v14906_v50  ;;  %v14920_v51 = vand.u32 63, %v311_v28  ;;  %v14931_v23 = vand.u32 63, %v316_v34  ;;  %v14933_v25 = vand.u32 63, %v317_v35 }
  0x2d   :  { %19673 = vst [vmem:[#allocation22_spill] sm:$0xff] %v14908_v38  ;;  %19674 = vst [vmem:[#allocation23_spill] sm:$0xff] %v14910_v0  ;;  %v14937_v26 = vand.u32 63, %v319_v37  ;;  %v14939_v27 = vand.u32 63, %v320_v39  ;;  %v14941_v28 = vand.u32 63, %v321_v42  ;;  %v14944_v29 = vand.u32 63, %v14883_v44 }
  0x2e   :  { %19675 = vst [vmem:[#allocation24_spill] sm:$0xff] %v14912_v49  ;;  %19676 = vst [vmem:[#allocation25_spill] sm:$0xff] %v14914_v63  ;;  %v239_v8 = vadd.f32 %v238_v52, %v237_v46  ;;  %v14935_v52 = vand.u32 63, %v318_v36  ;;  %v246_v32 = vsel %vm214_vm2, %v121_v40, 0.0  ;;  %v133_v34 = vrot.slane %v14802_v24, %v14767_v9 }
  0x2f   :  { %19677 = vst [vmem:[#allocation26_spill] sm:$0xff] %v14916_v11  ;;  %19678 = vst [vmem:[#allocation27_spill] sm:$0xff] %v14918_v12  ;;  %v19691_v35 = vrot.slane %v14802_v24, %v14758_v5  ;;  %v137_v39 = vrot.slane %v14802_v24, %v14779_v14  ;;  %v141_v42 = vrot.slane %v14802_v24, %v14782_v15 }
  0x30   :  { %19679 = vst [vmem:[#allocation28_spill] sm:$0xff] %v14920_v51  ;;  %19680 = vst [vmem:[#allocation29_spill] sm:$0xff] %v14922_v13  ;;  %v241_v22 = vadd.f32 %v14832_v53, %v239_v8  ;;  %v129_v53 = vrot.slane %v14802_v24, %v14761_v6  ;;  %v252_v46 = vsel %vm214_vm2, %v133_v34, 0.0  ;;  %v145_v8 = vrot.slane %v14802_v24, %v14785_v16 }
  0x31   :  { %19681 = vst [vmem:[#allocation30_spill] sm:$0xff] %v14924_v17  ;;  %19682 = vst [vmem:[#allocation31_spill] sm:$0xff] %v14926_v19  ;;  %v248_v36 = vsel %vm214_vm2, %v19691_v35, 0.0  ;;  %v256_v35 = vsel %vm214_vm2, %v141_v42, 0.0 }
  0x32   :  { %19683 = vst [vmem:[#allocation32_spill] sm:$0xff] %v14928_v20  ;;  %19684 = vst [vmem:[#allocation33_spill] sm:$0xff] %v14931_v23  ;;  %v243_v31 = vadd.f32 %v14835_v54, %v241_v22  ;;  %v14963_v54 = vld [vmem:[%s19227_s1 + $0x18] sm:$0xff]  ;;  %v250_v40 = vsel %vm214_vm2, %v129_v53, 0.0  ;;  %v254_v22 = vsel %vm214_vm2, %v137_v39, 0.0  ;;  %v149_v53 = vrot.slane %v14802_v24, %v14790_v18 }
  0x33   :  { %19685 = vst [vmem:[#allocation34_spill] sm:$0xff] %v14933_v25  ;;  %19686 = vst [vmem:[#allocation35_spill] sm:$0xff] %v14935_v52  ;;  %vm45_vm4 = vcmp.eq.s32.totalorder %v14963_v54, 3  ;;  %v258_v34 = vsel %vm214_vm2, %v145_v8, 0.0 }
  0x34   :  { %19687 = vst [vmem:[#allocation36_spill] sm:$0xff] %v14937_v26  ;;  %19688 = vst [vmem:[#allocation37_spill] sm:$0xff] %v14939_v27  ;;  %v245_v33 = vadd.f32 %v14838_v55, %v243_v31  ;;  %v19693_v31 = vmov 0.0   ;;  %v260_v39 = vsel %vm214_vm2, %v149_v53, 0.0 }
  0x35   :  { %19689 = vst [vmem:[#allocation38_spill] sm:$0xff] %v14941_v28  ;;  %19690 = vst [vmem:[#allocation39_spill] sm:$0xff] %v14944_v29 }
  0x36   :  { %19692 = vst [vmem:[#allocation40_spill] sm:$0xff] %v14963_v54  ;;  %v247_v37 = vadd.f32 %v246_v32, %v245_v33  ;;  %v49_v32 = vsel %vm45_vm4, 3.0, %v19693_v31 }
  0x37   :  { %v161_v60 = vrot.slane %v49_v32, %v14761_v6  ;;  %v165_v24 = vrot.slane %v49_v32, %v14767_v9  ;;  %v169_v31 = vrot.slane %v49_v32, %v14779_v14 }
  0x38   :  { %v249_v55 = vadd.f32 %v248_v36, %v247_v37  ;;  %v153_v37 = vrot.slane %v49_v32, %v14755_v4 }
  0x39   :  { %v266_v8 = vsel %vm214_vm2, %v161_v60, 0.0  ;;  %v268_v53 = vsel %vm214_vm2, %v165_v24, 0.0 }
  0x3a   :  { %v251_v56 = vadd.f32 %v250_v40, %v249_v55  ;;  %v157_v55 = vrot.slane %v49_v32, %v14758_v5 }
  0x3c   :  { %v253_v33 = vadd.f32 %v252_v46, %v251_v56  ;;  %v262_v46 = vsel %vm214_vm2, %v153_v37, 0.0  ;;  %v264_v42 = vsel %vm214_vm2, %v157_v55, 0.0  ;;  %v270_v37 = vsel %vm214_vm2, %v169_v31, 0.0 }
  0x3e   :  { %v255_v36 = vadd.f32 %v254_v22, %v253_v33 }
  0x40   :  { %v257_v40 = vadd.f32 %v256_v35, %v255_v36  ;;  %v173_v35 = vrot.slane %v49_v32, %v14782_v15 }
  0x42   :  { %v259_v44 = vadd.f32 %v258_v34, %v257_v40  ;;  %v177_v34 = vrot.slane %v49_v32, %v14785_v16  ;;  %v181_v40 = vrot.slane %v49_v32, %v14790_v18  ;;  %v272_v55 = vsel %vm214_vm2, %v173_v35, 0.0 }
  0x44   :  { %v261_v56 = vadd.f32 %v260_v39, %v259_v44  ;;  %v276_v60 = vsel %vm214_vm2, %v181_v40, 0.0 }
  0x46   :  { %v263_v22 = vadd.f32 %v262_v46, %v261_v56  ;;  %v274_v46 = vsel %vm214_vm2, %v177_v34, 0.0 }
  0x48   :  { %v265_v33 = vadd.f32 %v264_v42, %v263_v22 }
  0x4a   :  { %v267_v36 = vadd.f32 %v266_v8, %v265_v33 }
  0x4c   :  { %v269_v44 = vadd.f32 %v268_v53, %v267_v36 }
  0x4e   :  { %v271_v39 = vadd.f32 %v270_v37, %v269_v44 }
  0x50   :  { %v273_v56 = vadd.f32 %v272_v55, %v271_v39 }
  0x52   :  { %v275_v42 = vadd.f32 %v274_v46, %v273_v56 }
  0x54   :  { %v277_v22 = vadd.f32 %v276_v60, %v275_v42 }
  0x56   :  { %278 = vadd.xlane.f32.xlu0 %v277_v22 }
  0xe3   :  { %v279_v24 = vpop.xlane.xlu0 %278 }
  0xe4   :  { %v280_v8 = vrot.slane %v279_v24, 4 }
  0xe6   :  { %v281_v33 = vadd.f32 %v280_v8, %v279_v24 }
  0xe8   :  { %v282_v61 = vrot.slane %v281_v33, 2 }
  0xea   :  { %v283_v58 = vadd.f32 %v282_v61, %v281_v33 }
  0xec   :  { %v284_v31 = vrot.slane %v283_v58, 1 }
  0xee   :  { %v285_v53 = vadd.f32 %v284_v31, %v283_v58 }
  0xf0   :  { %14609 = vpush %v285_v53 }
 0x11f   :  { %357 = sbr.rel (!%p37_p5) target bundleno = 1300 (0x514), region = 29 }
 0x121   :  { %s14610_s1 = spop %14609 }
 0x122   :  { %v287_v32 = vstv %s14610_s1 }
 0x123   :  { %v14999_v35 = vmul.f32 5.086263e-06, %v287_v32 }
 0x125   :  { %19694 = vst [vmem:[#allocation41_spill] sm:$0xff] %v14999_v35 }
 0x126   :  { %v19246_v36 = vmov 0   ;;  %s14688_s11 = smov 75   ;;  %s14689_s18 = smov 65   ;;  %vm14692_vm6 = vmmov 1   ;;  %vm19307_vm10 = vcmp.lt.s32.totalorder %v14821_v43, 75  ;;  %vm650_vm11 = vcmp.ge.s32.totalorder %v14944_v29, 11 }
 0x127   :  { %v361_v34 = vsel %vm45_vm4, 1, %v19246_v36  ;;  %v358_v61 = vsel %vm42_vm0, 1, %v19246_v36  ;;  %14623 = vset.pattern.permute.xlu1 %v19246_v36  ;;  %14624 = vset.pattern.permute.xlu0 %v19246_v36  ;;  %v359_v22 = vsel %vm43_vm1, 1, %v19246_v36  ;;  %s14690_s25 = smov 64   ;;  %vm750_vm7 = vmxor %vm45_vm4, %vm14692_vm6  ;;  %vm593_vm12 = vcmp.ge.s32.totalorder %v14856_v62, 832  ;;  %s14696_s0 = smov 127  }
 0x128   :  { %v461_v58 = vrot.slane %v361_v34, %v14755_v4  ;;  %v365_v37 = vrot.slane %v358_v61, %v14755_v4  ;;  %v465_v44 = vrot.slane %v361_v34, %v14758_v5  ;;  %v369_v40 = vrot.slane %v358_v61, %v14758_v5  ;;  %vm747_vm8 = vmxor %vm42_vm0, %vm14692_vm6 }
 0x129   :  { %v489_v55 = vrot.slane %v361_v34, %v14790_v18  ;;  %v373_v39 = vrot.slane %v358_v61, %v14761_v6  ;;  %v377_v46 = vrot.slane %v358_v61, %v14767_v9  ;;  %v381_v56 = vrot.slane %v358_v61, %v14779_v14  ;;  %vm748_vm9 = vmxor %vm43_vm1, %vm14692_vm6 }
 0x12a   :  { %538 = vrot.lane.b32.xlu0 %v461_v58, %s14688_s11  ;;  %490 = vrot.lane.b32.xlu1 %v365_v37, %s14688_s11  ;;  %v385_v60 = vrot.slane %v358_v61, %v14782_v15  ;;  %v389_v42 = vrot.slane %v358_v61, %v14785_v16  ;;  %v393_v24 = vrot.slane %v358_v61, %v14790_v18  ;;  %v360_v58 = vsel %vm44_vm3, 1, %v19246_v36  ;;  %vm15205_vm15 = vmxor %vm44_vm3, %vm14692_vm6 }
 0x12b   :  { %v397_v8 = vrot.slane %v359_v22, %v14755_v4  ;;  %v401_v33 = vrot.slane %v359_v22, %v14758_v5  ;;  %v405_v31 = vrot.slane %v359_v22, %v14761_v6  ;;  %v409_v53 = vrot.slane %v359_v22, %v14767_v9 }
 0x12c   :  { %v413_v32 = vrot.slane %v359_v22, %v14779_v14  ;;  %v417_v34 = vrot.slane %v359_v22, %v14782_v15  ;;  %v421_v61 = vrot.slane %v359_v22, %v14785_v16  ;;  %v425_v37 = vrot.slane %v359_v22, %v14790_v18  ;;  %v1139_v22 = vld [vmem:[%s19228_s2] sm:$0xff] }
 0x12d   :  { %vm625_vm14 = vcmp.ge.s32.totalorder %v14892_v21, 11  ;;  %vm626_vm0 = vcmp.ge.s32.totalorder %v14894_v30, 11  ;;  %v15242_v57 = vrot.slane %v14752_v3, %v14767_v9  ;;  %v15263_v52 = vrot.slane %v14752_v3, %v14782_v15 }
 0x12e   :  { %540 = vrot.lane.b32.xlu0 %v465_v44, %s14688_s11  ;;  %492 = vrot.lane.b32.xlu1 %v369_v40, %s14688_s11  ;;  %v429_v44 = vrot.slane %v360_v58, %v14755_v4  ;;  %v433_v40 = vrot.slane %v360_v58, %v14758_v5  ;;  %v15274_v28 = vrot.slane %v14752_v3, %v14785_v16 }
 0x12f   :  { %v15278_v25 = vrot.slane %v14752_v3, %v14790_v18  ;;  %v15290_v59 = vrot.slane %v14772_v10, %v14755_v4  ;;  %v15294_v20 = vrot.slane %v14772_v10, %v14758_v5  ;;  %v15304_v19 = vrot.slane %v14772_v10, %v14761_v6 }
 0x130   :  { %v15352_v21 = vrot.slane %v14772_v10, %v14785_v16  ;;  %v15468_v23 = vrot.slane %v14963_v54, %v14785_v16 }
 0x131   :  { %19715 = vst [vmem:[#allocation51_spill] sm:$0xff] %v15290_v59  ;;  %19716 = vst [vmem:[#allocation52_spill] sm:$0xff] %v15294_v20  ;;  %v15308_v59 = vrot.slane %v14772_v10, %v14767_v9 }
 0x132   :  { %552 = vrot.lane.b32.xlu0 %v489_v55, %s14688_s11  ;;  %494 = vrot.lane.b32.xlu1 %v373_v39, %s14688_s11  ;;  %v437_v55 = vrot.slane %v360_v58, %v14761_v6  ;;  %v441_v39 = vrot.slane %v360_v58, %v14767_v9  ;;  %19717 = vst [vmem:[#allocation53_spill] sm:$0xff] %v15304_v19  ;;  %19724 = vst [vmem:[#allocation54_spill] sm:$0xff] %v15352_v21 }
 0x133   :  { %v15367_v21 = vrot.slane %v14963_v54, %v14755_v4 }
 0x135   :  { %19726 = vst [vmem:[#allocation56_spill] sm:$0xff] %v15367_v21 }
 0x136   :  { %496 = vrot.lane.b32.xlu0 %v377_v46, %s14688_s11  ;;  %498 = vrot.lane.b32.xlu1 %v381_v56, %s14688_s11  ;;  %v445_v46 = vrot.slane %v360_v58, %v14779_v14  ;;  %v15066_v56 = vrot.slane %v19246_v36, %v14755_v4 }
 0x138   :  { %19695 = vst [vmem:[#allocation42_spill] sm:$0xff] %v15066_v56  ;;  %vm19277_vm5 = vcmp.eq.s32.totalorder %v15066_v56, 1 }
 0x13a   :  { %500 = vrot.lane.b32.xlu0 %v385_v60, %s14688_s11  ;;  %502 = vrot.lane.b32.xlu1 %v389_v42, %s14688_s11  ;;  %v449_v60 = vrot.slane %v360_v58, %v14782_v15  ;;  %v453_v42 = vrot.slane %v360_v58, %v14785_v16 }
 0x13e   :  { %504 = vrot.lane.b32.xlu0 %v393_v24, %s14688_s11  ;;  %506 = vrot.lane.b32.xlu1 %v397_v8, %s14688_s11  ;;  %v457_v24 = vrot.slane %v360_v58, %v14790_v18  ;;  %v15081_v8 = vsel %vm19277_vm5, 0.0, %v1139_v22  ;;  %v994_v22 = vrot.slane %v14742_v1, %v14767_v9 }
 0x13f   :  { %19696 = vst [vmem:[#allocation43_spill] sm:$0xff] %v15081_v8 }
 0x142   :  { %508 = vrot.lane.b32.xlu0 %v401_v33, %s14688_s11  ;;  %510 = vrot.lane.b32.xlu1 %v405_v31, %s14688_s11  ;;  %v1140_v33 = vld [vmem:[%s19228_s2 + $0x8] sm:$0xff]  ;;  %v1141_v31 = vld [vmem:[%s19228_s2 + $0x10] sm:$0xff] }
 0x146   :  { %512 = vrot.lane.b32.xlu0 %v409_v53, %s14688_s11  ;;  %514 = vrot.lane.b32.xlu1 %v413_v32, %s14688_s11  ;;  %v15094_v53 = vsel %vm19277_vm5, 0.0, %v1140_v33  ;;  %v15098_v32 = vsel %vm19277_vm5, 0.0, %v1141_v31  ;;  %v15158_v33 = vsel %vm750_vm7, 1, %v19246_v36  ;;  %vm629_vm7 = vcmp.ge.s32.totalorder %v14900_v45, 11 }
 0x147   :  { %19697 = vst [vmem:[#allocation44_spill] sm:$0xff] %v15094_v53  ;;  %19698 = vst [vmem:[#allocation45_spill] sm:$0xff] %v15098_v32  ;;  %v882_v56 = vrot.slane %v15158_v33, %v14790_v18 }
 0x149   :  { %vm15192_vm13 = vcmp.ne.s32.totalorder %v882_v56, 0 }
 0x14a   :  { %516 = vrot.lane.b32.xlu0 %v417_v34, %s14688_s11  ;;  %518 = vrot.lane.b32.xlu1 %v421_v61, %s14688_s11  ;;  %v1142_v34 = vld [vmem:[%s19228_s2 + $0x18] sm:$0xff]  ;;  %v1144_v61 = vld [vmem:[%s19228_s2 + $0x28] sm:$0xff] }
 0x14b   :  { %v15112_v58 = vsel %vm19277_vm5, 0.0, %v1142_v34 }
 0x14c   :  { %19699 = vst [vmem:[#allocation46_spill] sm:$0xff] %v15112_v58 }
 0x14e   :  { %520 = vrot.lane.b32.xlu0 %v425_v37, %s14688_s11  ;;  %522 = vrot.lane.b32.xlu1 %v429_v44, %s14688_s11  ;;  %v15116_v37 = vsel %vm19277_vm5, 0.0, %v1144_v61  ;;  %v1143_v44 = vld [vmem:[%s19228_s2 + $0x20] sm:$0xff] }
 0x14f   :  { %19700 = vst [vmem:[#allocation47_spill] sm:$0xff] %v15116_v37 }
 0x152   :  { %524 = vrot.lane.b32.xlu0 %v433_v40, %s14688_s11  ;;  %526 = vrot.lane.b32.xlu1 %v437_v55, %s14688_s11  ;;  %v15127_v40 = vsel %vm19277_vm5, 0.0, %v1143_v44  ;;  %v14691_v55 = vmov 1966171168   ;;  %v751_v44 = vsel %vm747_vm8, 1, %v19246_v36  ;;  %vm15327_vm5 = vmand %vm593_vm12, %vm625_vm14 }
 0x153   :  { %19701 = vst [vmem:[#allocation48_spill] sm:$0xff] %v15127_v40 }
 0x156   :  { %528 = vrot.lane.b32.xlu0 %v441_v39, %s14688_s11  ;;  %530 = vrot.lane.b32.xlu1 %v445_v46, %s14688_s11  ;;  %v13635_v39 = vunpack.c.l.s4 %v14691_v55  ;;  %v982_v46 = vrot.slane %v14742_v1, %v14755_v4  ;;  %v998_v55 = vrot.slane %v14742_v1, %v14779_v14 }
 0x15a   :  { %532 = vrot.lane.b32.xlu0 %v449_v60, %s14688_s11  ;;  %534 = vrot.lane.b32.xlu1 %v453_v42, %s14688_s11  ;;  %v986_v60 = vrot.slane %v14742_v1, %v14758_v5  ;;  %v990_v42 = vrot.slane %v14742_v1, %v14761_v6 }
 0x15c   :  { %v13630_v31 = vcombine.low %v982_v46, %v986_v60  ;;  %v13631_v34 = vcombine.low %v990_v42, %v994_v22  ;;  %v15177_v60 = vrot.slane %v14963_v54, %v14790_v18  ;;  %v786_v42 = vrot.slane %v751_v44, %v14790_v18 }
 0x15d   :  { %v15182_v22 = vrot.slane %v14742_v1, %v14790_v18 }
 0x15e   :  { %536 = vrot.lane.b32.xlu0 %v457_v24, %s14688_s11  ;;  %1369 = vrot.lane.b32.xlu1 %v15081_v8, %s14689_s18  ;;  %v13636_v24 = vunpack.c.0.s8 %v13635_v39  ;;  %v1002_v39 = vrot.slane %v14742_v1, %v14782_v15  ;;  %19702 = vst [vmem:[#allocation49_spill] sm:$0xff] %v15177_v60  ;;  %vm15220_vm1 = vcmp.ne.s32.totalorder %v786_v42, 0  ;;  %v19710_v60 = vmov 0  }
 0x15f   :  { %v15249_v27 = vsel %vm15205_vm15, 1, %v19710_v60 }
 0x160   :  { %v15161_v61 = vsub.s32 %v13636_v24, %v14744_v2  ;;  %v15185_v24 = vsel %vm748_vm9, 1, %v19246_v36  ;;  %v15200_v36 = vrot.slane %v14742_v1, %v14785_v16 }
 0x161   :  { %v19731_v1 = vrot.slane %v15185_v24, %v14779_v14 }
 0x162   :  { %1371 = vrot.lane.b32.xlu0 %v15094_v53, %s14689_s18  ;;  %1373 = vrot.lane.b32.xlu1 %v15098_v32, %s14689_s18  ;;  %v13640_v46 = vrot.slane %v13630_v31, %v15161_v61  ;;  %v13647_v2 = vrot.slane %v13631_v34, %v15161_v61  ;;  %v15190_v31 = vcombine.low %v998_v55, %v1002_v39 }
 0x163   :  { %v790_v55 = vrot.slane %v15185_v24, %v14755_v4  ;;  %v794_v39 = vrot.slane %v15185_v24, %v14758_v5 }
 0x164   :  { %v15210_v56 = vcombine.low %v13640_v46, %v13647_v2  ;;  %v798_v46 = vrot.slane %v15185_v24, %v14761_v6  ;;  %v802_v2 = vrot.slane %v15185_v24, %v14767_v9 }
 0x165   :  { %vm15280_vm4 = vcmp.ne.s32.totalorder %v790_v55, 0  ;;  %vm15315_vm8 = vcmp.ne.s32.totalorder %v794_v39, 0  ;;  %v15334_v39 = vrot.slane %v14772_v10, %v14779_v14 }
 0x166   :  { %1375 = vrot.lane.b32.xlu0 %v15112_v58, %s14689_s18  ;;  %1379 = vrot.lane.b32.xlu1 %v15116_v37, %s14689_s18  ;;  %vm15342_vm3 = vcmp.ne.s32.totalorder %v798_v46, 0  ;;  %vm15383_vm14 = vcmp.ne.s32.totalorder %v802_v2, 0 }
 0x16a   :  { %1377 = vrot.lane.b32.xlu0 %v15127_v40, %s14689_s18  ;;  %2831 = vrot.lane.b32.xlu1 %v15081_v8, %s14690_s25  ;;  %v15259_v8 = vrot.slane %v14752_v3, %v14779_v14 }
 0x16e   :  { %2833 = vrot.lane.b32.xlu0 %v15094_v53, %s14690_s25  ;;  %2835 = vrot.lane.b32.xlu1 %v15098_v32, %s14690_s25  ;;  %v15234_v32 = vrot.slane %v14752_v3, %v14761_v6 }
 0x172   :  { %2837 = vrot.lane.b32.xlu0 %v15112_v58, %s14690_s25  ;;  %2841 = vrot.lane.b32.xlu1 %v15116_v37, %s14690_s25  ;;  %v782_v37 = vrot.slane %v751_v44, %v14785_v16  ;;  %v15216_v44 = vrot.slane %v14752_v3, %v14755_v4  ;;  %v15226_v58 = vrot.slane %v14752_v3, %v14758_v5 }
 0x174   :  { %vm15251_vm2 = vcmp.ne.s32.totalorder %v782_v37, 0 }
 0x176   :  { %2839 = vrot.lane.b32.xlu0 %v15127_v40, %s14690_s25  ;;  %v15338_v40 = vrot.slane %v14772_v10, %v14782_v15 }
 0x19c   :  { %v15236_v53 = vpop.permute.xlu0 %538  ;;  %v491_v42 = vpop.permute.xlu1 %490 }
 0x19d   :  { %19709 = vst [vmem:[#allocation50_spill] sm:$0xff] %v15236_v53 }
 0x1a0   :  { %v541_v55 = vpop.permute.xlu0 %540  ;;  %v493_v3 = vpop.permute.xlu1 %492 }
 0x1a1   :  { %v561_v20 = vsel %vm19307_vm10, %v15236_v53, %v541_v55  ;;  %v585_v17 = vsel %vm19307_vm10, %v491_v42, %v493_v3  ;;  %v15356_v53 = vrot.slane %v14772_v10, %v14790_v18  ;;  %v15371_v10 = vrot.slane %v14963_v54, %v14758_v5 }
 0x1a2   :  { %vm714_vm9 = vcmp.ne.s32.totalorder %v561_v20, 0  ;;  %vm690_vm15 = vcmp.ne.s32.totalorder %v585_v17, 0  ;;  %v1170_v17 = vld [vmem:[%s19228_s2 + $0xf8] sm:$0xff]  ;;  %v19736_v55 = vmov 0 }
 0x1a3   :  { %vm746_vm6 = vmand %vm650_vm11, %vm714_vm9  ;;  %19725 = vst [vmem:[#allocation55_spill] sm:$0xff] %v15356_v53  ;;  %v19760_v53 = vrot.slane %v15190_v31, %v15161_v61 }
 0x1a4   :  { %vm946_vm11 = vmand %vm746_vm6, %vm15192_vm13  ;;  %v553_v46 = vpop.permute.xlu0 %552  ;;  %v495_v29 = vpop.permute.xlu1 %494  ;;  %19727 = vst [vmem:[#allocation57_spill] sm:$0xff] %v15371_v10 }
 0x1a5   :  { %v15374_v34 = vsel %vm946_vm11, 1, %v19710_v60  ;;  %vm722_vm13 = vmand %vm626_vm0, %vm690_vm15  ;;  %v586_v62 = vsel %vm19307_vm10, %v553_v46, %v491_v42  ;;  %v584_v19 = vsel %vm19307_vm10, %v493_v3, %v495_v29  ;;  %v15415_v46 = vrot.slane %v14963_v54, %v14767_v9  ;;  %v1148_v42 = vld [vmem:[%s19228_s2 + $0x48] sm:$0xff] }
 0x1a6   :  { %19728 = vst [vmem:[#allocation58_spill] sm:$0xff] %v15374_v34  ;;  %v1298_v21 = vrot.slane %v15374_v34, %v14755_v4  ;;  %vm922_vm6 = vmand %vm722_vm13, %vm15220_vm1  ;;  %vm689_vm0 = vcmp.ne.s32.totalorder %v586_v62, 0  ;;  %vm691_vm9 = vcmp.ne.s32.totalorder %v584_v19, 0  ;;  %vm15405_vm1 = vcmp.ne.s32.totalorder %v19731_v1, 0 }
 0x1a7   :  { %v954_v2 = vsel %vm922_vm6, 1, %v19710_v60  ;;  %vm721_vm11 = vmand %vm15327_vm5, %vm689_vm0  ;;  %v15411_v62 = vrot.slane %v14963_v54, %v14761_v6  ;;  %19735 = vst [vmem:[#allocation60_spill] sm:$0xff] %v15415_v46  ;;  %vm19739_vm0 = vcmp.ge.s32.totalorder %v14896_v7, 11  ;;  %v19740_v34 = vrot.slane %v15185_v24, %v14782_v15 }
 0x1a8   :  { %vm15419_vm13 = vcmp.eq.s32.totalorder %v1298_v21, 1  ;;  %v1114_v1 = vadd.s32 %v15182_v22, %v954_v2  ;;  %v1202_v10 = vrot.slane %v954_v2, %v14755_v4  ;;  %vm921_vm5 = vmand %vm721_vm11, %vm15251_vm2  ;;  %v497_v30 = vpop.permute.xlu0 %496  ;;  %v19776_v46 = vrot.slane %v15210_v56, %v15161_v61  ;;  %v19831_v56 = vld [vmem:[#allocation51_spill] sm:$0xff] }
 0x1a9   :  { %19734 = vst [vmem:[#allocation59_spill] sm:$0xff] %v15411_v62  ;;  %v19737_v55 = vsel %vm15419_vm13, 4294967295, %v19736_v55  ;;  %v499_v62 = vpop.permute.xlu1 %498  ;;  %v953_v3 = vsel %vm921_vm5, 1, %v19710_v60  ;;  %vm723_vm15 = vmand %vm19739_vm0, %vm691_vm9  ;;  %v583_v21 = vsel %vm19307_vm10, %v495_v29, %v497_v30  ;;  %v15438_v26 = vsel %vm15419_vm13, 0.0, %v1170_v17 }
 0x1aa   :  { %19738 = vst [vmem:[#allocation61_spill] sm:$0xff] %v19737_v55  ;;  %v582_v2 = vsel %vm19307_vm10, %v497_v30, %v499_v62  ;;  %vm15445_vm2 = vcmp.ne.s32.totalorder %v19740_v34, 0  ;;  %v1113_v19 = vadd.s32 %v15200_v36, %v953_v3  ;;  %v1198_v7 = vrot.slane %v953_v3, %v14755_v4  ;;  %vm923_vm9 = vmand %vm723_vm15, %vm15280_vm4  ;;  %1431 = vrot.lane.b32.xlu1 %v15438_v26, %s14689_s18  ;;  %v1145_v30 = vld [vmem:[%s19228_s2 + $0x30] sm:$0xff] }
 0x1ab   :  { %vm692_vm11 = vcmp.ne.s32.totalorder %v583_v21, 0  ;;  %vm19743_vm5 = vcmp.le.f32.partialorder %v14999_v35, 0.5  ;;  %v955_v17 = vsel %vm923_vm9, 1, %v19710_v60  ;;  %vm19744_vm0 = vcmp.ge.s32.totalorder %v14898_v41, 11 }
 0x1ac   :  { %v13605_v34 = vsel %vm19743_vm5, %v1114_v1, %v15182_v22  ;;  %vm724_vm4 = vmand %vm19744_vm0, %vm692_vm11  ;;  %vm693_vm15 = vcmp.ne.s32.totalorder %v582_v2, 0  ;;  %vm15470_vm6 = vcmp.eq.s32.totalorder %v1198_v7, 1  ;;  %v19745_v3 = vmov 0  ;;  %v501_v1 = vpop.permute.xlu0 %500  ;;  %v1146_v2 = vld [vmem:[%s19228_s2 + $0x38] sm:$0xff] }
 0x1ad   :  { %v19746_v3 = vsel %vm15470_vm6, 4294967295, %v19745_v3  ;;  %vm19748_vm12 = vmmov %vm19743_vm5  ;;  %v1115_v22 = vadd.s32 %v15216_v44, %v955_v17  ;;  %vm15483_vm11 = vcmp.eq.s32.totalorder %v1202_v10, 1  ;;  %v19749_v29 = vmov 0  ;;  %v503_v7 = vpop.permute.xlu1 %502 }
 0x1ae   :  { %19747 = vst [vmem:[#allocation62_spill] sm:$0xff] %v19746_v3  ;;  %v13604_v21 = vsel %vm19748_vm12, %v1113_v19, %v15200_v36  ;;  %vm924_vm9 = vmand %vm724_vm4, %vm15315_vm8  ;;  %v19750_v29 = vsel %vm15483_vm11, 4294967295, %v19749_v29  ;;  %v581_v36 = vsel %vm19307_vm10, %v499_v62, %v501_v1  ;;  %v15494_v37 = vsel %vm15470_vm6, 0.0, %v1145_v30 }
 0x1af   :  { %19751 = vst [vmem:[#allocation63_spill] sm:$0xff] %v19750_v29  ;;  %v13633_v55 = vcombine.low %v13604_v21, %v13605_v34  ;;  %v956_v41 = vsel %vm924_vm9, 1, %v19710_v60  ;;  %vm725_vm12 = vmand %vm629_vm7, %vm693_vm15  ;;  %v1206_v19 = vrot.slane %v955_v17, %v14755_v4  ;;  %1381 = vrot.lane.b32.xlu0 %v15494_v37, %s14689_s18  ;;  %vm19753_vm4 = vcmp.ge.s32.totalorder %v14902_v47, 11 }
 0x1b0   :  { %vm19752_vm8 = vmmov %vm19743_vm5  ;;  %v1116_v34 = vadd.s32 %v15226_v58, %v956_v41  ;;  %vm694_vm5 = vcmp.ne.s32.totalorder %v581_v36, 0  ;;  %v15518_v17 = vsel %vm15483_vm11, 0.0, %v1146_v2  ;;  %v580_v20 = vsel %vm19307_vm10, %v501_v1, %v503_v7  ;;  %v505_v1 = vpop.permute.xlu0 %504 }
 0x1b1   :  { %v15500_v10 = vsel %vm19752_vm8, %v1115_v22, %v15216_v44  ;;  %vm925_vm0 = vmand %vm725_vm12, %vm15342_vm3  ;;  %v13661_v62 = vrot.slane %v13633_v55, %v15161_v61  ;;  %v1210_v21 = vrot.slane %v956_v41, %v14755_v4  ;;  %1383 = vrot.lane.b32.xlu1 %v15518_v17, %s14689_s18  ;;  %v19757_v41 = vrot.slane %v15185_v24, %v14785_v16 }
 0x1b2   :  { %vm15511_vm15 = vmand %vm19753_vm4, %vm694_vm5  ;;  %v957_v44 = vsel %vm925_vm0, 1, %v19710_v60  ;;  %v579_v3 = vsel %vm19307_vm10, %v503_v7, %v505_v1  ;;  %vm15580_vm7 = vcmp.eq.s32.totalorder %v1206_v19, 1  ;;  %vm19796_vm13 = vcmp.lt.s32.totalorder %v14821_v43, 75 }
 0x1b3   :  { %vm19756_vm9 = vmmov %vm19752_vm8  ;;  %v1117_v22 = vadd.s32 %v15234_v32, %v957_v44  ;;  %vm695_vm8 = vcmp.ne.s32.totalorder %v580_v20, 0  ;;  %vm15539_vm5 = vcmp.ne.s32.totalorder %v19757_v41, 0  ;;  %v13663_v36 = vcombine.low %v19760_v53, %v13661_v62  ;;  %v1147_v20 = vld [vmem:[%s19228_s2 + $0x40] sm:$0xff] }
 0x1b4   :  { %v15527_v55 = vsel %vm19756_vm9, %v1116_v34, %v15226_v58  ;;  %vm926_vm12 = vmand %vm15511_vm15, %vm15383_vm14  ;;  %v507_v58 = vpop.permute.xlu1 %506  ;;  %v1214_v30 = vrot.slane %v957_v44, %v14755_v4  ;;  %vm19761_vm14 = vcmp.ge.s32.totalorder %v14904_v48, 11  ;;  %v19762_v41 = vrot.slane %v15185_v24, %v14790_v18 }
 0x1b5   :  { %v958_v34 = vsel %vm926_vm12, 1, %v19710_v60  ;;  %vm727_vm0 = vmand %vm19761_vm14, %vm695_vm8  ;;  %v13679_v62 = vcombine.low %v15500_v10, %v15527_v55  ;;  %v13677_v24 = vrot.slane %v13663_v36, %v15161_v61  ;;  %vm19766_vm14 = vcmp.ge.s32.totalorder %v14906_v50, 11 }
 0x1b6   :  { %vm15558_vm4 = vcmp.ne.s32.totalorder %v19762_v41, 0  ;;  %v1118_v44 = vadd.s32 %v15242_v57, %v958_v34  ;;  %vm19765_vm15 = vmmov %vm19756_vm9  ;;  %vm696_vm9 = vcmp.ne.s32.totalorder %v579_v3, 0  ;;  %v1218_v53 = vrot.slane %v958_v34, %v14755_v4  ;;  %v509_v34 = vpop.permute.xlu0 %508 }
 0x1b7   :  { %v13608_v7 = vsel %vm19765_vm15, %v1117_v22, %v15234_v32  ;;  %vm927_vm12 = vmand %vm727_vm0, %vm15405_vm1  ;;  %v19769_v32 = vmov 0  ;;  %v15599_v36 = vsel %vm15580_vm7, 0.0, %v1147_v20  ;;  %v19773_v41 = vrot.slane %v15249_v27, %v14755_v4 }
 0x1b8   :  { %vm15575_vm3 = vmand %vm19766_vm14, %vm696_vm9  ;;  %v959_v55 = vsel %vm927_vm12, 1, %v19710_v60  ;;  %v19770_v32 = vsel %vm15580_vm7, 4294967295, %v19769_v32  ;;  %1385 = vrot.lane.b32.xlu0 %v15599_v36, %s14689_s18  ;;  %v19777_v20 = vmov 0  ;;  %v19841_v50 = vrot.slane %v15249_v27, %v14785_v16 }
 0x1b9   :  { %19771 = vst [vmem:[#allocation64_spill] sm:$0xff] %v19770_v32  ;;  %vm19772_vm0 = vmmov %vm19765_vm15  ;;  %v1119_v19 = vadd.s32 %v15259_v8, %v959_v55  ;;  %v1222_v22 = vrot.slane %v959_v55, %v14755_v4  ;;  %vm15604_vm9 = vcmp.ne.s32.totalorder %v19773_v41, 0  ;;  %v1149_v41 = vld [vmem:[%s19228_s2 + $0x50] sm:$0xff]  ;;  %v19780_v32 = vrot.slane %v15249_v27, %v14758_v5 }
 0x1ba   :  { %v13609_v3 = vsel %vm19772_vm0, %v1118_v44, %v15242_v57  ;;  %vm928_vm15 = vmand %vm15575_vm3, %vm15445_vm2  ;;  %v511_v57 = vpop.permute.xlu1 %510  ;;  %v13678_v44 = vcombine.low %v19776_v46, %v13677_v24  ;;  %vm15614_vm2 = vcmp.eq.s32.totalorder %v1210_v21, 1  ;;  %v577_v46 = vsel %vm19307_vm10, %v507_v58, %v509_v34 }
 0x1bb   :  { %v13680_v10 = vcombine.low %v13608_v7, %v13609_v3  ;;  %v960_v55 = vsel %vm928_vm15, 1, %v19710_v60  ;;  %v19778_v20 = vsel %vm15614_vm2, 4294967295, %v19777_v20  ;;  %vm15624_vm3 = vcmp.ne.s32.totalorder %v19780_v32, 0  ;;  %vm19783_vm12 = vmmov %vm19772_vm0 }
 0x1bc   :  { %19779 = vst [vmem:[#allocation65_spill] sm:$0xff] %v19778_v20  ;;  %v1120_v7 = vadd.s32 %v15263_v52, %v960_v55  ;;  %v1226_v24 = vrot.slane %v960_v55, %v14755_v4  ;;  %v13610_v21 = vsel %vm19783_vm12, %v1119_v19, %v15259_v8  ;;  %v15635_v3 = vsel %vm15614_vm2, 0.0, %v1148_v42  ;;  %13826 = vst [vmem:[%s19232_s6] sm:$0xff] %v13678_v44  ;;  %v1150_v19 = vld [vmem:[%s19228_s2 + $0x58] sm:$0xff] }
 0x1bd   :  { %v15642_v32 = vrot.slane %v13680_v10, %v15161_v61  ;;  %1387 = vrot.lane.b32.xlu1 %v15635_v3, %s14689_s18  ;;  %v578_v8 = vsel %vm19307_vm10, %v505_v1, %v507_v58  ;;  %vm15650_vm0 = vcmp.eq.s32.totalorder %v1214_v30, 1  ;;  %v19784_v42 = vmov 0  ;;  %v513_v1 = vpop.permute.xlu0 %512  ;;  %v1151_v58 = vld [vmem:[%s19228_s2 + $0x60] sm:$0xff]  ;;  %vm19803_vm7 = vmmov %vm19796_vm13 }
 0x1be   :  { %v19785_v42 = vsel %vm15650_vm0, 4294967295, %v19784_v42  ;;  %v13611_v44 = vsel %vm19783_vm12, %v1120_v7, %v15263_v52  ;;  %vm697_vm14 = vcmp.ne.s32.totalorder %v578_v8, 0  ;;  %vm698_vm1 = vcmp.ne.s32.totalorder %v577_v46, 0  ;;  %v515_v20 = vpop.permute.xlu1 %514 }
 0x1bf   :  { %19786 = vst [vmem:[#allocation66_spill] sm:$0xff] %v19785_v42  ;;  %v15663_v10 = vsel %vm15650_vm0, 0.0, %v1149_v41  ;;  %v19787_v30 = vrot.slane %v15249_v27, %v14761_v6  ;;  %v15676_v52 = vrot.slane %v13679_v62, %v15161_v61  ;;  %v13681_v7 = vcombine.low %v13610_v21, %v13611_v44 }
 0x1c0   :  { %vm19790_vm12 = vcmp.ge.s32.totalorder %v14908_v38, 11  ;;  %1389 = vrot.lane.b32.xlu0 %v15663_v10, %s14689_s18  ;;  %vm15686_vm10 = vcmp.eq.s32.totalorder %v1218_v53, 1  ;;  %v19793_v46 = vmov 0  ;;  %v575_v8 = vsel %vm19796_vm13, %v511_v57, %v513_v1 }
 0x1c1   :  { %vm15671_vm8 = vcmp.ne.s32.totalorder %v19787_v30, 0  ;;  %vm15680_vm15 = vmand %vm19790_vm12, %vm697_vm14  ;;  %v19794_v46 = vsel %vm15686_vm10, 4294967295, %v19793_v46  ;;  %v19797_v62 = vrot.slane %v15249_v27, %v14767_v9  ;;  %vm19800_vm14 = vcmp.ge.s32.totalorder %v14910_v0, 11  ;;  %v517_v41 = vpop.permute.xlu0 %516 }
 0x1c2   :  { %19795 = vst [vmem:[#allocation67_spill] sm:$0xff] %v19794_v46  ;;  %vm15701_vm12 = vmand %vm19800_vm14, %vm698_vm1  ;;  %v15707_v53 = vsel %vm15686_vm10, 0.0, %v1150_v19  ;;  %v576_v30 = vsel %vm19803_vm7, %v509_v34, %v511_v57  ;;  %vm15711_vm13 = vcmp.eq.s32.totalorder %v1222_v22, 1  ;;  %v19804_v42 = vmov 0  ;;  %v519_v31 = vpop.permute.xlu1 %518 }
 0x1c3   :  { %vm15695_vm0 = vcmp.ne.s32.totalorder %v19797_v62, 0  ;;  %v19805_v42 = vsel %vm15711_vm13, 4294967295, %v19804_v42  ;;  %v1152_v62 = vld [vmem:[%s19228_s2 + $0x68] sm:$0xff]  ;;  %v15721_v38 = vrot.slane %v14963_v54, %v14779_v14  ;;  %vm929_vm7 = vmand %vm15680_vm15, %vm15539_vm5  ;;  %1391 = vrot.lane.b32.xlu1 %v15707_v53, %s14689_s18  ;;  %vm699_vm14 = vcmp.ne.s32.totalorder %v576_v30, 0 }
 0x1c4   :  { %19806 = vst [vmem:[#allocation68_spill] sm:$0xff] %v19805_v42  ;;  %vm700_vm10 = vcmp.ne.s32.totalorder %v575_v8, 0  ;;  %v15733_v22 = vsel %vm15711_vm13, 0.0, %v1151_v58  ;;  %v15737_v34 = vrot.slane %v13681_v7, %v15161_v61  ;;  %vm930_vm6 = vmand %vm15701_vm12, %vm15558_vm4  ;;  %v961_v2 = vsel %vm929_vm7, 1, %v19710_v60 }
 0x1c5   :  { %vm15744_vm5 = vcmp.eq.s32.totalorder %v1226_v24, 1  ;;  %v19807_v57 = vmov 0  ;;  %vm19810_vm15 = vcmp.lt.s32.totalorder %v14821_v43, 75  ;;  %v19811_v19 = vrot.slane %v15249_v27, %v14779_v14  ;;  %1393 = vrot.lane.b32.xlu0 %v15733_v22, %s14689_s18 }
 0x1c6   :  { %v19808_v57 = vsel %vm15744_vm5, 4294967295, %v19807_v57  ;;  %v574_v58 = vsel %vm19810_vm15, %v513_v1, %v515_v20  ;;  %v962_v44 = vsel %vm930_vm6, 1, %v19710_v60  ;;  %v1121_v42 = vadd.s32 %v15274_v28, %v961_v2 }
 0x1c7   :  { %19809 = vst [vmem:[#allocation69_spill] sm:$0xff] %v19808_v57  ;;  %vm15753_vm1 = vcmp.ne.s32.totalorder %v19811_v19, 0  ;;  %v1230_v24 = vrot.slane %v961_v2, %v14755_v4  ;;  %vm19814_vm4 = vcmp.ge.s32.totalorder %v14912_v49, 11  ;;  %v15771_v1 = vsel %vm15744_vm5, 0.0, %v1152_v62  ;;  %v1153_v19 = vld [vmem:[%s19228_s2 + $0x70] sm:$0xff] }
 0x1c8   :  { %vm15763_vm12 = vmand %vm19814_vm4, %vm699_vm14  ;;  %v19817_v30 = vrot.slane %v15249_v27, %v14782_v15  ;;  %v1122_v49 = vadd.s32 %v15278_v25, %v962_v44  ;;  %v1234_v0 = vrot.slane %v962_v44, %v14755_v4  ;;  %vm19820_vm7 = vcmp.ge.s32.totalorder %v14914_v63, 11  ;;  %1395 = vrot.lane.b32.xlu1 %v15771_v1, %s14689_s18  ;;  %v523_v63 = vpop.permute.xlu1 %522 }
 0x1c9   :  { %vm15788_vm14 = vmand %vm19820_vm7, %vm700_vm10  ;;  %v573_v57 = vsel %vm19810_vm15, %v515_v20, %v517_v41  ;;  %vm701_vm4 = vcmp.ne.s32.totalorder %v574_v58, 0  ;;  %vm19823_vm13 = vcmp.le.f32.partialorder %v14999_v35, 0.5  ;;  %vm15803_vm7 = vcmp.eq.s32.totalorder %v1230_v24, 1  ;;  %v1154_v20 = vld [vmem:[%s19228_s2 + $0x78] sm:$0xff]  ;;  %v19830_v24 = vld [vmem:[#allocation30_spill] sm:$0xff] }
 0x1ca   :  { %vm15779_vm6 = vcmp.ne.s32.totalorder %v19817_v30, 0  ;;  %v13612_v30 = vsel %vm19823_vm13, %v1121_v42, %v15274_v28  ;;  %vm931_vm5 = vmand %vm15763_vm12, %vm15604_vm9  ;;  %vm702_vm10 = vcmp.ne.s32.totalorder %v573_v57, 0  ;;  %v19824_v8 = vmov 0  ;;  %v19856_v58 = vld [vmem:[#allocation53_spill] sm:$0xff] }
 0x1cb   :  { %v19825_v8 = vsel %vm15803_vm7, 4294967295, %v19824_v8  ;;  %v572_v28 = vsel %vm19810_vm15, %v517_v41, %v519_v31  ;;  %v13613_v29 = vsel %vm19823_vm13, %v1122_v49, %v15278_v25  ;;  %vm932_vm9 = vmand %vm15788_vm14, %vm15624_vm3  ;;  %v963_v42 = vsel %vm931_vm5, 1, %v19710_v60  ;;  %v521_v41 = vpop.permute.xlu0 %520 }
 0x1cc   :  { %19826 = vst [vmem:[#allocation70_spill] sm:$0xff] %v19825_v8  ;;  %v15822_v46 = vsel %vm15803_vm7, 0.0, %v1153_v19  ;;  %vm15824_vm12 = vcmp.eq.s32.totalorder %v1234_v0, 1  ;;  %v19827_v44 = vmov 0  ;;  %v13682_v49 = vcombine.low %v13612_v30, %v13613_v29  ;;  %v19835_v0 = vld [vmem:[#allocation31_spill] sm:$0xff]  ;;  %v19836_v8 = vld [vmem:[#allocation52_spill] sm:$0xff] }
 0x1cd   :  { %v19828_v44 = vsel %vm15824_vm12, 4294967295, %v19827_v44  ;;  %v964_v25 = vsel %vm932_vm9, 1, %v19710_v60  ;;  %v1123_v62 = vadd.s32 %v19831_v56, %v963_v42  ;;  %v1238_v48 = vrot.slane %v963_v42, %v14755_v4  ;;  %1397 = vrot.lane.b32.xlu0 %v15822_v46, %s14689_s18 }
 0x1ce   :  { %19829 = vst [vmem:[#allocation71_spill] sm:$0xff] %v19828_v44  ;;  %vm19832_vm3 = vcmp.ge.s32.totalorder %v14916_v11, 11  ;;  %v1124_v30 = vadd.s32 %v19836_v8, %v964_v25  ;;  %v1242_v29 = vrot.slane %v964_v25, %v14755_v4  ;;  %vm19837_vm13 = vcmp.ge.s32.totalorder %v14918_v12, 11  ;;  %v19860_v44 = vld [vmem:[#allocation33_spill] sm:$0xff]  ;;  %v527_v12 = vpop.permute.xlu1 %526 }
 0x1cf   :  { %vm15835_vm5 = vmand %vm19832_vm3, %vm701_vm4  ;;  %v15853_v42 = vsel %vm15824_vm12, 0.0, %v1154_v20  ;;  %vm15860_vm3 = vcmp.ne.s32.totalorder %v19841_v50, 0  ;;  %v13710_v57 = vrot.slane %v13682_v49, %v15161_v61  ;;  %v1155_v50 = vld [vmem:[%s19228_s2 + $0x80] sm:$0xff]  ;;  %v19855_v21 = vcombine.low %v15676_v52, %v15642_v32 }
 0x1d0   :  { %vm15847_vm9 = vmand %vm19837_vm13, %vm702_vm10  ;;  %vm19844_vm10 = vcmp.le.f32.partialorder %v14999_v35, 0.5  ;;  %1399 = vrot.lane.b32.xlu1 %v15853_v42, %s14689_s18  ;;  %vm15903_vm14 = vcmp.eq.s32.totalorder %v1242_v29, 1  ;;  %v19874_v29 = vld [vmem:[#allocation34_spill] sm:$0xff]  ;;  %vm19895_vm12 = vcmp.lt.s32.totalorder %v14821_v43, 75 }
 0x1d1   :  { %vm19840_vm4 = vmmov %vm19810_vm15  ;;  %v15868_v25 = vsel %vm19844_vm10, %v1123_v62, %v19831_v56  ;;  %v15889_v55 = vsel %vm19844_vm10, %v1124_v30, %v19836_v8  ;;  %v19848_v56 = vmov 0  ;;  %v525_v8 = vpop.permute.xlu0 %524  ;;  %v19854_v62 = vld [vmem:[#allocation32_spill] sm:$0xff]  ;;  %v13719_v19 = vrot.slane %v19855_v21, %v15161_v61 }
 0x1d2   :  { %v571_v11 = vsel %vm19840_vm4, %v519_v31, %v521_v41  ;;  %vm933_vm13 = vmand %vm15835_vm5, %vm15671_vm8  ;;  %vm703_vm4 = vcmp.ne.s32.totalorder %v572_v28, 0  ;;  %v19845_v31 = vrot.slane %v15249_v27, %v14790_v18  ;;  %vm15896_vm5 = vcmp.eq.s32.totalorder %v1238_v48, 1  ;;  %v1156_v18 = vld [vmem:[%s19228_s2 + $0x88] sm:$0xff] }
 0x1d3   :  { %vm934_vm8 = vmand %vm15847_vm9, %vm15695_vm0  ;;  %v965_v49 = vsel %vm933_vm13, 1, %v19710_v60  ;;  %v19849_v56 = vsel %vm15896_vm5, 4294967295, %v19848_v56  ;;  %v19851_v27 = vmov 0  ;;  %v13712_v48 = vcombine.low %v15737_v34, %v13710_v57 }
 0x1d4   :  { %vm15882_vm15 = vcmp.ne.s32.totalorder %v19845_v31, 0  ;;  %19850 = vst [vmem:[#allocation51_spill] sm:$0xff] %v19849_v56  ;;  %v19852_v27 = vsel %vm15903_vm14, 4294967295, %v19851_v27  ;;  %v966_v30 = vsel %vm934_vm8, 1, %v19710_v60  ;;  %v1125_v31 = vadd.s32 %v19856_v58, %v965_v49 }
 0x1d5   :  { %19853 = vst [vmem:[#allocation52_spill] sm:$0xff] %v19852_v27  ;;  %vm19857_vm0 = vcmp.ge.s32.totalorder %v14920_v51, 11  ;;  %v13728_v32 = vcombine.low %v15868_v25, %v15889_v55  ;;  %v1126_v52 = vadd.s32 %v15308_v59, %v966_v30  ;;  %v1246_v34 = vrot.slane %v965_v49, %v14755_v4  ;;  %v19922_v27 = vld [vmem:[#allocation56_spill] sm:$0xff] }
 0x1d6   :  { %vm15918_vm9 = vmand %vm19857_vm0, %vm703_vm4  ;;  %vm19861_vm8 = vcmp.ne.s32.totalorder %v571_v11, 0  ;;  %vm19862_vm10 = vcmp.ge.s32.totalorder %v14922_v13, 11  ;;  %v15936_v57 = vsel %vm15896_vm5, 0.0, %v1155_v50  ;;  %v19865_v21 = vrot.slane %v15158_v33, %v14755_v4 }
 0x1d7   :  { %vm15930_vm7 = vmand %vm19862_vm10, %vm19861_vm8  ;;  %v13726_v55 = vrot.slane %v13712_v48, %v15161_v61  ;;  %v1250_v11 = vrot.slane %v966_v30, %v14755_v4  ;;  %vm19868_vm10 = vcmp.le.f32.partialorder %v14999_v35, 0.5  ;;  %1401 = vrot.lane.b32.xlu0 %v15936_v57, %s14689_s18  ;;  %v15958_v50 = vsel %vm15903_vm14, 0.0, %v1156_v18 }
 0x1d8   :  { %vm15941_vm4 = vcmp.ne.s32.totalorder %v19865_v21, 0  ;;  %v13616_v49 = vsel %vm19868_vm10, %v1125_v31, %v19856_v58  ;;  %vm935_vm0 = vmand %vm15918_vm9, %vm15753_vm1  ;;  %v19869_v48 = vrot.slane %v15158_v33, %v14758_v5  ;;  %v13617_v7 = vsel %vm19868_vm10, %v1126_v52, %v15308_v59  ;;  %1403 = vrot.lane.b32.xlu1 %v15958_v50, %s14689_s18  ;;  %v529_v31 = vpop.permute.xlu0 %528  ;;  %v1157_v21 = vld [vmem:[%s19228_s2 + $0x90] sm:$0xff] }
 0x1d9   :  { %vm936_vm1 = vmand %vm15930_vm7, %vm15779_vm6  ;;  %v967_v58 = vsel %vm935_vm0, 1, %v19710_v60  ;;  %vm19872_vm9 = vcmp.lt.s32.totalorder %v14821_v43, 75  ;;  %v13727_v59 = vcombine.low %v13719_v19, %v13726_v55  ;;  %v13729_v52 = vcombine.low %v13616_v49, %v13617_v7  ;;  %v1158_v19 = vld [vmem:[%s19228_s2 + $0x98] sm:$0xff]  ;;  %v19878_v55 = vld [vmem:[#allocation35_spill] sm:$0xff] }
 0x1da   :  { %vm15963_vm8 = vcmp.ne.s32.totalorder %v19869_v48, 0  ;;  %v569_v5 = vsel %vm19872_vm9, %v523_v63, %v525_v8  ;;  %vm19873_vm13 = vmmov %vm19872_vm9  ;;  %v968_v2 = vsel %vm936_vm1, 1, %v19710_v60  ;;  %v1127_v28 = vadd.s32 %v15334_v39, %v967_v58 }
 0x1db   :  { %v570_v18 = vsel %vm19873_vm13, %v521_v41, %v523_v63  ;;  %v19875_v48 = vrot.slane %v15158_v33, %v14761_v6  ;;  %v1128_v63 = vadd.s32 %v15338_v40, %v968_v2  ;;  %v1254_v41 = vrot.slane %v967_v58, %v14755_v4  ;;  %13827 = vst [vmem:[%s19232_s6 + $0x8] sm:$0xff] %v13727_v59  ;;  %vm19879_vm0 = vmmov %vm19868_vm10 }
 0x1dc   :  { %vm705_vm7 = vcmp.ne.s32.totalorder %v570_v18, 0  ;;  %v16002_v49 = vrot.slane %v14963_v54, %v14782_v15  ;;  %v16008_v6 = vrot.slane %v13729_v52, %v15161_v61  ;;  %v16013_v7 = vsel %vm19879_vm0, %v1127_v28, %v15334_v39  ;;  %v531_v39 = vpop.permute.xlu1 %530 }
 0x1dd   :  { %vm15990_vm6 = vcmp.ne.s32.totalorder %v19875_v48, 0  ;;  %vm706_vm10 = vcmp.ne.s32.totalorder %v569_v5, 0  ;;  %vm19880_vm1 = vcmp.ge.s32.totalorder %v19830_v24, 11  ;;  %vm16021_vm13 = vcmp.eq.s32.totalorder %v1246_v34, 1  ;;  %v19945_v24 = vld [vmem:[#allocation57_spill] sm:$0xff] }
 0x1de   :  { %vm16017_vm9 = vmand %vm19880_vm1, %vm705_vm7  ;;  %v19883_v18 = vmov 0  ;;  %v19886_v59 = vrot.slane %v15158_v33, %v14767_v9  ;;  %v13619_v5 = vsel %vm19879_vm0, %v1128_v63, %v15338_v40  ;;  %vm19889_vm7 = vcmp.ge.s32.totalorder %v19835_v0, 11 }
 0x1df   :  { %v19884_v18 = vsel %vm16021_vm13, 4294967295, %v19883_v18  ;;  %vm16037_vm1 = vmand %vm19889_vm7, %vm706_vm10  ;;  %v16043_v34 = vsel %vm16021_vm13, 0.0, %v1157_v21  ;;  %vm16045_vm14 = vcmp.eq.s32.totalorder %v1250_v11, 1  ;;  %v19892_v9 = vmov 0 }
 0x1e0   :  { %19885 = vst [vmem:[#allocation53_spill] sm:$0xff] %v19884_v18  ;;  %vm16028_vm5 = vcmp.ne.s32.totalorder %v19886_v59, 0  ;;  %v19893_v9 = vsel %vm16045_vm14, 4294967295, %v19892_v9  ;;  %v567_v48 = vsel %vm19895_vm12, %v527_v12, %v529_v31  ;;  %v16051_v59 = vpop.permute.xlu0 %532  ;;  %v13738_v40 = vrot.slane %v13728_v32, %v15161_v61  ;;  %vm937_vm10 = vmand %vm16017_vm9, %vm15860_vm3  ;;  %1405 = vrot.lane.b32.xlu0 %v16043_v34, %s14689_s18  ;;  %v1159_v32 = vld [vmem:[%s19228_s2 + $0xa0] sm:$0xff]  ;;  %v535_v25 = vpop.permute.xlu1 %534 }
 0x1e1   :  { %19894 = vst [vmem:[#allocation72_spill] sm:$0xff] %v19893_v9  ;;  %v1258_v63 = vrot.slane %v968_v2, %v14755_v4  ;;  %v16063_v11 = vsel %vm16045_vm14, 0.0, %v1158_v19  ;;  %v568_v21 = vsel %vm19895_vm12, %v525_v8, %v527_v12  ;;  %vm938_vm0 = vmand %vm16037_vm1, %vm15882_vm15  ;;  %v969_v45 = vsel %vm937_vm10, 1, %v19710_v60  ;;  %v19899_v19 = vld [vmem:[#allocation54_spill] sm:$0xff] }
 0x1e2   :  { %1407 = vrot.lane.b32.xlu1 %v16063_v11, %s14689_s18  ;;  %vm707_vm3 = vcmp.ne.s32.totalorder %v568_v21, 0  ;;  %vm708_vm9 = vcmp.ne.s32.totalorder %v567_v48, 0  ;;  %vm16077_vm7 = vcmp.eq.s32.totalorder %v1254_v41, 1  ;;  %v19896_v2 = vmov 0  ;;  %v1160_v41 = vld [vmem:[%s19228_s2 + $0xa8] sm:$0xff]  ;;  %v19904_v21 = vld [vmem:[#allocation55_spill] sm:$0xff] }
 0x1e3   :  { %v19897_v2 = vsel %vm16077_vm7, 4294967295, %v19896_v2  ;;  %v13760_v12 = vcombine.low %v13738_v40, %v16008_v6  ;;  %v13730_v8 = vcombine.low %v16013_v7, %v13619_v5  ;;  %v970_v20 = vsel %vm938_vm0, 1, %v19710_v60  ;;  %v19903_v48 = vld [vmem:[#allocation38_spill] sm:$0xff] }
 0x1e4   :  { %19898 = vst [vmem:[#allocation73_spill] sm:$0xff] %v19897_v2  ;;  %v1129_v58 = vadd.s32 %v19899_v19, %v969_v45  ;;  %vm19900_vm15 = vcmp.ge.s32.totalorder %v19854_v62, 11  ;;  %v1130_v6 = vadd.s32 %v19904_v21, %v970_v20  ;;  %v1262_v7 = vrot.slane %v969_v45, %v14755_v4  ;;  %v19920_v2 = vld [vmem:[#allocation58_spill] sm:$0xff] }
 0x1e5   :  { %vm16087_vm1 = vmand %vm19900_vm15, %vm707_vm3  ;;  %v1266_v5 = vrot.slane %v970_v20, %v14755_v4  ;;  %vm19905_vm12 = vcmp.ge.s32.totalorder %v19860_v44, 11  ;;  %v16106_v54 = vsel %vm16077_vm7, 0.0, %v1159_v32  ;;  %v19908_v18 = vrot.slane %v15158_v33, %v14785_v16  ;;  %v537_v20 = vpop.permute.xlu0 %536 }
 0x1e6   :  { %vm16100_vm0 = vmand %vm19905_vm12, %vm708_vm9  ;;  %vm19911_vm15 = vcmp.le.f32.partialorder %v14999_v35, 0.5  ;;  %1409 = vrot.lane.b32.xlu0 %v16106_v54, %s14689_s18  ;;  %vm16124_vm12 = vcmp.eq.s32.totalorder %v1258_v63, 1  ;;  %v19912_v32 = vmov 0  ;;  %vm19915_vm10 = vcmp.lt.s32.totalorder %v14821_v43, 75 }
 0x1e7   :  { %vm16111_vm3 = vcmp.ne.s32.totalorder %v19908_v18, 0  ;;  %v13620_v45 = vsel %vm19911_vm15, %v1129_v58, %v19899_v19  ;;  %vm939_vm9 = vmand %vm16087_vm1, %vm15941_vm4  ;;  %v19913_v32 = vsel %vm16124_vm12, 4294967295, %v19912_v32  ;;  %v565_v16 = vsel %vm19915_vm10, %v531_v39, %v16051_v59  ;;  %v19917_v19 = vld [vmem:[#allocation36_spill] sm:$0xff] }
 0x1e8   :  { %19914 = vst [vmem:[#allocation54_spill] sm:$0xff] %v19913_v32  ;;  %vm19916_vm7 = vmmov %vm19915_vm10  ;;  %v971_v63 = vsel %vm939_vm9, 1, %v19710_v60  ;;  %v16144_v28 = vsel %vm16124_vm12, 0.0, %v1160_v41  ;;  %v19929_v32 = vmov 0  ;;  %v19972_v9 = vmov 0 }
 0x1e9   :  { %v566_v18 = vsel %vm19916_vm7, %v529_v31, %v531_v39  ;;  %vm19918_vm4 = vmmov %vm19911_vm15  ;;  %v1161_v31 = vld [vmem:[%s19228_s2 + $0xb0] sm:$0xff]  ;;  %v19919_v39 = vld [vmem:[#allocation37_spill] sm:$0xff]  ;;  %v1131_v62 = vadd.s32 %v19922_v27, %v971_v63  ;;  %1411 = vrot.lane.b32.xlu1 %v16144_v28, %s14689_s18 }
 0x1ea   :  { %v13621_v58 = vsel %vm19918_vm4, %v1130_v6, %v19904_v21  ;;  %vm940_vm1 = vmand %vm16100_vm0, %vm15963_vm8  ;;  %vm709_vm7 = vcmp.ne.s32.totalorder %v566_v18, 0  ;;  %v19921_v21 = vld [vmem:[#allocation49_spill] sm:$0xff]  ;;  %vm19923_vm8 = vcmp.ge.s32.totalorder %v19874_v29, 11  ;;  %v19926_v18 = vrot.slane %v15158_v33, %v14779_v14  ;;  %v1162_v14 = vld [vmem:[%s19228_s2 + $0xb8] sm:$0xff] }
 0x1eb   :  { %v16152_v6 = vadd.s32 %v19921_v21, %v19920_v2  ;;  %v13731_v30 = vcombine.low %v13620_v45, %v13621_v58  ;;  %v972_v40 = vsel %vm940_vm1, 1, %v19710_v60  ;;  %vm16160_vm0 = vmand %vm19923_vm8, %vm709_vm7  ;;  %v13768_v45 = vrot.slane %v13760_v12, %v15161_v61 }
 0x1ec   :  { %vm16167_vm9 = vcmp.ne.s32.totalorder %v19926_v18, 0  ;;  %v13752_v58 = vrot.slane %v13730_v8, %v15161_v61  ;;  %vm710_vm1 = vcmp.ne.s32.totalorder %v565_v16, 0  ;;  %vm941_vm7 = vmand %vm16160_vm0, %vm15990_vm6  ;;  %vm16178_vm8 = vcmp.eq.s32.totalorder %v1262_v7, 1  ;;  %v19935_v8 = vld [vmem:[#allocation10_spill] sm:$0xff]  ;;  %v19940_v7 = vld [vmem:[#allocation8_spill] sm:$0xff] }
 0x1ed   :  { %v19930_v32 = vsel %vm16178_vm8, 4294967295, %v19929_v32  ;;  %v19932_v18 = vrot.slane %v15158_v33, %v14782_v15  ;;  %v19936_v56 = vand.u32 63, %v19935_v8  ;;  %v19937_v16 = vmov 0  ;;  %v16215_v8 = vpop.permute.xlu1 %1369 }
 0x1ee   :  { %19931 = vst [vmem:[#allocation55_spill] sm:$0xff] %v19930_v32  ;;  %v19941_v41 = vand.u32 63, %v19940_v7  ;;  %v19942_v29 = vmov 0  ;;  %v13759_v44 = vrot.slane %v13731_v30, %v15161_v61  ;;  %v1132_v15 = vadd.s32 %v19945_v24, %v972_v40  ;;  %v19947_v30 = vld [vmem:[#allocation59_spill] sm:$0xff] }
 0x1ef   :  { %vm16188_vm4 = vcmp.ne.s32.totalorder %v19932_v18, 0  ;;  %vm16194_vm10 = vcmp.ge.s32.totalorder %v19936_v56, 1  ;;  %vm19946_vm0 = vcmp.ge.s32.totalorder %v19878_v55, 11  ;;  %v973_v33 = vsel %vm941_vm7, 1, %v19710_v60  ;;  %v16213_v56 = vpop.permute.xlu0 %1371 }
 0x1f0   :  { %v19938_v16 = vsel %vm16194_vm10, 4294967295, %v19937_v16  ;;  %vm16200_vm6 = vcmp.ge.s32.totalorder %v19941_v41, 1  ;;  %vm742_vm15 = vmand %vm19946_vm0, %vm710_vm1  ;;  %v16211_v18 = vsel %vm16178_vm8, 0.0, %v1161_v31  ;;  %v1270_v41 = vrot.slane %v971_v63, %v14755_v4 }
 0x1f1   :  { %19939 = vst [vmem:[#allocation58_spill] sm:$0xff] %v19938_v16  ;;  %v19943_v29 = vsel %vm16200_vm6, 4294967295, %v19942_v29  ;;  %v1274_v7 = vrot.slane %v972_v40, %v14755_v4  ;;  %vm942_vm13 = vmand %vm742_vm15, %vm16028_vm5  ;;  %v1133_v55 = vadd.s32 %v19947_v30, %v973_v33  ;;  %1413 = vrot.lane.b32.xlu0 %v16211_v18, %s14689_s18  ;;  %vm16224_vm1 = vcmp.eq.s32.totalorder %v1266_v5, 1  ;;  %v19952_v40 = vld [vmem:[#allocation60_spill] sm:$0xff] }
 0x1f2   :  { %19944 = vst [vmem:[#allocation49_spill] sm:$0xff] %v19943_v29  ;;  %v19948_v32 = vmov 0  ;;  %v13761_v31 = vcombine.low %v13752_v58, %v13759_v44  ;;  %vm19951_vm7 = vcmp.le.f32.partialorder %v14999_v35, 0.5  ;;  %v974_v63 = vsel %vm942_vm13, 1, %v19710_v60  ;;  %v19953_v44 = vld [vmem:[#allocation50_spill] sm:$0xff]  ;;  %v20052_v16 = vld [vmem:[#allocation20_spill] sm:$0xff] }
 0x1f3   :  { %v19949_v32 = vsel %vm16224_vm1, 4294967295, %v19948_v32  ;;  %v13622_v0 = vsel %vm19951_vm7, %v1131_v62, %v19922_v27  ;;  %v16234_v52 = vsel %vm16224_vm1, 0.0, %v1162_v14  ;;  %v1134_v51 = vadd.s32 %v19952_v40, %v974_v63  ;;  %v1163_v27 = vld [vmem:[%s19228_s2 + $0xc0] sm:$0xff]  ;;  %vm19960_vm15 = vmmov %vm19951_vm7  ;;  %v20059_v29 = vld [vmem:[#allocation22_spill] sm:$0xff] }
 0x1f4   :  { %19950 = vst [vmem:[#allocation56_spill] sm:$0xff] %v19949_v32  ;;  %v1278_v13 = vrot.slane %v973_v33, %v14755_v4  ;;  %v1282_v5 = vrot.slane %v974_v63, %v14755_v4  ;;  %1415 = vrot.lane.b32.xlu1 %v16234_v52, %s14689_s18  ;;  %vm19954_vm5 = vcmp.lt.s32.totalorder %v14821_v43, 75  ;;  %v19955_v62 = vld [vmem:[#allocation9_spill] sm:$0xff]  ;;  %v19957_v32 = vmov 0 }
 0x1f5   :  { %v562_v58 = vsel %vm19954_vm5, %v537_v20, %v19953_v44  ;;  %v19956_v14 = vand.u32 63, %v19955_v62  ;;  %v13775_v33 = vrot.slane %v13761_v31, %v15161_v61  ;;  %v13623_v63 = vsel %vm19960_vm15, %v1132_v15, %v19945_v24  ;;  %vm19961_vm7 = vmmov %vm19954_vm5  ;;  %v1164_v24 = vld [vmem:[%s19228_s2 + $0xc8] sm:$0xff]  ;;  %v16286_v15 = vpop.permute.xlu0 %1375 }
 0x1f6   :  { %vm713_vm0 = vcmp.ne.s32.totalorder %v562_v58, 0  ;;  %v563_v44 = vsel %vm19961_vm7, %v535_v25, %v537_v20  ;;  %vm19962_vm5 = vmmov %vm19960_vm15  ;;  %vm19963_vm8 = vcmp.ge.s32.totalorder %v19903_v48, 11  ;;  %vm16267_vm11 = vcmp.eq.s32.totalorder %v1270_v41, 1  ;;  %v1374_v41 = vpop.permute.xlu1 %1373 }
 0x1f7   :  { %vm16249_vm13 = vcmp.ge.s32.totalorder %v19956_v14, 1  ;;  %v13624_v47 = vsel %vm19962_vm5, %v1133_v55, %v19947_v30  ;;  %vm745_vm1 = vmand %vm19963_vm8, %vm713_vm0  ;;  %vm712_vm14 = vcmp.ne.s32.totalorder %v563_v44, 0  ;;  %v19965_v31 = vmov 0 }
 0x1f8   :  { %v19958_v32 = vsel %vm16249_vm13, 4294967295, %v19957_v32  ;;  %vm19964_vm12 = vmmov %vm19961_vm7  ;;  %v19966_v31 = vsel %vm16267_vm11, 4294967295, %v19965_v31  ;;  %v13776_v20 = vcombine.low %v13768_v45, %v13775_v33  ;;  %v19975_v30 = vmov 0 }
 0x1f9   :  { %19959 = vst [vmem:[#allocation57_spill] sm:$0xff] %v19958_v32  ;;  %v564_v14 = vsel %vm19964_vm12, %v16051_v59, %v535_v25  ;;  %19967 = vst [vmem:[#allocation59_spill] sm:$0xff] %v19966_v31  ;;  %v16281_v59 = vsel %vm16267_vm11, 0.0, %v1163_v27  ;;  %v1165_v25 = vld [vmem:[%s19228_s2 + $0xd0] sm:$0xff]  ;;  %vm19969_vm12 = vcmp.ge.s32.totalorder %v19917_v19, 11  ;;  %v19978_v58 = vmov 0 }
 0x1fa   :  { %vm19968_vm15 = vmmov %vm19962_vm5  ;;  %vm711_vm0 = vcmp.ne.s32.totalorder %v564_v14, 0  ;;  %1417 = vrot.lane.b32.xlu0 %v16281_v59, %s14689_s18  ;;  %vm16308_vm5 = vcmp.eq.s32.totalorder %v1282_v5, 1  ;;  %13828 = vst [vmem:[%s19232_s6 + $0x10] sm:$0xff] %v13776_v20 }
 0x1fb   :  { %v13625_v55 = vsel %vm19968_vm15, %v1134_v51, %v19952_v40  ;;  %vm945_vm8 = vmand %vm745_vm1, %vm16111_vm3  ;;  %vm16297_vm3 = vcmp.eq.s32.totalorder %v1274_v7, 1  ;;  %vm16301_vm1 = vcmp.eq.s32.totalorder %v1278_v13, 1  ;;  %v1166_v40 = vld [vmem:[%s19228_s2 + $0xd8] sm:$0xff]  ;;  %v19979_v58 = vsel %vm16308_vm5, 4294967295, %v19978_v58 }
 0x1fc   :  { %v977_v45 = vsel %vm945_vm8, 1, %v19710_v60  ;;  %vm16291_vm7 = vmand %vm19969_vm12, %vm711_vm0  ;;  %v19973_v9 = vsel %vm16297_vm3, 4294967295, %v19972_v9  ;;  %v19976_v30 = vsel %vm16301_vm1, 4294967295, %v19975_v30  ;;  %19980 = vst [vmem:[#allocation74_spill] sm:$0xff] %v19979_v58  ;;  %v13629_v7 = vsel %vm19968_vm15, %v16152_v6, %v19921_v21  ;;  %v20039_v58 = vld [vmem:[#allocation47_spill] sm:$0xff] }
 0x1fd   :  { %19974 = vst [vmem:[#allocation60_spill] sm:$0xff] %v19973_v9  ;;  %19977 = vst [vmem:[#allocation50_spill] sm:$0xff] %v19976_v30  ;;  %v13777_v13 = vcombine.low %v13622_v0, %v13623_v63  ;;  %v1137_v27 = vadd.s32 %v15468_v23, %v977_v45  ;;  %vm19981_vm8 = vcmp.ge.s32.totalorder %v19919_v39, 11  ;;  %v16329_v33 = vsel %vm16297_vm3, 0.0, %v1164_v24  ;;  %v20036_v30 = vld [vmem:[#allocation17_spill] sm:$0xff] }
 0x1fe   :  { %vm16323_vm0 = vmand %vm19981_vm8, %vm712_vm14  ;;  %v13778_v14 = vcombine.low %v13624_v47, %v13625_v55  ;;  %1419 = vrot.lane.b32.xlu1 %v16329_v33, %s14689_s18  ;;  %v16339_v0 = vsel %vm16301_vm1, 0.0, %v1165_v25  ;;  %vm19984_vm14 = vcmp.lt.s32.totalorder %v14821_v43, 65  ;;  %v1294_v6 = vrot.slane %v977_v45, %v14755_v4  ;;  %v1167_v55 = vld [vmem:[%s19228_s2 + $0xe0] sm:$0xff] }
 0x1ff   :  { %vm943_vm12 = vmand %vm16291_vm7, %vm16167_vm9  ;;  %v16344_v21 = vsel %vm19984_vm14, %v1374_v41, %v16286_v15  ;;  %vm19988_vm9 = vcmp.le.f32.partialorder %v14999_v35, 0.5  ;;  %v16363_v44 = vsel %vm16308_vm5, 0.0, %v1166_v40  ;;  %1421 = vrot.lane.b32.xlu0 %v16339_v0, %s14689_s18  ;;  %v13787_v25 = vrot.slane %v13777_v13, %v15161_v61 }
 0x200   :  { %19985 = vst [vmem:[#allocation75_spill] sm:$0xff] %v16344_v21  ;;  %vm19986_vm15 = vmmov %vm19984_vm14  ;;  %v13628_v2 = vsel %vm19988_vm9, %v1137_v27, %v15468_v23  ;;  %v975_v63 = vsel %vm943_vm12, 1, %v19710_v60  ;;  %13914 = vmatprep.subr.msk.mxu1 %vm16194_vm10, %v16344_v21  ;;  %v13794_v40 = vrot.slane %v13778_v14, %v15161_v61  ;;  %v19990_v27 = vmov 0  ;;  %v20018_v21 = vld [vmem:[#allocation43_spill] sm:$0xff] }
 0x201   :  { %v16350_v47 = vsel %vm19986_vm15, %v16215_v8, %v16213_v56  ;;  %vm944_vm7 = vmand %vm16323_vm0, %vm16188_vm4  ;;  %v13780_v23 = vcombine.low %v13628_v2, %v13629_v7  ;;  %v1135_v24 = vadd.s32 %v15721_v38, %v975_v63  ;;  %v1286_v20 = vrot.slane %v975_v63, %v14755_v4  ;;  %v16432_v63 = vld [vmem:[%s19229_s3] sm:$0xff] }
 0x202   :  { %19987 = vst [vmem:[#allocation76_spill] sm:$0xff] %v16350_v47  ;;  %13911 = vmatprep.subr.msk.mxu0 %vm16200_vm6, %v16350_v47  ;;  %v976_v12 = vsel %vm944_vm7, 1, %v19710_v60  ;;  %v1168_v60 = vld [vmem:[%s19228_s2 + $0xe8] sm:$0xff]  ;;  %vm19989_vm4 = vmmov %vm19988_vm9  ;;  %1423 = vrot.lane.b32.xlu1 %v16363_v44, %s14689_s18  ;;  %vm16411_vm15 = vcmp.eq.s32.totalorder %v1294_v6, 1  ;;  %v19999_v14 = vmov 0  ;;  %v1169_v6 = vld [vmem:[%s19228_s2 + $0xf0] sm:$0xff] }
 0x203   :  { %v1136_v45 = vadd.s32 %v16002_v49, %v976_v12  ;;  %v1290_v51 = vrot.slane %v976_v12, %v14755_v4  ;;  %v13626_v7 = vsel %vm19989_vm4, %v1135_v24, %v15721_v38  ;;  %vm16391_vm8 = vcmp.eq.s32.totalorder %v1286_v20, 1  ;;  %vm19993_vm0 = vmmov %vm19984_vm14  ;;  %v20024_v47 = vld [vmem:[#allocation15_spill] sm:$0xff] }
 0x204   :  { %v19991_v27 = vsel %vm16391_vm8, 4294967295, %v19990_v27  ;;  %v16398_v4 = vsel %vm19993_vm0, %v16213_v56, %v1374_v41  ;;  %vm19995_vm12 = vmmov %vm19989_vm4  ;;  %v16405_v5 = vsel %vm16391_vm8, 0.0, %v1167_v55  ;;  %v19996_v38 = vmov 0 }
 0x205   :  { %19992 = vst [vmem:[#allocation77_spill] sm:$0xff] %v19991_v27  ;;  %19994 = vst [vmem:[#allocation78_spill] sm:$0xff] %v16398_v4  ;;  %v13627_v13 = vsel %vm19995_vm12, %v1136_v45, %v16002_v49  ;;  %vm16407_vm14 = vcmp.eq.s32.totalorder %v1290_v51, 1  ;;  %v20000_v14 = vsel %vm16411_vm15, 4294967295, %v19999_v14  ;;  %13915 = vmatpush1.msk.msra.mxu1 %vm16249_vm13, %v16398_v4  ;;  %v13808_v56 = vrot.slane %v13780_v23, %v15161_v61  ;;  %v1378_v51 = vpop.permute.xlu0 %1377 }
 0x206   :  { %v19997_v38 = vsel %vm16407_vm14, 4294967295, %v19996_v38  ;;  %20001 = vst [vmem:[#allocation80_spill] sm:$0xff] %v20000_v14  ;;  %v13779_v41 = vcombine.low %v13626_v7, %v13627_v13  ;;  %1425 = vrot.lane.b32.xlu0 %v16405_v5, %s14689_s18  ;;  %v16423_v49 = vsel %vm16407_vm14, 0.0, %v1168_v60  ;;  %v19404_v2 = vmov 0.0   ;;  %v20029_v14 = vld [vmem:[#allocation14_spill] sm:$0xff] }
 0x207   :  { %19998 = vst [vmem:[#allocation79_spill] sm:$0xff] %v19997_v38  ;;  %1727 = vmatprep.mubr.f32.mxu0 %v19404_v2  ;;  %vm19403_vm9 = vcmask 64512   ;;  %1798 = vmatprep.mubr.f32.mxu1 %v19404_v2  ;;  %v13809_v23 = vcombine.low %v13787_v25, %v13794_v40  ;;  %v16442_v24 = vsel %vm16411_vm15, 0.0, %v1169_v6  ;;  %vm19406_vm7 = vcmp.ge.s32.totalorder %v14821_v43, 64  ;;  %v20038_v38 = vld [vmem:[#allocation16_spill] sm:$0xff] }
 0x208   :  { %v13801_v12 = vrot.slane %v13779_v41, %v15161_v61  ;;  %1427 = vrot.lane.b32.xlu1 %v16423_v49, %s14689_s18  ;;  %13916 = vmatmul.mubr.msk.f32.vlgmr.msra.gmra.mrb[0].mxu1 %vm19403_vm9, %v16432_v63  ;;  %v20002_v41 = vand.u32 63, %v14821_v43  ;;  %v20003_v6 = vmov 0  ;;  %vm20011_vm9 = vcmp.lt.s32.totalorder %v14821_v43, 65 }
 0x209   :  { %1940 = vmatprep.mubr.f32.mxu1 %v19404_v2  ;;  %v13817_v55 = vrot.slane %v13809_v23, %v15161_v61  ;;  %v16494_v40 = vpop.permute.xlu0 %2833  ;;  %v20015_v35 = vmov 0  ;;  %vm20019_vm15 = vmmov %vm20011_vm9  ;;  %vm20022_vm8 = vcmask 64512   ;;  %v20025_v4 = vmov 0.0  }
 0x20a   :  { %v13810_v20 = vcombine.low %v13801_v12, %v13808_v56  ;;  %1429 = vrot.lane.b32.xlu0 %v16442_v24, %s14689_s18  ;;  %vm16513_vm4 = vcmp.ge.s32.totalorder %v20002_v41, 1  ;;  %v20013_v41 = vld [vmem:[#allocation11_spill] sm:$0xff]  ;;  %s14694_s18 = smov 63   ;;  %vm20032_vm1 = vcmask 64512   ;;  %vm20046_vm14 = vcmask 64512  }
 0x20b   :  { %v20004_v6 = vsel %vm16513_vm4, 4294967295, %v20003_v6  ;;  %vm1530_vm0 = vmand %vm19406_vm7, %vm16513_vm4  ;;  %v20014_v2 = vand.u32 63, %v20013_v41 }
 0x20c   :  { %v13824_v25 = vrot.slane %v13810_v20, %v15161_v61  ;;  %2893 = vrot.lane.b32.xlu1 %v15438_v26, %s14690_s25  ;;  %v1380_v61 = vpop.permute.xlu1 %1379  ;;  %20005 = vst [vmem:[#allocation81_spill] sm:$0xff] %v20004_v6  ;;  %v20006_v20 = vld [vmem:[#allocation12_spill] sm:$0xff] }
 0x20d   :  { %v16504_v13 = vpop.permute.xlu0 %2837  ;;  %vm16543_vm7 = vcmp.ge.s32.totalorder %v20014_v2, 1  ;;  %v20023_v2 = vld [vmem:[#allocation44_spill] sm:$0xff] }
 0x20e   :  { %v13825_v45 = vcombine.low %v13817_v55, %v13824_v25  ;;  %2843 = vrot.lane.b32.xlu0 %v15494_v37, %s14690_s25  ;;  %v20007_v55 = vand.u32 63, %v20006_v20  ;;  %v20008_v25 = vmov 0  ;;  %v20016_v35 = vsel %vm16543_vm7, 4294967295, %v20015_v35 }
 0x20f   :  { %20017 = vst [vmem:[#allocation84_spill] sm:$0xff] %v20016_v35 }
 0x210   :  { %13829 = vst [vmem:[%s19232_s6 + $0x18] sm:$0xff] %v13825_v45  ;;  %2845 = vrot.lane.b32.xlu1 %v15518_v17, %s14690_s25  ;;  %v16486_v60 = vpop.permute.xlu1 %2831  ;;  %vm16531_vm12 = vcmp.ge.s32.totalorder %v20007_v55, 1  ;;  %v16552_v55 = vsel %vm20019_vm15, %v1378_v51, %v1380_v61  ;;  %vm19438_vm15 = vcmp.ge.s32.totalorder %v20024_v47, 1 }
 0x211   :  { %v16525_v23 = vpop.permute.xlu0 %2839  ;;  %v20009_v25 = vsel %vm16531_vm12, 4294967295, %v20008_v25  ;;  %20020 = vst [vmem:[#allocation43_spill] sm:$0xff] %v16552_v55 }
 0x212   :  { %2847 = vrot.lane.b32.xlu0 %v15599_v36, %s14690_s25  ;;  %20010 = vst [vmem:[#allocation82_spill] sm:$0xff] %v20009_v25  ;;  %v20045_v25 = vld [vmem:[#allocation18_spill] sm:$0xff] }
 0x214   :  { %2849 = vrot.lane.b32.xlu1 %v15635_v3, %s14690_s25  ;;  %v16496_v7 = vpop.permute.xlu1 %2835 }
 0x216   :  { %2851 = vrot.lane.b32.xlu0 %v15663_v10, %s14690_s25 }
 0x218   :  { %2853 = vrot.lane.b32.xlu1 %v15707_v53, %s14690_s25  ;;  %v16506_v56 = vpop.permute.xlu1 %2841 }
 0x21a   :  { %2855 = vrot.lane.b32.xlu0 %v15733_v22, %s14690_s25 }
 0x21c   :  { %2857 = vrot.lane.b32.xlu1 %v15771_v1, %s14690_s25  ;;  %v16527_v12 = vpop.permute.xlu1 %1431 }
 0x21d   :  { %v16539_v45 = vsel %vm20011_vm9, %v16527_v12, %v16215_v8  ;;  %v16557_v8 = vsel %vm20011_vm9, %v16286_v15, %v1378_v51  ;;  %v20026_v15 = vld [vmem:[#allocation45_spill] sm:$0xff] }
 0x21e   :  { %2859 = vrot.lane.b32.xlu0 %v15822_v46, %s14690_s25  ;;  %20012 = vst [vmem:[#allocation83_spill] sm:$0xff] %v16539_v45  ;;  %13912 = vmatpush1.msk.msra.mxu0 %vm1530_vm0, %v16539_v45  ;;  %20021 = vst [vmem:[#allocation85_spill] sm:$0xff] %v16557_v8 }
 0x21f   :  { %13917 = vmatprep.subr.msk.mxu0 %vm16531_vm12, %v16552_v55  ;;  %13913 = vmatmul.mubr.msk.f32.vlgmr.msra.gmra.mrb[0].mxu0 %vm20022_vm8, %v16432_v63  ;;  %vm20027_vm0 = vmmov %vm20011_vm9  ;;  %vm19431_vm8 = vcmp.ge.s32.totalorder %v20029_v14, 1 }
 0x220   :  { %2861 = vrot.lane.b32.xlu1 %v15853_v42, %s14690_s25  ;;  %13918 = vmatpush1.msk.msra.mxu0 %vm16543_vm7, %v16557_v8  ;;  %vm20030_vm9 = vmmov %vm20027_vm0  ;;  %v20033_v8 = vld [vmem:[#allocation46_spill] sm:$0xff] }
 0x221   :  { %v1382_v45 = vpop.permute.xlu0 %1381  ;;  %1869 = vmatprep.mubr.f32.mxu0 %v20025_v4 }
 0x222   :  { %2863 = vrot.lane.b32.xlu0 %v15936_v57, %s14690_s25  ;;  %v16575_v51 = vsel %vm20027_vm0, %v1380_v61, %v1382_v45  ;;  %vm20034_vm0 = vmmov %vm20032_vm1 }
 0x223   :  { %20028 = vst [vmem:[#allocation44_spill] sm:$0xff] %v16575_v51  ;;  %v1384_v55 = vpop.permute.xlu1 %1383  ;;  %13919 = vmatmul.mubr.msk.f32.vlgmr.msra.gmra.mrb[2].mxu0 %vm20032_vm1, %v16432_v63  ;;  %vm19445_vm1 = vcmp.ge.s32.totalorder %v20036_v30, 1 }
 0x224   :  { %2865 = vrot.lane.b32.xlu1 %v15958_v50, %s14690_s25  ;;  %v16580_v27 = vsel %vm20030_vm9, %v1382_v45, %v1384_v55  ;;  %2011 = vmatprep.mubr.f32.mxu0 %v20025_v4  ;;  %v20035_v45 = vld [vmem:[#allocation48_spill] sm:$0xff] }
 0x225   :  { %20031 = vst [vmem:[#allocation45_spill] sm:$0xff] %v16580_v27  ;;  %13920 = vmatprep.subr.msk.mxu1 %vm19438_vm15, %v16580_v27 }
 0x226   :  { %2867 = vrot.lane.b32.xlu0 %v16043_v34, %s14690_s25  ;;  %13921 = vmatpush1.msk.msra.mxu1 %vm19431_vm8, %v16575_v51  ;;  %vm19452_vm8 = vcmp.ge.s32.totalorder %v20038_v38, 1 }
 0x227   :  { %13922 = vmatmul.mubr.msk.f32.vlgmr.msra.gmra.mrb[2].mxu1 %vm20034_vm0, %v16432_v63  ;;  %vm20040_vm0 = vmmov %vm20030_vm9 }
 0x228   :  { %2869 = vrot.lane.b32.xlu1 %v16063_v11, %s14690_s25  ;;  %2082 = vmatprep.mubr.f32.mxu1 %v20025_v4  ;;  %vm20043_vm15 = vmmov %vm20040_vm0 }
 0x22a   :  { %2871 = vrot.lane.b32.xlu0 %v16106_v54, %s14690_s25  ;;  %v1386_v61 = vpop.permute.xlu0 %1385 }
 0x22b   :  { %v16603_v27 = vsel %vm20030_vm9, %v1384_v55, %v1386_v61  ;;  %v20042_v55 = vld [vmem:[#allocation19_spill] sm:$0xff] }
 0x22c   :  { %2873 = vrot.lane.b32.xlu1 %v16144_v28, %s14690_s25  ;;  %20037 = vst [vmem:[#allocation46_spill] sm:$0xff] %v16603_v27  ;;  %vm19453_vm9 = vcmp.ge.s32.totalorder %v20042_v55, 1 }
 0x22e   :  { %2875 = vrot.lane.b32.xlu0 %v16211_v18, %s14690_s25 }
 0x22f   :  { %v1388_v51 = vpop.permute.xlu1 %1387 }
 0x230   :  { %2877 = vrot.lane.b32.xlu1 %v16234_v52, %s14690_s25  ;;  %v16610_v31 = vsel %vm20040_vm0, %v1386_v61, %v1388_v51  ;;  %vm19460_vm0 = vcmp.ge.s32.totalorder %v20045_v25, 1 }
 0x231   :  { %20041 = vst [vmem:[#allocation48_spill] sm:$0xff] %v16610_v31  ;;  %13923 = vmatprep.subr.msk.mxu0 %vm19445_vm1, %v16610_v31  ;;  %vm20047_vm1 = vmmov %vm20043_vm15 }
 0x232   :  { %2879 = vrot.lane.b32.xlu0 %v16281_v59, %s14690_s25  ;;  %v1390_v9 = vpop.permute.xlu0 %1389  ;;  %13924 = vmatpush1.msk.msra.mxu0 %vm19452_vm8, %v16603_v27  ;;  %v20049_v27 = vld [vmem:[#allocation21_spill] sm:$0xff]  ;;  %vm20053_vm8 = vcmask 64512  }
 0x233   :  { %v16623_v35 = vsel %vm20043_vm15, %v1388_v51, %v1390_v9  ;;  %13925 = vmatmul.mubr.msk.f32.vlgmr.msra.gmra.mrb[4].mxu0 %vm20046_vm14, %v16432_v63  ;;  %vm19461_vm14 = vcmp.ge.s32.totalorder %v20049_v27, 1  ;;  %vm20050_vm15 = vmmov %vm20047_vm1  ;;  %v20094_v27 = vld [vmem:[#allocation34_spill] sm:$0xff] }
 0x234   :  { %2881 = vrot.lane.b32.xlu1 %v16329_v33, %s14690_s25  ;;  %20044 = vst [vmem:[#allocation47_spill] sm:$0xff] %v16623_v35  ;;  %2153 = vmatprep.mubr.f32.mxu0 %v20025_v4 }
 0x235   :  { %v1392_v61 = vpop.permute.xlu1 %1391 }
 0x236   :  { %2883 = vrot.lane.b32.xlu0 %v16339_v0, %s14690_s25  ;;  %v16632_v31 = vsel %vm20047_vm1, %v1390_v9, %v1392_v61  ;;  %vm19496_vm1 = vcmp.ge.s32.totalorder %v20052_v16, 1 }
 0x237   :  { %20048 = vst [vmem:[#allocation86_spill] sm:$0xff] %v16632_v31  ;;  %13926 = vmatprep.subr.msk.mxu1 %vm19453_vm9, %v16632_v31  ;;  %v1394_v51 = vpop.permute.xlu0 %1393  ;;  %vm20054_vm9 = vmmov %vm20050_vm15 }
 0x238   :  { %2885 = vrot.lane.b32.xlu1 %v16363_v44, %s14690_s25  ;;  %13927 = vmatpush1.msk.msra.mxu1 %vm19460_vm0, %v16623_v35  ;;  %v16646_v9 = vsel %vm20050_vm15, %v1392_v61, %v1394_v51  ;;  %v20056_v35 = vld [vmem:[#allocation23_spill] sm:$0xff]  ;;  %vm20057_vm15 = vmmov %vm20054_vm9  ;;  %vm20060_vm0 = vcmask 64512  }
 0x239   :  { %20051 = vst [vmem:[#allocation87_spill] sm:$0xff] %v16646_v9  ;;  %13928 = vmatmul.mubr.msk.f32.vlgmr.msra.gmra.mrb[4].mxu1 %vm20053_vm8, %v16432_v63  ;;  %vm19466_vm8 = vcmp.ge.s32.totalorder %v20056_v35, 1  ;;  %v20066_v35 = vld [vmem:[#allocation24_spill] sm:$0xff] }
 0x23a   :  { %2887 = vrot.lane.b32.xlu0 %v16405_v5, %s14690_s25  ;;  %v1396_v32 = vpop.permute.xlu1 %1395  ;;  %2224 = vmatprep.mubr.f32.mxu1 %v20025_v4 }
 0x23b   :  { %v16655_v31 = vsel %vm20054_vm9, %v1394_v51, %v1396_v32  ;;  %vm19467_vm9 = vcmp.ge.s32.totalorder %v20059_v29, 1  ;;  %v20074_v29 = vld [vmem:[#allocation29_spill] sm:$0xff] }
 0x23c   :  { %2889 = vrot.lane.b32.xlu1 %v16423_v49, %s14690_s25  ;;  %20055 = vst [vmem:[#allocation88_spill] sm:$0xff] %v16655_v31  ;;  %13929 = vmatprep.subr.msk.mxu0 %vm19461_vm14, %v16655_v31  ;;  %vm20061_vm14 = vmmov %vm20057_vm15 }
 0x23d   :  { %13930 = vmatpush1.msk.msra.mxu0 %vm19496_vm1, %v16646_v9  ;;  %v20063_v9 = vld [vmem:[#allocation25_spill] sm:$0xff]  ;;  %vm20095_vm1 = vcmask 64512  }
 0x23e   :  { %2891 = vrot.lane.b32.xlu0 %v16442_v24, %s14690_s25  ;;  %13931 = vmatmul.mubr.msk.f32.vlgmr.msra.gmra.mrb[6].mxu0 %vm20060_vm0, %v16432_v63  ;;  %vm19473_vm0 = vcmp.ge.s32.totalorder %v20063_v9, 1  ;;  %s14695_s25 = smov 1  }
 0x23f   :  { %v1398_v61 = vpop.permute.xlu0 %1397  ;;  %2295 = vmatprep.mubr.f32.mxu0 %v20025_v4 }
 0x240   :  { %4197 = vrot.lane.b32.xlu1 %v20018_v21, %s14694_s18  ;;  %v16669_v51 = vsel %vm20057_vm15, %v1396_v32, %v1398_v61  ;;  %vm20064_vm15 = vcmask 64512  }
 0x241   :  { %20058 = vst [vmem:[#allocation89_spill] sm:$0xff] %v16669_v51 }
 0x242   :  { %4199 = vrot.lane.b32.xlu0 %v20023_v2, %s14694_s18  ;;  %v1400_v6 = vpop.permute.xlu1 %1399 }
 0x243   :  { %v16678_v31 = vsel %vm20061_vm14, %v1398_v61, %v1400_v6 }
 0x244   :  { %4201 = vrot.lane.b32.xlu1 %v20026_v15, %s14694_s18  ;;  %20062 = vst [vmem:[#allocation90_spill] sm:$0xff] %v16678_v31  ;;  %13932 = vmatprep.subr.msk.mxu1 %vm19466_vm8, %v16678_v31  ;;  %vm19472_vm8 = vcmp.ge.s32.totalorder %v20066_v35, 1 }
 0x245   :  { %13933 = vmatpush1.msk.msra.mxu1 %vm19467_vm9, %v16669_v51  ;;  %vm20067_vm9 = vmmov %vm20061_vm14 }
 0x246   :  { %4203 = vrot.lane.b32.xlu0 %v20033_v8, %s14694_s18  ;;  %13934 = vmatmul.mubr.msk.f32.vlgmr.msra.gmra.mrb[6].mxu1 %vm20064_vm15, %v16432_v63 }
 0x247   :  { %2366 = vmatprep.mubr.f32.mxu1 %v20025_v4 }
 0x248   :  { %4259 = vrot.lane.b32.xlu1 %v15438_v26, %s14694_s18 }
 0x249   :  { %v1402_v32 = vpop.permute.xlu0 %1401 }
 0x24a   :  { %4205 = vrot.lane.b32.xlu0 %v20035_v45, %s14694_s18  ;;  %v16696_v61 = vsel %vm20061_vm14, %v1400_v6, %v1402_v32  ;;  %v1404_v31 = vpop.permute.xlu1 %1403 }
 0x24b   :  { %20065 = vst [vmem:[#allocation91_spill] sm:$0xff] %v16696_v61  ;;  %v16702_v51 = vsel %vm20067_vm9, %v1402_v32, %v1404_v31  ;;  %v20069_v32 = vld [vmem:[#allocation27_spill] sm:$0xff] }
 0x24c   :  { %4207 = vrot.lane.b32.xlu1 %v20039_v58, %s14694_s18  ;;  %20068 = vst [vmem:[#allocation92_spill] sm:$0xff] %v16702_v51  ;;  %13935 = vmatprep.subr.msk.mxu0 %vm19473_vm0, %v16702_v51  ;;  %vm19478_vm9 = vcmp.ge.s32.totalorder %v20069_v32, 1  ;;  %vm20072_vm0 = vmmov %vm20061_vm14  ;;  %v20077_v32 = vld [vmem:[#allocation28_spill] sm:$0xff] }
 0x24d   :  { %13936 = vmatpush1.msk.msra.mxu0 %vm19472_vm8, %v16696_v61  ;;  %v20071_v61 = vld [vmem:[#allocation26_spill] sm:$0xff] }
 0x24e   :  { %4209 = vrot.lane.b32.xlu0 %v15494_v37, %s14694_s18  ;;  %13937 = vmatmul.mubr.msk.f32.vlgmr.msra.gmra.mrb[8].mxu0 %vm20064_vm15, %v16432_v63  ;;  %vm19479_vm8 = vcmp.ge.s32.totalorder %v20071_v61, 1  ;;  %vm19484_vm15 = vcmp.ge.s32.totalorder %v20074_v29, 1  ;;  %v20083_v29 = vld [vmem:[#allocation30_spill] sm:$0xff] }
 0x24f   :  { %2437 = vmatprep.mubr.f32.mxu0 %v20025_v4 }
 0x250   :  { %4211 = vrot.lane.b32.xlu1 %v15518_v17, %s14694_s18 }
 0x252   :  { %4213 = vrot.lane.b32.xlu0 %v15599_v36, %s14694_s18  ;;  %v1406_v6 = vpop.permute.xlu0 %1405 }
 0x253   :  { %v16722_v51 = vsel %vm20061_vm14, %v1404_v31, %v1406_v6 }
 0x254   :  { %4215 = vrot.lane.b32.xlu1 %v15635_v3, %s14694_s18  ;;  %20070 = vst [vmem:[#allocation93_spill] sm:$0xff] %v16722_v51  ;;  %v1408_v35 = vpop.permute.xlu1 %1407 }
 0x255   :  { %v16727_v9 = vsel %vm20072_vm0, %v1406_v6, %v1408_v35  ;;  %vm20075_vm0 = vcmask 64512  }
 0x256   :  { %4217 = vrot.lane.b32.xlu0 %v15663_v10, %s14694_s18  ;;  %20073 = vst [vmem:[#allocation94_spill] sm:$0xff] %v16727_v9  ;;  %13938 = vmatprep.subr.msk.mxu1 %vm19478_vm9, %v16727_v9  ;;  %vm19485_vm9 = vcmp.ge.s32.totalorder %v20077_v32, 1 }
 0x257   :  { %13939 = vmatpush1.msk.msra.mxu1 %vm19479_vm8, %v16722_v51  ;;  %vm20078_vm8 = vmmov %vm20061_vm14  ;;  %v20080_v51 = vld [vmem:[#allocation31_spill] sm:$0xff] }
 0x258   :  { %4219 = vrot.lane.b32.xlu1 %v15707_v53, %s14694_s18  ;;  %v1410_v31 = vpop.permute.xlu0 %1409  ;;  %13940 = vmatmul.mubr.msk.f32.vlgmr.msra.gmra.mrb[8].mxu1 %vm20075_vm0, %v16432_v63  ;;  %vm19491_vm0 = vcmp.ge.s32.totalorder %v20080_v51, 1 }
 0x259   :  { %v16744_v6 = vsel %vm20061_vm14, %v1408_v35, %v1410_v31  ;;  %2508 = vmatprep.mubr.f32.mxu1 %v20025_v4  ;;  %vm20081_vm14 = vcmask 64512  }
 0x25a   :  { %4221 = vrot.lane.b32.xlu0 %v15733_v22, %s14694_s18  ;;  %20076 = vst [vmem:[#allocation95_spill] sm:$0xff] %v16744_v6 }
 0x25b   :  { %v1412_v16 = vpop.permute.xlu1 %1411 }
 0x25c   :  { %4223 = vrot.lane.b32.xlu1 %v15771_v1, %s14694_s18  ;;  %v16752_v9 = vsel %vm20078_vm8, %v1410_v31, %v1412_v16 }
 0x25d   :  { %20079 = vst [vmem:[#allocation96_spill] sm:$0xff] %v16752_v9  ;;  %13941 = vmatprep.subr.msk.mxu0 %vm19484_vm15, %v16752_v9  ;;  %vm19490_vm15 = vcmp.ge.s32.totalorder %v20083_v29, 1 }
 0x25e   :  { %4225 = vrot.lane.b32.xlu0 %v15822_v46, %s14694_s18  ;;  %13942 = vmatpush1.msk.msra.mxu0 %vm19485_vm9, %v16744_v6  ;;  %vm20084_vm9 = vmmov %vm20078_vm8 }
 0x25f   :  { %13943 = vmatmul.mubr.msk.f32.vlgmr.msra.gmra.mrb[10].mxu0 %vm20081_vm14, %v16432_v63 }
 0x260   :  { %4227 = vrot.lane.b32.xlu1 %v15853_v42, %s14694_s18  ;;  %2579 = vmatprep.mubr.f32.mxu0 %v20025_v4 }
 0x262   :  { %4229 = vrot.lane.b32.xlu0 %v15936_v57, %s14694_s18 }
 0x263   :  { %v1414_v35 = vpop.permute.xlu0 %1413 }
 0x264   :  { %4231 = vrot.lane.b32.xlu1 %v15958_v50, %s14694_s18  ;;  %v16769_v31 = vsel %vm20078_vm8, %v1412_v16, %v1414_v35 }
 0x265   :  { %20082 = vst [vmem:[#allocation97_spill] sm:$0xff] %v16769_v31 }
 0x266   :  { %4233 = vrot.lane.b32.xlu0 %v16043_v34, %s14694_s18  ;;  %v1416_v9 = vpop.permute.xlu1 %1415 }
 0x267   :  { %v16775_v6 = vsel %vm20084_vm9, %v1414_v35, %v1416_v9  ;;  %v20086_v35 = vld [vmem:[#allocation33_spill] sm:$0xff] }
 0x268   :  { %4235 = vrot.lane.b32.xlu1 %v16063_v11, %s14694_s18  ;;  %20085 = vst [vmem:[#allocation98_spill] sm:$0xff] %v16775_v6  ;;  %13944 = vmatprep.subr.msk.mxu1 %vm19491_vm0, %v16775_v6  ;;  %vm19497_vm9 = vcmp.ge.s32.totalorder %v20086_v35, 1  ;;  %vm20089_vm0 = vmmov %vm20078_vm8 }
 0x269   :  { %13945 = vmatpush1.msk.msra.mxu1 %vm19490_vm15, %v16769_v31  ;;  %v20088_v31 = vld [vmem:[#allocation32_spill] sm:$0xff] }
 0x26a   :  { %4237 = vrot.lane.b32.xlu0 %v16106_v54, %s14694_s18  ;;  %13946 = vmatmul.mubr.msk.f32.vlgmr.msra.gmra.mrb[10].mxu1 %vm20081_vm14, %v16432_v63  ;;  %vm19500_vm15 = vcmp.ge.s32.totalorder %v20088_v31, 1 }
 0x26b   :  { %2650 = vmatprep.mubr.f32.mxu1 %v20025_v4 }
 0x26c   :  { %4239 = vrot.lane.b32.xlu1 %v16144_v28, %s14694_s18  ;;  %v1418_v16 = vpop.permute.xlu0 %1417 }
 0x26d   :  { %v16793_v32 = vsel %vm20078_vm8, %v1416_v9, %v1418_v16  ;;  %v20091_v9 = vld [vmem:[#allocation35_spill] sm:$0xff]  ;;  %vm20092_vm8 = vmmov %vm20089_vm0 }
 0x26e   :  { %4241 = vrot.lane.b32.xlu0 %v16211_v18, %s14694_s18  ;;  %20087 = vst [vmem:[#allocation99_spill] sm:$0xff] %v16793_v32  ;;  %vm19501_vm14 = vcmp.ge.s32.totalorder %v20091_v9, 1  ;;  %vm20100_vm5 = vmmov %vm20092_vm8 }
 0x270   :  { %4243 = vrot.lane.b32.xlu1 %v16234_v52, %s14694_s18  ;;  %v1420_v6 = vpop.permute.xlu1 %1419 }
 0x271   :  { %v16800_v29 = vsel %vm20089_vm0, %v1418_v16, %v1420_v6  ;;  %v1422_v51 = vpop.permute.xlu0 %1421  ;;  %vm19546_vm0 = vcmp.ge.s32.totalorder %v20094_v27, 1 }
 0x272   :  { %4245 = vrot.lane.b32.xlu0 %v16281_v59, %s14694_s18  ;;  %20090 = vst [vmem:[#allocation100_spill] sm:$0xff] %v16800_v29  ;;  %13947 = vmatprep.subr.msk.mxu0 %vm19497_vm9, %v16800_v29  ;;  %v16813_v61 = vsel %vm20092_vm8, %v1420_v6, %v1422_v51  ;;  %vm20096_vm9 = vmmov %vm20092_vm8 }
 0x273   :  { %13948 = vmatpush1.msk.msra.mxu0 %vm19500_vm15, %v16793_v32  ;;  %20093 = vst [vmem:[#allocation101_spill] sm:$0xff] %v16813_v61  ;;  %vm20099_vm15 = vcmask 64512  }
 0x274   :  { %4247 = vrot.lane.b32.xlu1 %v16329_v33, %s14694_s18  ;;  %v1424_v16 = vpop.permute.xlu1 %1423  ;;  %13949 = vmatmul.mubr.msk.f32.vlgmr.msra.gmra.mrb[12].mxu0 %vm20095_vm1, %v16432_v63  ;;  %vm19508_vm1 = vcmp.ge.s32.totalorder %v19919_v39, 1 }
 0x275   :  { %v16822_v29 = vsel %vm20096_vm9, %v1422_v51, %v1424_v16  ;;  %2721 = vmatprep.mubr.f32.mxu0 %v20025_v4  ;;  %vm19510_vm9 = vcmp.ge.s32.totalorder %v19917_v19, 1 }
 0x276   :  { %4249 = vrot.lane.b32.xlu0 %v16339_v0, %s14694_s18  ;;  %20097 = vst [vmem:[#allocation102_spill] sm:$0xff] %v16822_v29  ;;  %13950 = vmatprep.subr.msk.mxu1 %vm19501_vm14, %v16822_v29  ;;  %vm2895_vm14 = vcmp.lt.s32.totalorder %v14821_v43, 64 }
 0x277   :  { %13951 = vmatpush1.msk.msra.mxu1 %vm19546_vm0, %v16813_v61  ;;  %v20102_v61 = vld [vmem:[#allocation39_spill] sm:$0xff] }
 0x278   :  { %4251 = vrot.lane.b32.xlu1 %v16363_v44, %s14694_s18  ;;  %v1426_v6 = vpop.permute.xlu0 %1425  ;;  %13952 = vmatmul.mubr.msk.f32.vlgmr.msra.gmra.mrb[12].mxu1 %vm20099_vm15, %v16432_v63  ;;  %vm20105_vm15 = vmmov %vm20100_vm5 }
 0x279   :  { %v16836_v51 = vsel %vm20092_vm8, %v1424_v16, %v1426_v6  ;;  %2792 = vmatprep.mubr.f32.mxu1 %v20025_v4  ;;  %vm19545_vm8 = vcmp.ge.s32.totalorder %v20102_v61, 1 }
 0x27a   :  { %20098 = vst [vmem:[#allocation103_spill] sm:$0xff] %v16836_v51  ;;  %v1428_v32 = vpop.permute.xlu1 %1427  ;;  %4253 = vrot.lane.b32.xlu0 %v16405_v5, %s14694_s18 }
 0x27b   :  { %v16846_v29 = vsel %vm20100_vm5, %v1426_v6, %v1428_v32  ;;  %v16862_v6 = vsel %vm2895_vm14, %v16486_v60, %v16494_v40 }
 0x27c   :  { %20101 = vst [vmem:[#allocation104_spill] sm:$0xff] %v16846_v29  ;;  %4255 = vrot.lane.b32.xlu1 %v16423_v49, %s14694_s18  ;;  %13953 = vmatprep.subr.msk.mxu0 %vm19508_vm1, %v16846_v29  ;;  %v1430_v16 = vpop.permute.xlu0 %1429  ;;  %20103 = vst [vmem:[#allocation105_spill] sm:$0xff] %v16862_v6  ;;  %vm20106_vm1 = vcmask 64512  }
 0x27d   :  { %13954 = vmatpush1.msk.msra.mxu0 %vm19510_vm9, %v16836_v51  ;;  %v16867_v27 = vsel %vm20100_vm5, %v1430_v16, %v16527_v12  ;;  %v16871_v29 = vsel %vm20105_vm15, %v1428_v32, %v1430_v16  ;;  %vm19543_vm9 = vcmp.ge.s32.totalorder %v19903_v48, 1  ;;  %v16908_v32 = vsel %vm2895_vm14, %v16525_v23, %v16506_v56 }
 0x27e   :  { %20104 = vst [vmem:[#allocation106_spill] sm:$0xff] %v16867_v27  ;;  %13955 = vmatmul.mubr.msk.f32.vlgmr.msra.gmra.mrb[14].mxu0 %vm20106_vm1, %v16432_v63  ;;  %3029 = vmatprep.subr.mxu0 %v16862_v6  ;;  %v16876_v51 = vpop.permute.xlu1 %2893  ;;  %vm20108_vm1 = vcmp.ge.s32.totalorder %v14821_v43, 64  ;;  %20109 = vst [vmem:[#allocation108_spill] sm:$0xff] %v16908_v32  ;;  %vm20110_vm5 = vcmask 64512   ;;  %v16917_v16 = vsel %vm2895_vm14, %v16496_v7, %v16504_v13 }
 0x27f   :  { %v16883_v19 = vsel %vm2895_vm14, %v16876_v51, %v16486_v60  ;;  %4257 = vrot.lane.b32.xlu0 %v16442_v24, %s14694_s18  ;;  %13956 = vmatprep.subr.msk.mxu1 %vm19545_vm8, %v16867_v27  ;;  %v16898_v60 = vld [vmem:[%s19229_s3 + $0x8] sm:$0xff]  ;;  %20111 = vst [vmem:[#allocation109_spill] sm:$0xff] %v16917_v16  ;;  %vm20112_vm15 = vmmov %vm20110_vm5  ;;  %v20163_v27 = vmov 0  ;;  %vm20166_vm8 = vcmp.ge.s32.totalorder %v14821_v43, 64 }
 0x280   :  { %20107 = vst [vmem:[#allocation107_spill] sm:$0xff] %v16883_v19  ;;  %5627 = vrot.lane.b32.xlu1 %v20018_v21, %s14695_s25  ;;  %13960 = vmatpush1.msk.msra.mxu0 %vm20108_vm1, %v16883_v19  ;;  %v2844_v12 = vpop.permute.xlu0 %2843  ;;  %vm20115_vm1 = vmmov %vm20110_vm5 }
 0x281   :  { %13957 = vmatpush1.msk.msra.mxu1 %vm19543_vm9, %v16871_v29  ;;  %3093 = vmatprep.mubr.f32.mxu0 %v20025_v4 }
 0x282   :  { %3171 = vmatprep.subr.mxu0 %v16908_v32  ;;  %13958 = vmatmul.mubr.msk.f32.vlgmr.msra.gmra.mrb[14].mxu1 %vm20110_vm5, %v16432_v63  ;;  %v2846_v19 = vpop.permute.xlu1 %2845  ;;  %v16926_v32 = vsel %vm2895_vm14, %v16504_v13, %v16525_v23  ;;  %v16932_v63 = vsel %vm2895_vm14, %v16494_v40, %v16496_v7  ;;  %v16951_v7 = vsel %vm2895_vm14, %v16506_v56, %v2844_v12  ;;  %vm20119_vm5 = vmmov %vm20115_vm1 }
 0x283   :  { %13961 = vmatmul.mubr.msk.f32.vlgmr.msra.gmra.mrb[0].mxu0 %vm20112_vm15, %v16898_v60  ;;  %3100 = vmatprep.subr.mxu1 %v16917_v16  ;;  %20113 = vst [vmem:[#allocation110_spill] sm:$0xff] %v16926_v32  ;;  %v16936_v6 = vsel %vm2895_vm14, %v2844_v12, %v2846_v19  ;;  %20116 = vst [vmem:[#allocation112_spill] sm:$0xff] %v16951_v7 }
 0x284   :  { %20114 = vst [vmem:[#allocation111_spill] sm:$0xff] %v16936_v6  ;;  %3172 = vmatpush1.msra.mxu0 %v16926_v32  ;;  %3101 = vmatpush1.msra.mxu1 %v16932_v63  ;;  %v2848_v16 = vpop.permute.xlu0 %2847  ;;  %vm20121_vm15 = vmmov %vm20115_vm1  ;;  %v20162_v32 = vand.u32 63, %v19955_v62 }
 0x285   :  { %5629 = vrot.lane.b32.xlu0 %v20023_v2, %s14695_s25  ;;  %5631 = vrot.lane.b32.xlu1 %v20026_v15, %s14695_s25  ;;  %v16962_v23 = vsel %vm2895_vm14, %v2846_v19, %v2848_v16 }
 0x286   :  { %3242 = vmatprep.subr.mxu1 %v16936_v6  ;;  %3164 = vmatprep.mubr.f32.mxu1 %v20025_v4  ;;  %v2850_v40 = vpop.permute.xlu1 %2849  ;;  %20118 = vst [vmem:[#allocation114_spill] sm:$0xff] %v16962_v23  ;;  %vm17195_vm9 = vcmp.lt.s32.totalorder %v20162_v32, 63 }
 0x287   :  { %13962 = vmatmul.mubr.msk.f32.vlgmr.msra.gmra.mrb[0].mxu1 %vm20115_vm1, %v16898_v60  ;;  %3235 = vmatprep.mubr.f32.mxu0 %v20025_v4  ;;  %v16956_v13 = vsel %vm2895_vm14, %v2848_v16, %v2850_v40  ;;  %v20164_v27 = vsel %vm17195_vm9, 4294967295, %v20163_v27 }
 0x288   :  { %20117 = vst [vmem:[#allocation113_spill] sm:$0xff] %v16956_v13  ;;  %3243 = vmatpush1.msra.mxu1 %v16951_v7  ;;  %3313 = vmatprep.subr.mxu0 %v16956_v13  ;;  %v2852_v6 = vpop.permute.xlu0 %2851  ;;  %v18534_v7 = vld [vmem:[%s19229_s3 + $0x40] sm:$0xff] }
 0x289   :  { %5633 = vrot.lane.b32.xlu0 %v20033_v8, %s14695_s25  ;;  %5689 = vrot.lane.b32.xlu1 %v15438_v26, %s14695_s25  ;;  %v16980_v19 = vsel %vm2895_vm14, %v2850_v40, %v2852_v6 }
 0x28a   :  { %13963 = vmatmul.mubr.msk.f32.vlgmr.msra.gmra.mrb[2].mxu0 %vm20119_vm5, %v16898_v60  ;;  %v2854_v56 = vpop.permute.xlu1 %2853  ;;  %3306 = vmatprep.mubr.f32.mxu1 %v20025_v4  ;;  %20122 = vst [vmem:[#allocation116_spill] sm:$0xff] %v16980_v19  ;;  %vm20125_vm5 = vmmov %vm20115_vm1 }
 0x28b   :  { %3314 = vmatpush1.msra.mxu0 %v16962_v23  ;;  %v16974_v12 = vsel %vm2895_vm14, %v2852_v6, %v2854_v56  ;;  %13964 = vmatmul.mubr.msk.f32.vlgmr.msra.gmra.mrb[2].mxu1 %vm20121_vm15, %v16898_v60  ;;  %vm20128_vm15 = vmmov %vm20115_vm1 }
 0x28c   :  { %20120 = vst [vmem:[#allocation115_spill] sm:$0xff] %v16974_v12  ;;  %3384 = vmatprep.subr.mxu1 %v16974_v12  ;;  %v2856_v16 = vpop.permute.xlu0 %2855  ;;  %3377 = vmatprep.mubr.f32.mxu0 %v20025_v4 }
 0x28d   :  { %5635 = vrot.lane.b32.xlu0 %v20035_v45, %s14695_s25  ;;  %5637 = vrot.lane.b32.xlu1 %v20039_v58, %s14695_s25  ;;  %v16997_v40 = vsel %vm2895_vm14, %v2854_v56, %v2856_v16 }
 0x28e   :  { %3385 = vmatpush1.msra.mxu1 %v16980_v19  ;;  %v2858_v13 = vpop.permute.xlu1 %2857  ;;  %13965 = vmatmul.mubr.msk.f32.vlgmr.msra.gmra.mrb[4].mxu0 %vm20115_vm1, %v16898_v60  ;;  %20124 = vst [vmem:[#allocation118_spill] sm:$0xff] %v16997_v40 }
 0x28f   :  { %v16993_v6 = vsel %vm2895_vm14, %v2856_v16, %v2858_v13  ;;  %3448 = vmatprep.mubr.f32.mxu1 %v20025_v4  ;;  %3519 = vmatprep.mubr.f32.mxu0 %v20025_v4 }
 0x290   :  { %20123 = vst [vmem:[#allocation117_spill] sm:$0xff] %v16993_v6  ;;  %3455 = vmatprep.subr.mxu0 %v16993_v6  ;;  %v2860_v12 = vpop.permute.xlu0 %2859  ;;  %13966 = vmatmul.mubr.msk.f32.vlgmr.msra.gmra.mrb[4].mxu1 %vm20125_vm5, %v16898_v60  ;;  %vm20133_vm5 = vmmov %vm20115_vm1 }
 0x291   :  { %5639 = vrot.lane.b32.xlu0 %v15494_v37, %s14695_s25  ;;  %5641 = vrot.lane.b32.xlu1 %v15518_v17, %s14695_s25  ;;  %v17016_v6 = vsel %vm2895_vm14, %v2858_v13, %v2860_v12 }
 0x292   :  { %3456 = vmatpush1.msra.mxu0 %v16997_v40  ;;  %v2862_v56 = vpop.permute.xlu1 %2861  ;;  %3590 = vmatprep.mubr.f32.mxu1 %v20025_v4  ;;  %20127 = vst [vmem:[#allocation120_spill] sm:$0xff] %v17016_v6 }
 0x293   :  { %v17012_v16 = vsel %vm2895_vm14, %v2860_v12, %v2862_v56  ;;  %13967 = vmatmul.mubr.msk.f32.vlgmr.msra.gmra.mrb[6].mxu0 %vm20128_vm15, %v16898_v60  ;;  %vm20136_vm15 = vmmov %vm20115_vm1 }
 0x294   :  { %20126 = vst [vmem:[#allocation119_spill] sm:$0xff] %v17012_v16  ;;  %3526 = vmatprep.subr.mxu1 %v17012_v16  ;;  %v2864_v19 = vpop.permute.xlu0 %2863  ;;  %3661 = vmatprep.mubr.f32.mxu0 %v20025_v4 }
 0x295   :  { %5643 = vrot.lane.b32.xlu0 %v15599_v36, %s14695_s25  ;;  %5645 = vrot.lane.b32.xlu1 %v15635_v3, %s14695_s25  ;;  %v17033_v12 = vsel %vm2895_vm14, %v2862_v56, %v2864_v19 }
 0x296   :  { %3527 = vmatpush1.msra.mxu1 %v17016_v6  ;;  %v2866_v40 = vpop.permute.xlu1 %2865  ;;  %20130 = vst [vmem:[#allocation122_spill] sm:$0xff] %v17033_v12 }
 0x297   :  { %v17029_v13 = vsel %vm2895_vm14, %v2864_v19, %v2866_v40  ;;  %13968 = vmatmul.mubr.msk.f32.vlgmr.msra.gmra.mrb[6].mxu1 %vm20115_vm1, %v16898_v60 }
 0x298   :  { %20129 = vst [vmem:[#allocation121_spill] sm:$0xff] %v17029_v13  ;;  %3597 = vmatprep.subr.mxu0 %v17029_v13  ;;  %v2868_v16 = vpop.permute.xlu0 %2867  ;;  %3732 = vmatprep.mubr.f32.mxu1 %v20025_v4 }
 0x299   :  { %5647 = vrot.lane.b32.xlu0 %v15663_v10, %s14695_s25  ;;  %5649 = vrot.lane.b32.xlu1 %v15707_v53, %s14695_s25  ;;  %v17050_v56 = vsel %vm2895_vm14, %v2866_v40, %v2868_v16 }
 0x29a   :  { %3598 = vmatpush1.msra.mxu0 %v17033_v12  ;;  %v2870_v6 = vpop.permute.xlu1 %2869  ;;  %20132 = vst [vmem:[#allocation124_spill] sm:$0xff] %v17050_v56 }
 0x29b   :  { %v17046_v19 = vsel %vm2895_vm14, %v2868_v16, %v2870_v6  ;;  %13969 = vmatmul.mubr.msk.f32.vlgmr.msra.gmra.mrb[8].mxu0 %vm20133_vm5, %v16898_v60  ;;  %vm20141_vm5 = vmmov %vm20115_vm1 }
 0x29c   :  { %20131 = vst [vmem:[#allocation123_spill] sm:$0xff] %v17046_v19  ;;  %3668 = vmatprep.subr.mxu1 %v17046_v19  ;;  %v2872_v13 = vpop.permute.xlu0 %2871  ;;  %3803 = vmatprep.mubr.f32.mxu0 %v20025_v4 }
 0x29d   :  { %5651 = vrot.lane.b32.xlu0 %v15733_v22, %s14695_s25  ;;  %5653 = vrot.lane.b32.xlu1 %v15771_v1, %s14695_s25  ;;  %v17067_v16 = vsel %vm2895_vm14, %v2870_v6, %v2872_v13 }
 0x29e   :  { %3669 = vmatpush1.msra.mxu1 %v17050_v56  ;;  %v2874_v12 = vpop.permute.xlu1 %2873  ;;  %20135 = vst [vmem:[#allocation126_spill] sm:$0xff] %v17067_v16 }
 0x29f   :  { %v17063_v40 = vsel %vm2895_vm14, %v2872_v13, %v2874_v12  ;;  %13970 = vmatmul.mubr.msk.f32.vlgmr.msra.gmra.mrb[8].mxu1 %vm20136_vm15, %v16898_v60  ;;  %vm20144_vm15 = vmmov %vm20115_vm1 }
 0x2a0   :  { %20134 = vst [vmem:[#allocation125_spill] sm:$0xff] %v17063_v40  ;;  %3739 = vmatprep.subr.mxu0 %v17063_v40  ;;  %v2876_v19 = vpop.permute.xlu0 %2875  ;;  %3874 = vmatprep.mubr.f32.mxu1 %v20025_v4 }
 0x2a1   :  { %5655 = vrot.lane.b32.xlu0 %v15822_v46, %s14695_s25  ;;  %5657 = vrot.lane.b32.xlu1 %v15853_v42, %s14695_s25  ;;  %v17084_v13 = vsel %vm2895_vm14, %v2874_v12, %v2876_v19 }
 0x2a2   :  { %3740 = vmatpush1.msra.mxu0 %v17067_v16  ;;  %v2878_v56 = vpop.permute.xlu1 %2877  ;;  %20138 = vst [vmem:[#allocation128_spill] sm:$0xff] %v17084_v13 }
 0x2a3   :  { %v17080_v6 = vsel %vm2895_vm14, %v2876_v19, %v2878_v56  ;;  %13971 = vmatmul.mubr.msk.f32.vlgmr.msra.gmra.mrb[10].mxu0 %vm20115_vm1, %v16898_v60 }
 0x2a4   :  { %20137 = vst [vmem:[#allocation127_spill] sm:$0xff] %v17080_v6  ;;  %3810 = vmatprep.subr.mxu1 %v17080_v6  ;;  %v2880_v40 = vpop.permute.xlu0 %2879  ;;  %3945 = vmatprep.mubr.f32.mxu0 %v20025_v4 }
 0x2a5   :  { %5659 = vrot.lane.b32.xlu0 %v15936_v57, %s14695_s25  ;;  %5661 = vrot.lane.b32.xlu1 %v15958_v50, %s14695_s25  ;;  %v17101_v19 = vsel %vm2895_vm14, %v2878_v56, %v2880_v40 }
 0x2a6   :  { %3811 = vmatpush1.msra.mxu1 %v17084_v13  ;;  %v2882_v16 = vpop.permute.xlu1 %2881  ;;  %20140 = vst [vmem:[#allocation130_spill] sm:$0xff] %v17101_v19 }
 0x2a7   :  { %v17097_v12 = vsel %vm2895_vm14, %v2880_v40, %v2882_v16  ;;  %13972 = vmatmul.mubr.msk.f32.vlgmr.msra.gmra.mrb[10].mxu1 %vm20141_vm5, %v16898_v60  ;;  %vm19547_vm5 = vcmp.lt.s32.totalorder %v14821_v43, 63 }
 0x2a8   :  { %20139 = vst [vmem:[#allocation129_spill] sm:$0xff] %v17097_v12  ;;  %3881 = vmatprep.subr.mxu0 %v17097_v12  ;;  %v2884_v6 = vpop.permute.xlu0 %2883  ;;  %4016 = vmatprep.mubr.f32.mxu1 %v20025_v4 }
 0x2a9   :  { %5663 = vrot.lane.b32.xlu0 %v16043_v34, %s14695_s25  ;;  %5665 = vrot.lane.b32.xlu1 %v16063_v11, %s14695_s25  ;;  %v17118_v40 = vsel %vm2895_vm14, %v2882_v16, %v2884_v6 }
 0x2aa   :  { %3882 = vmatpush1.msra.mxu0 %v17101_v19  ;;  %v2886_v13 = vpop.permute.xlu1 %2885  ;;  %20143 = vst [vmem:[#allocation132_spill] sm:$0xff] %v17118_v40 }
 0x2ab   :  { %v17114_v56 = vsel %vm2895_vm14, %v2884_v6, %v2886_v13  ;;  %13973 = vmatmul.mubr.msk.f32.vlgmr.msra.gmra.mrb[12].mxu0 %vm20144_vm15, %v16898_v60 }
 0x2ac   :  { %20142 = vst [vmem:[#allocation131_spill] sm:$0xff] %v17114_v56  ;;  %3952 = vmatprep.subr.mxu1 %v17114_v56  ;;  %v2888_v12 = vpop.permute.xlu0 %2887  ;;  %4087 = vmatprep.mubr.f32.mxu0 %v20025_v4 }
 0x2ad   :  { %5667 = vrot.lane.b32.xlu0 %v16106_v54, %s14695_s25  ;;  %5669 = vrot.lane.b32.xlu1 %v16144_v28, %s14695_s25  ;;  %v17135_v6 = vsel %vm2895_vm14, %v2886_v13, %v2888_v12 }
 0x2ae   :  { %3953 = vmatpush1.msra.mxu1 %v17118_v40  ;;  %v2890_v19 = vpop.permute.xlu1 %2889  ;;  %20146 = vst [vmem:[#allocation134_spill] sm:$0xff] %v17135_v6 }
 0x2af   :  { %v17131_v16 = vsel %vm2895_vm14, %v2888_v12, %v2890_v19  ;;  %13974 = vmatmul.mubr.msk.f32.vlgmr.msra.gmra.mrb[12].mxu1 %vm20115_vm1, %v16898_v60 }
 0x2b0   :  { %20145 = vst [vmem:[#allocation133_spill] sm:$0xff] %v17131_v16  ;;  %4023 = vmatprep.subr.mxu0 %v17131_v16  ;;  %v2892_v56 = vpop.permute.xlu0 %2891  ;;  %4158 = vmatprep.mubr.f32.mxu1 %v20025_v4  ;;  %v20149_v16 = vld [vmem:[#allocation8_spill] sm:$0xff] }
 0x2b1   :  { %5671 = vrot.lane.b32.xlu0 %v16211_v18, %s14695_s25  ;;  %5673 = vrot.lane.b32.xlu1 %v16234_v52, %s14695_s25  ;;  %v17147_v40 = vsel %vm2895_vm14, %v2890_v19, %v2892_v56  ;;  %v17152_v13 = vsel %vm2895_vm14, %v2892_v56, %v16876_v51  ;;  %v20150_v23 = vand.u32 63, %v20149_v16  ;;  %vm20153_vm14 = vmmov %vm20115_vm1  ;;  %v20155_v56 = vand.u32 63, %v14821_v43  ;;  %v20158_v16 = vld [vmem:[#allocation10_spill] sm:$0xff] }
 0x2b2   :  { %20147 = vst [vmem:[#allocation135_spill] sm:$0xff] %v17147_v40  ;;  %20148 = vst [vmem:[#allocation136_spill] sm:$0xff] %v17152_v13  ;;  %4024 = vmatpush1.msra.mxu0 %v17135_v6  ;;  %v4198_v12 = vpop.permute.xlu1 %4197  ;;  %4094 = vmatprep.subr.mxu1 %v17152_v13  ;;  %v20159_v13 = vand.u32 63, %v20158_v16  ;;  %v20171_v16 = vmov 0 }
 0x2b3   :  { %4095 = vmatpush1.msra.mxu1 %v17147_v40  ;;  %vm17160_vm15 = vcmp.lt.s32.totalorder %v20150_v23, 63  ;;  %13975 = vmatmul.mubr.msk.f32.vlgmr.msra.gmra.mrb[14].mxu0 %vm20115_vm1, %v16898_v60  ;;  %vm17182_vm1 = vcmp.lt.s32.totalorder %v20155_v56, 63  ;;  %v20160_v40 = vmov 0 }
 0x2b4   :  { %v4200_v51 = vpop.permute.xlu0 %4199  ;;  %13976 = vmatmul.mubr.msk.f32.vlgmr.msra.gmra.mrb[14].mxu1 %vm20153_vm14, %v16898_v60  ;;  %4523 = vmatprep.mubr.f32.mxu0 %v20025_v4  ;;  %v20156_v60 = vmov 0  ;;  %vm17189_vm14 = vcmp.lt.s32.totalorder %v20159_v13, 63  ;;  %vm4326_vm0 = vmand %vm20166_vm8, %vm17182_vm1  ;;  %vm20169_vm8 = vcmask 64512  }
 0x2b5   :  { %5675 = vrot.lane.b32.xlu0 %v16281_v59, %s14695_s25  ;;  %5677 = vrot.lane.b32.xlu1 %v16329_v33, %s14695_s25  ;;  %v17175_v23 = vsel %vm19547_vm5, %v4198_v12, %v4200_v51  ;;  %v20157_v60 = vsel %vm17182_vm1, 4294967295, %v20156_v60  ;;  %v20161_v40 = vsel %vm17189_vm14, 4294967295, %v20160_v40  ;;  %vm20185_vm1 = vcmask 64512  }
 0x2b6   :  { %20154 = vst [vmem:[#allocation137_spill] sm:$0xff] %v17175_v23  ;;  %v4202_v19 = vpop.permute.xlu1 %4201  ;;  %13978 = vmatprep.subr.msk.mxu0 %vm17160_vm15, %v17175_v23  ;;  %4594 = vmatprep.mubr.f32.mxu1 %v20025_v4 }
 0x2b7   :  { %v17213_v62 = vsel %vm19547_vm5, %v4200_v51, %v4202_v19  ;;  %v17231_v51 = vld [vmem:[%s19229_s3 + $0x10] sm:$0xff] }
 0x2b8   :  { %v4204_v6 = vpop.permute.xlu0 %4203  ;;  %20167 = vst [vmem:[#allocation139_spill] sm:$0xff] %v17213_v62 }
 0x2b9   :  { %5679 = vrot.lane.b32.xlu0 %v16339_v0, %s14695_s25  ;;  %5681 = vrot.lane.b32.xlu1 %v16363_v44, %s14695_s25  ;;  %v17205_v56 = vsel %vm19547_vm5, %v4202_v19, %v4204_v6 }
 0x2ba   :  { %20165 = vst [vmem:[#allocation138_spill] sm:$0xff] %v17205_v56  ;;  %v17215_v32 = vpop.permute.xlu1 %4259  ;;  %13981 = vmatprep.subr.msk.mxu1 %vm17189_vm14, %v17205_v56 }
 0x2bb   :  { %v17223_v13 = vsel %vm19547_vm5, %v17215_v32, %v4198_v12  ;;  %13982 = vmatpush1.msk.msra.mxu1 %vm17195_vm9, %v17213_v62  ;;  %v20170_v12 = vand.u32 63, %v20006_v20  ;;  %vm20174_vm9 = vmmov %vm20169_vm8  ;;  %v20179_v20 = vand.u32 63, %v20013_v41 }
 0x2bc   :  { %20168 = vst [vmem:[#allocation140_spill] sm:$0xff] %v17223_v13  ;;  %13979 = vmatpush1.msk.msra.mxu0 %vm4326_vm0, %v17223_v13  ;;  %v4206_v19 = vpop.permute.xlu0 %4205  ;;  %13983 = vmatmul.mubr.msk.f32.vlgmr.msra.gmra.mrb[0].mxu1 %vm20169_vm8, %v17231_v51  ;;  %vm20175_vm0 = vcmp.lt.s32.totalorder %v14821_v43, 63 }
 0x2bd   :  { %5683 = vrot.lane.b32.xlu0 %v16405_v5, %s14695_s25  ;;  %5685 = vrot.lane.b32.xlu1 %v16423_v49, %s14695_s25  ;;  %vm17242_vm5 = vcmp.lt.s32.totalorder %v20170_v12, 63  ;;  %v17251_v13 = vsel %vm20175_vm0, %v4204_v6, %v4206_v19  ;;  %vm20177_vm8 = vmmov %vm20175_vm0  ;;  %vm17259_vm14 = vcmp.lt.s32.totalorder %v20179_v20, 63  ;;  %v20180_v12 = vmov 0 }
 0x2be   :  { %v20172_v16 = vsel %vm17242_vm5, 4294967295, %v20171_v16  ;;  %v4208_v56 = vpop.permute.xlu1 %4207  ;;  %13980 = vmatmul.mubr.msk.f32.vlgmr.msra.gmra.mrb[0].mxu0 %vm20174_vm9, %v17231_v51  ;;  %4736 = vmatprep.mubr.f32.mxu1 %v20025_v4  ;;  %20176 = vst [vmem:[#allocation142_spill] sm:$0xff] %v17251_v13  ;;  %v20181_v12 = vsel %vm17259_vm14, 4294967295, %v20180_v12  ;;  %vm19560_vm9 = vcmp.lt.s32.totalorder %v20024_v47, 63 }
 0x2bf   :  { %20173 = vst [vmem:[#allocation141_spill] sm:$0xff] %v20172_v16  ;;  %v17255_v23 = vsel %vm20177_vm8, %v4206_v19, %v4208_v56  ;;  %4665 = vmatprep.mubr.f32.mxu0 %v20025_v4  ;;  %vm20183_vm8 = vmmov %vm20175_vm0 }
 0x2c0   :  { %20178 = vst [vmem:[#allocation143_spill] sm:$0xff] %v17255_v23  ;;  %13984 = vmatprep.subr.msk.mxu0 %vm17242_vm5, %v17255_v23  ;;  %v4210_v62 = vpop.permute.xlu0 %4209  ;;  %vm19563_vm5 = vcmp.lt.s32.totalorder %v20029_v14, 63 }
 0x2c1   :  { %5687 = vrot.lane.b32.xlu0 %v16442_v24, %s14695_s25  ;;  %8168 = vrot.lane.b32.xlu1 %v20023_v2, %s14696_s0  ;;  %v17277_v6 = vsel %vm20175_vm0, %v4208_v56, %v4210_v62  ;;  %vm19564_vm0 = vcmp.lt.s32.totalorder %v20036_v30, 63 }
 0x2c2   :  { %13985 = vmatpush1.msk.msra.mxu0 %vm17259_vm14, %v17251_v13  ;;  %v4212_v41 = vpop.permute.xlu1 %4211  ;;  %20182 = vst [vmem:[#allocation144_spill] sm:$0xff] %v17277_v6  ;;  %vm20190_vm14 = vcmask 64512   ;;  %v14656_v13 = vld [vmem:[%s19228_s2 + $0xf0] sm:$0xff] }
 0x2c3   :  { %v17281_v19 = vsel %vm20183_vm8, %v4210_v62, %v4212_v41  ;;  %13986 = vmatmul.mubr.msk.f32.vlgmr.msra.gmra.mrb[2].mxu0 %vm20185_vm1, %v17231_v51  ;;  %vm20186_vm1 = vmmov %vm20183_vm8 }
 0x2c4   :  { %20184 = vst [vmem:[#allocation145_spill] sm:$0xff] %v17281_v19  ;;  %13987 = vmatprep.subr.msk.mxu1 %vm19560_vm9, %v17281_v19  ;;  %v4214_v2 = vpop.permute.xlu0 %4213  ;;  %4807 = vmatprep.mubr.f32.mxu0 %v20025_v4  ;;  %vm20188_vm8 = vmmov %vm20186_vm1  ;;  %vm19568_vm9 = vcmp.lt.s32.totalorder %v20038_v38, 63  ;;  %v20206_v19 = vld [vmem:[#allocation22_spill] sm:$0xff] }
 0x2c5   :  { %8170 = vrot.lane.b32.xlu0 %v20026_v15, %s14696_s0  ;;  %8172 = vrot.lane.b32.xlu1 %v20033_v8, %s14696_s0  ;;  %v17300_v62 = vsel %vm20186_vm1, %v4212_v41, %v4214_v2  ;;  %vm19567_vm1 = vcmp.lt.s32.totalorder %v20042_v55, 63 }
 0x2c6   :  { %13988 = vmatpush1.msk.msra.mxu1 %vm19563_vm5, %v17277_v6  ;;  %v4216_v56 = vpop.permute.xlu1 %4215  ;;  %20187 = vst [vmem:[#allocation146_spill] sm:$0xff] %v17300_v62  ;;  %vm19571_vm5 = vcmp.lt.s32.totalorder %v20045_v25, 63  ;;  %v14655_v6 = vld [vmem:[%s19228_s2 + $0xf8] sm:$0xff] }
 0x2c7   :  { %v17304_v20 = vsel %vm20188_vm8, %v4214_v2, %v4216_v56  ;;  %13989 = vmatmul.mubr.msk.f32.vlgmr.msra.gmra.mrb[2].mxu1 %vm20190_vm14, %v17231_v51  ;;  %vm20191_vm14 = vmmov %vm20188_vm8 }
 0x2c8   :  { %20189 = vst [vmem:[#allocation147_spill] sm:$0xff] %v17304_v20  ;;  %13990 = vmatprep.subr.msk.mxu0 %vm19564_vm0, %v17304_v20  ;;  %v4218_v8 = vpop.permute.xlu0 %4217  ;;  %4878 = vmatprep.mubr.f32.mxu1 %v20025_v4  ;;  %vm20194_vm0 = vcmask 64512   ;;  %v20200_v20 = vld [vmem:[#allocation20_spill] sm:$0xff] }
 0x2c9   :  { %8174 = vrot.lane.b32.xlu0 %v20035_v45, %s14696_s0  ;;  %8166 = vrot.lane.b32.xlu1 %v20018_v21, %s14696_s0  ;;  %v17323_v41 = vsel %vm20191_vm14, %v4216_v56, %v4218_v8  ;;  %v20195_v45 = vld [vmem:[#allocation21_spill] sm:$0xff] }
 0x2ca   :  { %13991 = vmatpush1.msk.msra.mxu0 %vm19568_vm9, %v17300_v62  ;;  %v4220_v15 = vpop.permute.xlu1 %4219  ;;  %20192 = vst [vmem:[#allocation148_spill] sm:$0xff] %v17323_v41  ;;  %vm19572_vm14 = vcmp.lt.s32.totalorder %v20195_v45, 63  ;;  %vm20201_vm9 = vcmask 64512   ;;  %v20372_v62 = vld [vmem:[#allocation79_spill] sm:$0xff] }
 0x2cb   :  { %v17327_v2 = vsel %vm20188_vm8, %v4218_v8, %v4220_v15  ;;  %13992 = vmatmul.mubr.msk.f32.vlgmr.msra.gmra.mrb[4].mxu0 %vm20194_vm0, %v17231_v51  ;;  %vm20196_vm0 = vmmov %vm20188_vm8 }
 0x2cc   :  { %20193 = vst [vmem:[#allocation149_spill] sm:$0xff] %v17327_v2  ;;  %13993 = vmatprep.subr.msk.mxu1 %vm19567_vm1, %v17327_v2  ;;  %v4222_v21 = vpop.permute.xlu0 %4221  ;;  %4949 = vmatprep.mubr.f32.mxu0 %v20025_v4  ;;  %vm20198_vm8 = vmmov %vm20196_vm0  ;;  %vm19576_vm1 = vcmp.lt.s32.totalorder %v20200_v20, 63 }
 0x2cd   :  { %8176 = vrot.lane.b32.xlu0 %v20039_v58, %s14696_s0  ;;  %8178 = vrot.lane.b32.xlu1 %v15494_v37, %s14696_s0  ;;  %v17346_v8 = vsel %vm20196_vm0, %v4220_v15, %v4222_v21  ;;  %v20202_v58 = vld [vmem:[#allocation23_spill] sm:$0xff] }
 0x2ce   :  { %13994 = vmatpush1.msk.msra.mxu1 %vm19571_vm5, %v17323_v41  ;;  %v4224_v56 = vpop.permute.xlu1 %4223  ;;  %20197 = vst [vmem:[#allocation150_spill] sm:$0xff] %v17346_v8  ;;  %vm19575_vm0 = vcmp.lt.s32.totalorder %v20202_v58, 63  ;;  %vm19579_vm5 = vcmp.lt.s32.totalorder %v20206_v19, 63  ;;  %v14650_v41 = vld [vmem:[%s19228_s2 + $0xc0] sm:$0xff] }
 0x2cf   :  { %v17350_v2 = vsel %vm20198_vm8, %v4222_v21, %v4224_v56  ;;  %13995 = vmatmul.mubr.msk.f32.vlgmr.msra.gmra.mrb[4].mxu1 %vm20201_vm9, %v17231_v51  ;;  %vm20203_vm9 = vmmov %vm20198_vm8 }
 0x2d0   :  { %20199 = vst [vmem:[#allocation151_spill] sm:$0xff] %v17350_v2  ;;  %13996 = vmatprep.subr.msk.mxu0 %vm19572_vm14, %v17350_v2  ;;  %v4226_v37 = vpop.permute.xlu0 %4225  ;;  %5020 = vmatprep.mubr.f32.mxu1 %v20025_v4  ;;  %vm20207_vm14 = vcmask 64512  }
 0x2d1   :  { %8180 = vrot.lane.b32.xlu0 %v15518_v17, %s14696_s0  ;;  %8182 = vrot.lane.b32.xlu1 %v15599_v36, %s14696_s0  ;;  %v17369_v21 = vsel %vm20203_vm9, %v4224_v56, %v4226_v37  ;;  %v20208_v36 = vld [vmem:[#allocation25_spill] sm:$0xff] }
 0x2d2   :  { %13997 = vmatpush1.msk.msra.mxu0 %vm19576_vm1, %v17346_v8  ;;  %v4228_v15 = vpop.permute.xlu1 %4227  ;;  %20204 = vst [vmem:[#allocation152_spill] sm:$0xff] %v17369_v21  ;;  %vm19580_vm9 = vcmp.lt.s32.totalorder %v20208_v36, 63  ;;  %v20212_v8 = vld [vmem:[#allocation24_spill] sm:$0xff]  ;;  %vm20213_vm1 = vcmask 64512  }
 0x2d3   :  { %v17373_v2 = vsel %vm20198_vm8, %v4226_v37, %v4228_v15  ;;  %13998 = vmatmul.mubr.msk.f32.vlgmr.msra.gmra.mrb[6].mxu0 %vm20207_vm14, %v17231_v51  ;;  %vm20209_vm14 = vmmov %vm20198_vm8 }
 0x2d4   :  { %20205 = vst [vmem:[#allocation153_spill] sm:$0xff] %v17373_v2  ;;  %13999 = vmatprep.subr.msk.mxu1 %vm19575_vm0, %v17373_v2  ;;  %v4230_v17 = vpop.permute.xlu0 %4229  ;;  %5091 = vmatprep.mubr.f32.mxu0 %v20025_v4  ;;  %vm19584_vm0 = vcmp.lt.s32.totalorder %v20212_v8, 63 }
 0x2d5   :  { %8184 = vrot.lane.b32.xlu0 %v15635_v3, %s14696_s0  ;;  %8186 = vrot.lane.b32.xlu1 %v15663_v10, %s14696_s0  ;;  %v17392_v37 = vsel %vm20209_vm14, %v4228_v15, %v4230_v17  ;;  %v20214_v10 = vld [vmem:[#allocation27_spill] sm:$0xff] }
 0x2d6   :  { %14000 = vmatpush1.msk.msra.mxu1 %vm19579_vm5, %v17369_v21  ;;  %v4232_v56 = vpop.permute.xlu1 %4231  ;;  %20210 = vst [vmem:[#allocation154_spill] sm:$0xff] %v17392_v37  ;;  %vm19583_vm14 = vcmp.lt.s32.totalorder %v20214_v10, 63  ;;  %v20219_v21 = vld [vmem:[#allocation26_spill] sm:$0xff] }
 0x2d7   :  { %v17396_v2 = vsel %vm20198_vm8, %v4230_v17, %v4232_v56  ;;  %14001 = vmatmul.mubr.msk.f32.vlgmr.msra.gmra.mrb[6].mxu1 %vm20213_vm1, %v17231_v51  ;;  %vm20215_vm1 = vmmov %vm20198_vm8  ;;  %vm19587_vm5 = vcmp.lt.s32.totalorder %v20219_v21, 63 }
 0x2d8   :  { %20211 = vst [vmem:[#allocation155_spill] sm:$0xff] %v17396_v2  ;;  %14002 = vmatprep.subr.msk.mxu0 %vm19580_vm9, %v17396_v2  ;;  %v4234_v3 = vpop.permute.xlu0 %4233  ;;  %5162 = vmatprep.mubr.f32.mxu1 %v20025_v4  ;;  %vm20217_vm8 = vmmov %vm20215_vm1  ;;  %vm20220_vm9 = vcmask 64512  }
 0x2d9   :  { %8188 = vrot.lane.b32.xlu0 %v15707_v53, %s14696_s0  ;;  %8190 = vrot.lane.b32.xlu1 %v15733_v22, %s14696_s0  ;;  %v17415_v17 = vsel %vm20215_vm1, %v4232_v56, %v4234_v3  ;;  %v20221_v22 = vld [vmem:[#allocation29_spill] sm:$0xff] }
 0x2da   :  { %14003 = vmatpush1.msk.msra.mxu0 %vm19584_vm0, %v17392_v37  ;;  %v4236_v15 = vpop.permute.xlu1 %4235  ;;  %20216 = vst [vmem:[#allocation156_spill] sm:$0xff] %v17415_v17  ;;  %vm19588_vm1 = vcmp.lt.s32.totalorder %v20221_v22, 63  ;;  %v20225_v37 = vld [vmem:[#allocation28_spill] sm:$0xff]  ;;  %vm20226_vm0 = vcmask 64512  }
 0x2db   :  { %v17419_v2 = vsel %vm20217_vm8, %v4234_v3, %v4236_v15  ;;  %14004 = vmatmul.mubr.msk.f32.vlgmr.msra.gmra.mrb[8].mxu0 %vm20220_vm9, %v17231_v51  ;;  %vm20222_vm9 = vmmov %vm20217_vm8 }
 0x2dc   :  { %20218 = vst [vmem:[#allocation157_spill] sm:$0xff] %v17419_v2  ;;  %14005 = vmatprep.subr.msk.mxu1 %vm19583_vm14, %v17419_v2  ;;  %v4238_v53 = vpop.permute.xlu0 %4237  ;;  %5233 = vmatprep.mubr.f32.mxu0 %v20025_v4  ;;  %vm19590_vm14 = vcmp.lt.s32.totalorder %v20225_v37, 63 }
 0x2dd   :  { %8192 = vrot.lane.b32.xlu0 %v15771_v1, %s14696_s0  ;;  %8194 = vrot.lane.b32.xlu1 %v15822_v46, %s14696_s0  ;;  %v17438_v3 = vsel %vm20222_vm9, %v4236_v15, %v4238_v53  ;;  %v20227_v46 = vld [vmem:[#allocation31_spill] sm:$0xff] }
 0x2de   :  { %14006 = vmatpush1.msk.msra.mxu1 %vm19587_vm5, %v17415_v17  ;;  %v4240_v56 = vpop.permute.xlu1 %4239  ;;  %20223 = vst [vmem:[#allocation158_spill] sm:$0xff] %v17438_v3  ;;  %vm19589_vm9 = vcmp.lt.s32.totalorder %v20227_v46, 63  ;;  %v20232_v17 = vld [vmem:[#allocation30_spill] sm:$0xff] }
 0x2df   :  { %v17442_v2 = vsel %vm20217_vm8, %v4238_v53, %v4240_v56  ;;  %14007 = vmatmul.mubr.msk.f32.vlgmr.msra.gmra.mrb[8].mxu1 %vm20226_vm0, %v17231_v51  ;;  %vm20228_vm0 = vmmov %vm20217_vm8  ;;  %vm19592_vm5 = vcmp.lt.s32.totalorder %v20232_v17, 63 }
 0x2e0   :  { %20224 = vst [vmem:[#allocation159_spill] sm:$0xff] %v17442_v2  ;;  %14008 = vmatprep.subr.msk.mxu0 %vm19588_vm1, %v17442_v2  ;;  %v4242_v1 = vpop.permute.xlu0 %4241  ;;  %5304 = vmatprep.mubr.f32.mxu1 %v20025_v4  ;;  %vm20230_vm8 = vmmov %vm20228_vm0  ;;  %vm20233_vm1 = vcmask 64512  }
 0x2e1   :  { %8196 = vrot.lane.b32.xlu0 %v15853_v42, %s14696_s0  ;;  %8198 = vrot.lane.b32.xlu1 %v15936_v57, %s14696_s0  ;;  %v17461_v53 = vsel %vm20228_vm0, %v4240_v56, %v4242_v1  ;;  %vm19593_vm0 = vcmp.lt.s32.totalorder %v20086_v35, 63 }
 0x2e2   :  { %14009 = vmatpush1.msk.msra.mxu0 %vm19590_vm14, %v17438_v3  ;;  %v4244_v15 = vpop.permute.xlu1 %4243  ;;  %20229 = vst [vmem:[#allocation160_spill] sm:$0xff] %v17461_v53  ;;  %vm20238_vm14 = vcmask 64512  }
 0x2e3   :  { %v17465_v2 = vsel %vm20230_vm8, %v4242_v1, %v4244_v15  ;;  %14010 = vmatmul.mubr.msk.f32.vlgmr.msra.gmra.mrb[10].mxu0 %vm20233_vm1, %v17231_v51  ;;  %vm20234_vm1 = vmmov %vm20230_vm8 }
 0x2e4   :  { %20231 = vst [vmem:[#allocation161_spill] sm:$0xff] %v17465_v2  ;;  %14011 = vmatprep.subr.msk.mxu1 %vm19589_vm9, %v17465_v2  ;;  %v4246_v42 = vpop.permute.xlu0 %4245  ;;  %5375 = vmatprep.mubr.f32.mxu0 %v20025_v4  ;;  %vm20236_vm8 = vmmov %vm20234_vm1  ;;  %vm19596_vm9 = vcmp.lt.s32.totalorder %v20088_v31, 63  ;;  %v20340_v2 = vld [vmem:[#allocation52_spill] sm:$0xff] }
 0x2e5   :  { %8200 = vrot.lane.b32.xlu0 %v15958_v50, %s14696_s0  ;;  %8202 = vrot.lane.b32.xlu1 %v16043_v34, %s14696_s0  ;;  %v17484_v56 = vsel %vm20234_vm1, %v4244_v15, %v4246_v42  ;;  %vm19595_vm1 = vcmp.lt.s32.totalorder %v20091_v9, 63 }
 0x2e6   :  { %14012 = vmatpush1.msk.msra.mxu1 %vm19592_vm5, %v17461_v53  ;;  %v4248_v57 = vpop.permute.xlu1 %4247  ;;  %20235 = vst [vmem:[#allocation162_spill] sm:$0xff] %v17484_v56  ;;  %v14647_v53 = vld [vmem:[%s19228_s2 + $0xb8] sm:$0xff] }
 0x2e7   :  { %v17488_v1 = vsel %vm20236_vm8, %v4246_v42, %v4248_v57  ;;  %14013 = vmatmul.mubr.msk.f32.vlgmr.msra.gmra.mrb[10].mxu1 %vm20238_vm14, %v17231_v51  ;;  %vm20239_vm14 = vmmov %vm20236_vm8 }
 0x2e8   :  { %20237 = vst [vmem:[#allocation163_spill] sm:$0xff] %v17488_v1  ;;  %14014 = vmatprep.subr.msk.mxu0 %vm19593_vm0, %v17488_v1  ;;  %v4250_v50 = vpop.permute.xlu0 %4249  ;;  %5446 = vmatprep.mubr.f32.mxu1 %v20025_v4  ;;  %v20242_v1 = vld [vmem:[#allocation34_spill] sm:$0xff]  ;;  %vm20243_vm0 = vcmask 64512  }
 0x2e9   :  { %8204 = vrot.lane.b32.xlu0 %v16063_v11, %s14696_s0  ;;  %8206 = vrot.lane.b32.xlu1 %v16106_v54, %s14696_s0  ;;  %v17507_v15 = vsel %vm20239_vm14, %v4248_v57, %v4250_v50  ;;  %vm19597_vm5 = vcmp.lt.s32.totalorder %v20242_v1, 63  ;;  %vm19598_vm14 = vcmp.lt.s32.totalorder %v19919_v39, 63 }
 0x2ea   :  { %14015 = vmatpush1.msk.msra.mxu0 %vm19596_vm9, %v17484_v56  ;;  %v4252_v34 = vpop.permute.xlu1 %4251  ;;  %20240 = vst [vmem:[#allocation164_spill] sm:$0xff] %v17507_v15  ;;  %vm20249_vm9 = vcmask 64512   ;;  %v20352_v56 = vld [vmem:[#allocation54_spill] sm:$0xff] }
 0x2eb   :  { %v17511_v42 = vsel %vm20236_vm8, %v4250_v50, %v4252_v34  ;;  %14016 = vmatmul.mubr.msk.f32.vlgmr.msra.gmra.mrb[12].mxu0 %vm20243_vm0, %v17231_v51  ;;  %vm20244_vm0 = vmmov %vm20236_vm8 }
 0x2ec   :  { %20241 = vst [vmem:[#allocation165_spill] sm:$0xff] %v17511_v42  ;;  %14017 = vmatprep.subr.msk.mxu1 %vm19595_vm1, %v17511_v42  ;;  %v4254_v54 = vpop.permute.xlu0 %4253  ;;  %5517 = vmatprep.mubr.f32.mxu0 %v20025_v4  ;;  %vm20246_vm8 = vmmov %vm20244_vm0  ;;  %v20248_v42 = vld [vmem:[#allocation36_spill] sm:$0xff] }
 0x2ed   :  { %8208 = vrot.lane.b32.xlu0 %v16144_v28, %s14696_s0  ;;  %8210 = vrot.lane.b32.xlu1 %v16211_v18, %s14696_s0  ;;  %v17530_v57 = vsel %vm20244_vm0, %v4252_v34, %v4254_v54  ;;  %vm19604_vm1 = vcmp.lt.s32.totalorder %v20248_v42, 63  ;;  %vm19602_vm0 = vcmp.lt.s32.totalorder %v19903_v48, 63 }
 0x2ee   :  { %14018 = vmatpush1.msk.msra.mxu1 %vm19597_vm5, %v17507_v15  ;;  %v4256_v11 = vpop.permute.xlu1 %4255  ;;  %20245 = vst [vmem:[#allocation166_spill] sm:$0xff] %v17530_v57  ;;  %vm19603_vm5 = vcmp.lt.s32.totalorder %v20102_v61, 63  ;;  %v14643_v15 = vld [vmem:[%s19228_s2 + $0x98] sm:$0xff] }
 0x2ef   :  { %v17534_v50 = vsel %vm20246_vm8, %v4254_v54, %v4256_v11  ;;  %14019 = vmatmul.mubr.msk.f32.vlgmr.msra.gmra.mrb[12].mxu1 %vm20249_vm9, %v17231_v51  ;;  %vm20250_vm9 = vmmov %vm20246_vm8 }
 0x2f0   :  { %20247 = vst [vmem:[#allocation167_spill] sm:$0xff] %v17534_v50  ;;  %14020 = vmatprep.subr.msk.mxu0 %vm19598_vm14, %v17534_v50  ;;  %5588 = vmatprep.mubr.f32.mxu1 %v20025_v4  ;;  %vm20253_vm14 = vcmask 64512  }
 0x2f1   :  { %8212 = vrot.lane.b32.xlu0 %v16234_v52, %s14696_s0  ;;  %8214 = vrot.lane.b32.xlu1 %v16281_v59, %s14696_s0  ;;  %v4258_v28 = vpop.permute.xlu0 %4257 }
 0x2f2   :  { %14021 = vmatpush1.msk.msra.mxu0 %vm19604_vm1, %v17530_v57  ;;  %v17555_v18 = vsel %vm20250_vm9, %v4258_v28, %v17215_v32  ;;  %v17559_v34 = vsel %vm20246_vm8, %v4256_v11, %v4258_v28  ;;  %v5628_v52 = vpop.permute.xlu1 %5627  ;;  %vm5691_vm9 = vcmp.lt.s32.totalorder %v14821_v43, 1  ;;  %vm20254_vm8 = vmmov %vm20253_vm14  ;;  %v14639_v57 = vld [vmem:[%s19228_s2 + $0x78] sm:$0xff] }
 0x2f3   :  { %20251 = vst [vmem:[#allocation168_spill] sm:$0xff] %v17555_v18  ;;  %20252 = vst [vmem:[#allocation169_spill] sm:$0xff] %v17559_v34  ;;  %14023 = vmatprep.subr.msk.mxu1 %vm19603_vm5, %v17555_v18  ;;  %14022 = vmatmul.mubr.msk.f32.vlgmr.msra.gmra.mrb[14].mxu0 %vm20253_vm14, %v17231_v51  ;;  %v20470_v18 = vld [vmem:[#allocation45_spill] sm:$0xff] }
 0x2f4   :  { %14024 = vmatpush1.msk.msra.mxu1 %vm19602_vm0, %v17559_v34  ;;  %5889 = vmatprep.mubr.f32.mxu0 %v20025_v4  ;;  %vm20259_vm14 = vmmov %vm20254_vm8  ;;  %vm20264_vm0 = vcmp.ge.s32.totalorder %v20029_v14, 1 }
 0x2f5   :  { %8216 = vrot.lane.b32.xlu0 %v16329_v33, %s14696_s0  ;;  %8218 = vrot.lane.b32.xlu1 %v16339_v0, %s14696_s0  ;;  %v18294_v33 = vld [vmem:[%s19229_s3 + $0x30] sm:$0xff] }
 0x2f6   :  { %14025 = vmatmul.mubr.msk.f32.vlgmr.msra.gmra.mrb[14].mxu1 %vm20254_vm8, %v17231_v51 }
 0x2f7   :  { %v5630_v59 = vpop.permute.xlu0 %5629  ;;  %v5632_v32 = vpop.permute.xlu1 %5631  ;;  %5960 = vmatprep.mubr.f32.mxu1 %v20025_v4 }
 0x2f8   :  { %v5722_v54 = vsel %vm5691_vm9, %v5628_v52, %v5630_v59 }
 0x2f9   :  { %8220 = vrot.lane.b32.xlu0 %v16363_v44, %s14696_s0  ;;  %8222 = vrot.lane.b32.xlu1 %v16405_v5, %s14696_s0  ;;  %v17596_v44 = vld [vmem:[%s19229_s3 + $0x18] sm:$0xff]  ;;  %v5721_v5 = vsel %vm5691_vm9, %v5630_v59, %v5632_v32  ;;  %v20463_v59 = vld [vmem:[#allocation75_spill] sm:$0xff] }
 0x2fa   :  { %14027 = vmatprep.subr.msk.mxu0 %vm16200_vm6, %v5722_v54  ;;  %v20462_v54 = vld [vmem:[#allocation43_spill] sm:$0xff] }
 0x2fb   :  { %v5634_v0 = vpop.permute.xlu0 %5633  ;;  %v17586_v11 = vpop.permute.xlu1 %5689 }
 0x2fc   :  { %v5720_v51 = vsel %vm5691_vm9, %v5632_v32, %v5634_v0  ;;  %v5723_v28 = vsel %vm5691_vm9, %v17586_v11, %v5628_v52  ;;  %v20472_v52 = vld [vmem:[#allocation48_spill] sm:$0xff]  ;;  %v20474_v32 = vld [vmem:[#allocation87_spill] sm:$0xff] }
 0x2fd   :  { %8224 = vrot.lane.b32.xlu0 %v16423_v49, %s14696_s0  ;;  %8226 = vrot.lane.b32.xlu1 %v16442_v24, %s14696_s0 }
 0x2fe   :  { %14028 = vmatpush1.msk.msra.mxu0 %vm16513_vm4, %v5723_v28  ;;  %14030 = vmatprep.subr.msk.mxu1 %vm16194_vm10, %v5720_v51 }
 0x2ff   :  { %14031 = vmatpush1.msk.msra.mxu1 %vm16249_vm13, %v5721_v5  ;;  %v5636_v50 = vpop.permute.xlu0 %5635  ;;  %v5638_v34 = vpop.permute.xlu1 %5637  ;;  %14029 = vmatmul.mubr.msk.f32.vlgmr.msra.gmra.mrb[0].mxu0 %vm20259_vm14, %v17596_v44  ;;  %vm20262_vm14 = vmmov %vm20254_vm8 }
 0x300   :  { %v5719_v49 = vsel %vm5691_vm9, %v5634_v0, %v5636_v50  ;;  %v5718_v24 = vsel %vm5691_vm9, %v5636_v50, %v5638_v34  ;;  %14032 = vmatmul.mubr.msk.f32.vlgmr.msra.gmra.mrb[0].mxu1 %vm20254_vm8, %v17596_v44  ;;  %6031 = vmatprep.mubr.f32.mxu0 %v20025_v4  ;;  %vm20263_vm8 = vcmp.ge.s32.totalorder %v20024_v47, 1  ;;  %vm20265_vm5 = vmmov %vm20262_vm14 }
 0x301   :  { %8228 = vrot.lane.b32.xlu0 %v15438_v26, %s14696_s0  ;;  %14033 = vmatprep.subr.msk.mxu0 %vm16531_vm12, %v5718_v24 }
 0x302   :  { %14034 = vmatpush1.msk.msra.mxu0 %vm16543_vm7, %v5719_v49  ;;  %6102 = vmatprep.mubr.f32.mxu1 %v20025_v4 }
 0x303   :  { %v5640_v0 = vpop.permute.xlu0 %5639  ;;  %v5642_v51 = vpop.permute.xlu1 %5641  ;;  %14035 = vmatmul.mubr.msk.f32.vlgmr.msra.gmra.mrb[2].mxu0 %vm20262_vm14, %v17596_v44  ;;  %vm20266_vm14 = vcmp.ge.s32.totalorder %v20036_v30, 1 }
 0x304   :  { %v5717_v50 = vsel %vm5691_vm9, %v5638_v34, %v5640_v0  ;;  %v5716_v28 = vsel %vm5691_vm9, %v5640_v0, %v5642_v51  ;;  %6173 = vmatprep.mubr.f32.mxu0 %v20025_v4 }
 0x305   :  { %14036 = vmatprep.subr.msk.mxu1 %vm20263_vm8, %v5716_v28  ;;  %vm20267_vm8 = vcmp.ge.s32.totalorder %v20038_v38, 1 }
 0x306   :  { %14037 = vmatpush1.msk.msra.mxu1 %vm20264_vm0, %v5717_v50  ;;  %vm20268_vm0 = vmmov %vm20265_vm5 }
 0x307   :  { %v5644_v26 = vpop.permute.xlu0 %5643  ;;  %v5646_v5 = vpop.permute.xlu1 %5645  ;;  %14038 = vmatmul.mubr.msk.f32.vlgmr.msra.gmra.mrb[2].mxu1 %vm20265_vm5, %v17596_v44  ;;  %vm20269_vm5 = vcmp.ge.s32.totalorder %v20042_v55, 1 }
 0x308   :  { %v5715_v49 = vsel %vm5691_vm9, %v5642_v51, %v5644_v26  ;;  %v5714_v34 = vsel %vm5691_vm9, %v5644_v26, %v5646_v5  ;;  %6244 = vmatprep.mubr.f32.mxu1 %v20025_v4 }
 0x309   :  { %14039 = vmatprep.subr.msk.mxu0 %vm20266_vm14, %v5714_v34  ;;  %vm20270_vm14 = vcmp.ge.s32.totalorder %v20045_v25, 1 }
 0x30a   :  { %14040 = vmatpush1.msk.msra.mxu0 %vm20267_vm8, %v5715_v49  ;;  %vm20271_vm8 = vmmov %vm20268_vm0 }
 0x30b   :  { %v5648_v24 = vpop.permute.xlu0 %5647  ;;  %v5650_v0 = vpop.permute.xlu1 %5649  ;;  %14041 = vmatmul.mubr.msk.f32.vlgmr.msra.gmra.mrb[4].mxu0 %vm20268_vm0, %v17596_v44  ;;  %vm20272_vm0 = vcmp.ge.s32.totalorder %v20195_v45, 1 }
 0x30c   :  { %v5713_v50 = vsel %vm5691_vm9, %v5646_v5, %v5648_v24  ;;  %v5712_v51 = vsel %vm5691_vm9, %v5648_v24, %v5650_v0  ;;  %6315 = vmatprep.mubr.f32.mxu0 %v20025_v4 }
 0x30d   :  { %14042 = vmatprep.subr.msk.mxu1 %vm20269_vm5, %v5712_v51  ;;  %vm20273_vm5 = vcmp.ge.s32.totalorder %v20200_v20, 1 }
 0x30e   :  { %14043 = vmatpush1.msk.msra.mxu1 %vm20270_vm14, %v5713_v50  ;;  %vm20274_vm14 = vmmov %vm20271_vm8 }
 0x30f   :  { %v5652_v28 = vpop.permute.xlu0 %5651  ;;  %v5654_v26 = vpop.permute.xlu1 %5653  ;;  %14044 = vmatmul.mubr.msk.f32.vlgmr.msra.gmra.mrb[4].mxu1 %vm20271_vm8, %v17596_v44  ;;  %vm20275_vm8 = vcmp.ge.s32.totalorder %v20202_v58, 1 }
 0x310   :  { %v5711_v49 = vsel %vm5691_vm9, %v5650_v0, %v5652_v28  ;;  %v5710_v5 = vsel %vm5691_vm9, %v5652_v28, %v5654_v26  ;;  %6386 = vmatprep.mubr.f32.mxu1 %v20025_v4 }
 0x311   :  { %14045 = vmatprep.subr.msk.mxu0 %vm20272_vm0, %v5710_v5  ;;  %vm20276_vm0 = vcmp.ge.s32.totalorder %v20206_v19, 1 }
 0x312   :  { %14046 = vmatpush1.msk.msra.mxu0 %vm20273_vm5, %v5711_v49  ;;  %vm20277_vm5 = vmmov %vm20274_vm14 }
 0x313   :  { %v5656_v34 = vpop.permute.xlu0 %5655  ;;  %v5658_v24 = vpop.permute.xlu1 %5657  ;;  %14047 = vmatmul.mubr.msk.f32.vlgmr.msra.gmra.mrb[6].mxu0 %vm20274_vm14, %v17596_v44  ;;  %vm20278_vm14 = vcmp.ge.s32.totalorder %v20208_v36, 1 }
 0x314   :  { %v5709_v50 = vsel %vm5691_vm9, %v5654_v26, %v5656_v34  ;;  %v5708_v0 = vsel %vm5691_vm9, %v5656_v34, %v5658_v24  ;;  %6457 = vmatprep.mubr.f32.mxu0 %v20025_v4 }
 0x315   :  { %14048 = vmatprep.subr.msk.mxu1 %vm20275_vm8, %v5708_v0  ;;  %vm20279_vm8 = vcmp.ge.s32.totalorder %v20212_v8, 1 }
 0x316   :  { %14049 = vmatpush1.msk.msra.mxu1 %vm20276_vm0, %v5709_v50  ;;  %vm20280_vm0 = vmmov %vm20277_vm5 }
 0x317   :  { %v5660_v51 = vpop.permute.xlu0 %5659  ;;  %v5662_v28 = vpop.permute.xlu1 %5661  ;;  %14050 = vmatmul.mubr.msk.f32.vlgmr.msra.gmra.mrb[6].mxu1 %vm20277_vm5, %v17596_v44  ;;  %vm20281_vm5 = vcmp.ge.s32.totalorder %v20214_v10, 1 }
 0x318   :  { %v5707_v49 = vsel %vm5691_vm9, %v5658_v24, %v5660_v51  ;;  %v5706_v26 = vsel %vm5691_vm9, %v5660_v51, %v5662_v28  ;;  %6528 = vmatprep.mubr.f32.mxu1 %v20025_v4 }
 0x319   :  { %14051 = vmatprep.subr.msk.mxu0 %vm20278_vm14, %v5706_v26  ;;  %vm20282_vm14 = vcmp.ge.s32.totalorder %v20219_v21, 1 }
 0x31a   :  { %14052 = vmatpush1.msk.msra.mxu0 %vm20279_vm8, %v5707_v49  ;;  %vm20283_vm8 = vmmov %vm20280_vm0 }
 0x31b   :  { %v5664_v5 = vpop.permute.xlu0 %5663  ;;  %v5666_v34 = vpop.permute.xlu1 %5665  ;;  %14053 = vmatmul.mubr.msk.f32.vlgmr.msra.gmra.mrb[8].mxu0 %vm20280_vm0, %v17596_v44  ;;  %vm20284_vm0 = vcmp.ge.s32.totalorder %v20221_v22, 1 }
 0x31c   :  { %v5705_v50 = vsel %vm5691_vm9, %v5662_v28, %v5664_v5  ;;  %v5704_v24 = vsel %vm5691_vm9, %v5664_v5, %v5666_v34  ;;  %6599 = vmatprep.mubr.f32.mxu0 %v20025_v4 }
 0x31d   :  { %14054 = vmatprep.subr.msk.mxu1 %vm20281_vm5, %v5704_v24  ;;  %vm20285_vm5 = vcmp.ge.s32.totalorder %v20225_v37, 1 }
 0x31e   :  { %14055 = vmatpush1.msk.msra.mxu1 %vm20282_vm14, %v5705_v50  ;;  %vm20286_vm14 = vmmov %vm20283_vm8 }
 0x31f   :  { %v5668_v0 = vpop.permute.xlu0 %5667  ;;  %v5670_v51 = vpop.permute.xlu1 %5669  ;;  %14056 = vmatmul.mubr.msk.f32.vlgmr.msra.gmra.mrb[8].mxu1 %vm20283_vm8, %v17596_v44  ;;  %vm20287_vm8 = vcmp.ge.s32.totalorder %v20227_v46, 1 }
 0x320   :  { %v5703_v49 = vsel %vm5691_vm9, %v5666_v34, %v5668_v0  ;;  %v5702_v28 = vsel %vm5691_vm9, %v5668_v0, %v5670_v51  ;;  %6670 = vmatprep.mubr.f32.mxu1 %v20025_v4 }
 0x321   :  { %14057 = vmatprep.subr.msk.mxu0 %vm20284_vm0, %v5702_v28  ;;  %vm20288_vm0 = vcmp.ge.s32.totalorder %v20232_v17, 1 }
 0x322   :  { %14058 = vmatpush1.msk.msra.mxu0 %vm20285_vm5, %v5703_v49  ;;  %vm20289_vm5 = vmmov %vm20286_vm14 }
 0x323   :  { %v5672_v26 = vpop.permute.xlu0 %5671  ;;  %v5674_v5 = vpop.permute.xlu1 %5673  ;;  %14059 = vmatmul.mubr.msk.f32.vlgmr.msra.gmra.mrb[10].mxu0 %vm20286_vm14, %v17596_v44  ;;  %vm20290_vm14 = vcmp.ge.s32.totalorder %v20086_v35, 1 }
 0x324   :  { %v5701_v50 = vsel %vm5691_vm9, %v5670_v51, %v5672_v26  ;;  %v5700_v34 = vsel %vm5691_vm9, %v5672_v26, %v5674_v5  ;;  %6741 = vmatprep.mubr.f32.mxu0 %v20025_v4 }
 0x325   :  { %14060 = vmatprep.subr.msk.mxu1 %vm20287_vm8, %v5700_v34  ;;  %vm20291_vm8 = vcmp.ge.s32.totalorder %v20088_v31, 1 }
 0x326   :  { %14061 = vmatpush1.msk.msra.mxu1 %vm20288_vm0, %v5701_v50  ;;  %vm20292_vm0 = vmmov %vm20289_vm5 }
 0x327   :  { %v5676_v24 = vpop.permute.xlu0 %5675  ;;  %v5678_v0 = vpop.permute.xlu1 %5677  ;;  %14062 = vmatmul.mubr.msk.f32.vlgmr.msra.gmra.mrb[10].mxu1 %vm20289_vm5, %v17596_v44  ;;  %vm20293_vm5 = vcmp.ge.s32.totalorder %v20091_v9, 1 }
 0x328   :  { %v5699_v49 = vsel %vm5691_vm9, %v5674_v5, %v5676_v24  ;;  %v5698_v51 = vsel %vm5691_vm9, %v5676_v24, %v5678_v0  ;;  %6812 = vmatprep.mubr.f32.mxu1 %v20025_v4 }
 0x329   :  { %14063 = vmatprep.subr.msk.mxu0 %vm20290_vm14, %v5698_v51  ;;  %vm20294_vm14 = vcmp.ge.s32.totalorder %v20242_v1, 1  ;;  %v20296_v51 = vld [vmem:[#allocation42_spill] sm:$0xff] }
 0x32a   :  { %14064 = vmatpush1.msk.msra.mxu0 %vm20291_vm8, %v5699_v49  ;;  %vm20295_vm8 = vmmov %vm20292_vm0 }
 0x32b   :  { %v5680_v28 = vpop.permute.xlu0 %5679  ;;  %v5682_v26 = vpop.permute.xlu1 %5681  ;;  %14065 = vmatmul.mubr.msk.f32.vlgmr.msra.gmra.mrb[12].mxu0 %vm20292_vm0, %v17596_v44  ;;  %vm20297_vm0 = vcmp.eq.s32.totalorder %v20296_v51, 1  ;;  %v17886_v51 = vld [vmem:[%s19228_s2 + $0x58] sm:$0xff] }
 0x32c   :  { %v5697_v50 = vsel %vm5691_vm9, %v5678_v0, %v5680_v28  ;;  %v5696_v5 = vsel %vm5691_vm9, %v5680_v28, %v5682_v26  ;;  %6883 = vmatprep.mubr.f32.mxu0 %v20025_v4  ;;  %vm17755_vm1 = vmneg %vm20297_vm0  ;;  %vm20304_vm0 = vcmp.ge.s32.totalorder %v20102_v61, 1  ;;  %v20317_v28 = vld [vmem:[#allocation62_spill] sm:$0xff]  ;;  %20326 = vst [vmem:[#allocation174_spill] sm:$0xff] %v17886_v51 }
 0x32d   :  { %14066 = vmatprep.subr.msk.mxu1 %vm20293_vm5, %v5696_v5  ;;  %vm20300_vm5 = vcmp.ge.s32.totalorder %v19919_v39, 1  ;;  %v17771_v5 = vld [vmem:[%s19228_s2 + $0x8] sm:$0xff] }
 0x32e   :  { %14067 = vmatpush1.msk.msra.mxu1 %vm20294_vm14, %v5697_v50  ;;  %vm20301_vm14 = vcmp.ge.s32.totalorder %v20248_v42, 1  ;;  %20302 = vst [vmem:[#allocation49_spill] sm:$0xff] %v17771_v5 }
 0x32f   :  { %v5684_v34 = vpop.permute.xlu0 %5683  ;;  %v5686_v24 = vpop.permute.xlu1 %5685  ;;  %14068 = vmatmul.mubr.msk.f32.vlgmr.msra.gmra.mrb[12].mxu1 %vm20295_vm8, %v17596_v44 }
 0x330   :  { %v5695_v49 = vsel %vm5691_vm9, %v5682_v26, %v5684_v34  ;;  %v5694_v0 = vsel %vm5691_vm9, %v5684_v34, %v5686_v24  ;;  %6954 = vmatprep.mubr.f32.mxu1 %v20025_v4 }
 0x331   :  { %14069 = vmatprep.subr.msk.mxu0 %vm20300_vm5, %v5694_v0  ;;  %v17784_v0 = vld [vmem:[%s19228_s2] sm:$0xff]  ;;  %vm20307_vm5 = vmmov %vm20295_vm8 }
 0x332   :  { %14070 = vmatpush1.msk.msra.mxu0 %vm20301_vm14, %v5695_v49  ;;  %20303 = vst [vmem:[#allocation81_spill] sm:$0xff] %v17784_v0  ;;  %vm20308_vm14 = vmmov %vm20307_vm5 }
 0x333   :  { %v5688_v50 = vpop.permute.xlu0 %5687  ;;  %14071 = vmatmul.mubr.msk.f32.vlgmr.msra.gmra.mrb[14].mxu0 %vm20295_vm8, %v17596_v44  ;;  %v17766_v26 = vpop.permute.xlu1 %8168  ;;  %14077 = vmatprep.subr.msk.mxu0 %vm17755_vm1, %v17771_v5  ;;  %v17793_v5 = vld [vmem:[%s19229_s3 + $0x20] sm:$0xff]  ;;  %vm14096_vm8 = vmneg %vm15614_vm2 }
 0x334   :  { %v5692_v34 = vsel %vm5691_vm9, %v5688_v50, %v17586_v11  ;;  %v5693_v49 = vsel %vm5691_vm9, %v5686_v24, %v5688_v50  ;;  %14079 = vmatpush1.msk.msra.mxu0 %vm17755_vm1, %v17784_v0  ;;  %7062 = vmatprep.mubr.f32.mxu0 %v20025_v4  ;;  %v17800_v11 = vld [vmem:[%s19228_s2 + $0x28] sm:$0xff]  ;;  %vm20306_vm9 = vcmp.ge.s32.totalorder %v19903_v48, 1  ;;  %v20327_v0 = vld [vmem:[#allocation69_spill] sm:$0xff] }
 0x335   :  { %14072 = vmatprep.subr.msk.mxu1 %vm20304_vm0, %v5692_v34  ;;  %20305 = vst [vmem:[#allocation58_spill] sm:$0xff] %v17800_v11  ;;  %14087 = vmatprep.subr.msk.mxu0 %vm17755_vm1, %v17800_v11  ;;  %v17818_v34 = vld [vmem:[%s19228_s2 + $0x18] sm:$0xff]  ;;  %v17836_v11 = vld [vmem:[%s19228_s2 + $0x10] sm:$0xff] }
 0x336   :  { %14073 = vmatpush1.msk.msra.mxu1 %vm20306_vm9, %v5693_v49  ;;  %20309 = vst [vmem:[#allocation57_spill] sm:$0xff] %v17818_v34  ;;  %v17826_v49 = vld [vmem:[%s19228_s2 + $0x20] sm:$0xff]  ;;  %20312 = vst [vmem:[#allocation84_spill] sm:$0xff] %v17836_v11 }
 0x337   :  { %v17807_v24 = vpop.permute.xlu0 %8170  ;;  %14074 = vmatmul.mubr.msk.f32.vlgmr.msra.gmra.mrb[14].mxu1 %vm20307_vm5, %v17596_v44  ;;  %14080 = vmatmul.mubr.msk.f32.vlgmr.msra.gmra.mrb[0].mxu0 %vm20308_vm14, %v17793_v5  ;;  %v17813_v50 = vpop.permute.xlu1 %8172  ;;  %20310 = vst [vmem:[#allocation82_spill] sm:$0xff] %v17826_v49  ;;  %v17852_v44 = vld [vmem:[%s19228_s2 + $0x38] sm:$0xff] }
 0x338   :  { %14082 = vmatprep.subr.msk.mxu1 %vm17755_vm1, %v17818_v34  ;;  %14089 = vmatpush1.msk.msra.mxu0 %vm17755_vm1, %v17826_v49  ;;  %v17844_v34 = vld [vmem:[%s19228_s2 + $0x48] sm:$0xff]  ;;  %v20314_v49 = vld [vmem:[#allocation63_spill] sm:$0xff]  ;;  %20316 = vst [vmem:[#allocation171_spill] sm:$0xff] %v17852_v44 }
 0x339   :  { %14084 = vmatpush1.msk.msra.mxu1 %vm17755_vm1, %v17836_v11  ;;  %20313 = vst [vmem:[#allocation170_spill] sm:$0xff] %v17844_v34  ;;  %14097 = vmatprep.subr.msk.mxu0 %vm14096_vm8, %v17844_v34  ;;  %vm20315_vm0 = vnez %v20314_v49  ;;  %vm20318_vm1 = vnez %v20317_v28  ;;  %v20319_v34 = vld [vmem:[#allocation64_spill] sm:$0xff]  ;;  %v20323_v28 = vld [vmem:[#allocation67_spill] sm:$0xff] }
 0x33a   :  { %vm14091_vm9 = vmneg %vm20315_vm0  ;;  %7133 = vmatprep.mubr.f32.mxu1 %v20025_v4  ;;  %7204 = vmatprep.mubr.f32.mxu0 %v20025_v4  ;;  %vm20320_vm8 = vnez %v20319_v34  ;;  %v17880_v34 = vld [vmem:[%s19228_s2 + $0x40] sm:$0xff] }
 0x33b   :  { %14092 = vmatprep.subr.msk.mxu1 %vm14091_vm9, %v17852_v44  ;;  %vm14093_vm5 = vmneg %vm20318_vm1  ;;  %v17859_v11 = vpop.permute.xlu0 %8174  ;;  %14085 = vmatmul.mubr.msk.f32.vlgmr.msra.gmra.mrb[0].mxu1 %vm20308_vm14, %v17793_v5  ;;  %v17865_v49 = vpop.permute.xlu1 %8166  ;;  %v17872_v44 = vld [vmem:[%s19228_s2 + $0x30] sm:$0xff]  ;;  %vm20324_vm9 = vnez %v20323_v28  ;;  %20325 = vst [vmem:[#allocation173_spill] sm:$0xff] %v17880_v34  ;;  %v17894_v28 = vld [vmem:[%s19228_s2 + $0x68] sm:$0xff] }
 0x33c   :  { %vm14098_vm2 = vmneg %vm20320_vm8  ;;  %20322 = vst [vmem:[#allocation172_spill] sm:$0xff] %v17872_v44  ;;  %14094 = vmatpush1.msk.msra.mxu1 %vm14093_vm5, %v17872_v44  ;;  %7275 = vmatprep.mubr.f32.mxu1 %v20025_v4 }
 0x33d   :  { %vm20321_vm0 = vmmov %vm20308_vm14  ;;  %20329 = vst [vmem:[#allocation175_spill] sm:$0xff] %v17894_v28 }
 0x33e   :  { %14090 = vmatmul.mubr.msk.f32.vlgmr.msra.gmra.mrb[2].mxu0 %vm20321_vm0, %v17793_v5  ;;  %vm14101_vm1 = vmneg %vm20324_vm9  ;;  %vm20328_vm0 = vnez %v20327_v0  ;;  %v20333_v0 = vld [vmem:[#allocation68_spill] sm:$0xff] }
 0x33f   :  { %14099 = vmatpush1.msk.msra.mxu0 %vm14098_vm2, %v17880_v34  ;;  %14102 = vmatprep.subr.msk.mxu1 %vm14101_vm1, %v17886_v51  ;;  %vm14106_vm5 = vmneg %vm20328_vm0  ;;  %v20330_v34 = vld [vmem:[#allocation66_spill] sm:$0xff]  ;;  %v17901_v44 = vpop.permute.xlu0 %8176  ;;  %vm20332_vm1 = vcmask 64512   ;;  %vm20334_vm0 = vnez %v20333_v0  ;;  %v17907_v51 = vpop.permute.xlu1 %8178  ;;  %v17922_v0 = vld [vmem:[%s19228_s2 + $0x60] sm:$0xff] }
 0x340   :  { %14107 = vmatprep.subr.msk.mxu0 %vm14106_vm5, %v17894_v28  ;;  %vm20331_vm2 = vnez %v20330_v34  ;;  %7346 = vmatprep.mubr.f32.mxu0 %v20025_v4  ;;  %vm14108_vm9 = vmneg %vm20334_vm0  ;;  %v17914_v28 = vld [vmem:[%s19228_s2 + $0x50] sm:$0xff]  ;;  %20339 = vst [vmem:[#allocation177_spill] sm:$0xff] %v17922_v0 }
 0x341   :  { %vm14103_vm14 = vmneg %vm20331_vm2  ;;  %14095 = vmatmul.mubr.msk.f32.vlgmr.msra.gmra.mrb[2].mxu1 %vm20332_vm1, %v17793_v5  ;;  %20336 = vst [vmem:[#allocation176_spill] sm:$0xff] %v17914_v28  ;;  %v20337_v34 = vld [vmem:[#allocation71_spill] sm:$0xff] }
 0x342   :  { %vm20335_vm8 = vmmov %vm20332_vm1  ;;  %14104 = vmatpush1.msk.msra.mxu1 %vm14103_vm14, %v17914_v28  ;;  %vm20338_vm5 = vnez %v20337_v34  ;;  %v14640_v34 = vld [vmem:[%s19228_s2 + $0x88] sm:$0xff]  ;;  %7417 = vmatprep.mubr.f32.mxu1 %v20025_v4 }
 0x343   :  { %14100 = vmatmul.mubr.msk.f32.vlgmr.msra.gmra.mrb[4].mxu0 %vm20335_vm8, %v17793_v5  ;;  %vm14111_vm2 = vmneg %vm20338_vm5  ;;  %vm20341_vm8 = vnez %v20340_v2  ;;  %v20342_v28 = vld [vmem:[#allocation70_spill] sm:$0xff]  ;;  %v17943_v2 = vpop.permute.xlu1 %8182 }
 0x344   :  { %14109 = vmatpush1.msk.msra.mxu0 %vm14108_vm9, %v17922_v0  ;;  %14112 = vmatprep.subr.msk.mxu1 %vm14111_vm2, %v14639_v57  ;;  %vm14116_vm1 = vmneg %vm20341_vm8  ;;  %vm20343_vm14 = vnez %v20342_v28  ;;  %v17937_v0 = vpop.permute.xlu0 %8180  ;;  %vm20344_vm9 = vcmask 64512   ;;  %v20345_v57 = vld [vmem:[#allocation51_spill] sm:$0xff]  ;;  %v20349_v28 = vld [vmem:[#allocation72_spill] sm:$0xff] }
 0x345   :  { %14117 = vmatprep.subr.msk.mxu0 %vm14116_vm1, %v14640_v34  ;;  %vm14113_vm5 = vmneg %vm20343_vm14  ;;  %7488 = vmatprep.mubr.f32.mxu0 %v20025_v4  ;;  %vm20346_vm2 = vnez %v20345_v57  ;;  %v17950_v34 = vld [vmem:[%s19228_s2 + $0x70] sm:$0xff]  ;;  %vm20350_vm1 = vnez %v20349_v28  ;;  %v17958_v57 = vld [vmem:[%s19228_s2 + $0x80] sm:$0xff] }
 0x346   :  { %14105 = vmatmul.mubr.msk.f32.vlgmr.msra.gmra.mrb[4].mxu1 %vm20344_vm9, %v17793_v5  ;;  %vm14118_vm8 = vmneg %vm20346_vm2  ;;  %20348 = vst [vmem:[#allocation178_spill] sm:$0xff] %v17950_v34  ;;  %v14644_v28 = vld [vmem:[%s19228_s2 + $0xa8] sm:$0xff] }
 0x347   :  { %vm20347_vm0 = vmmov %vm20344_vm9  ;;  %14114 = vmatpush1.msk.msra.mxu1 %vm14113_vm5, %v17950_v34  ;;  %20351 = vst [vmem:[#allocation179_spill] sm:$0xff] %v17958_v57  ;;  %7559 = vmatprep.mubr.f32.mxu1 %v20025_v4  ;;  %v20354_v34 = vld [vmem:[#allocation53_spill] sm:$0xff] }
 0x348   :  { %14110 = vmatmul.mubr.msk.f32.vlgmr.msra.gmra.mrb[6].mxu0 %vm20347_vm0, %v17793_v5  ;;  %vm14121_vm14 = vmneg %vm20350_vm1  ;;  %vm20353_vm0 = vnez %v20352_v56  ;;  %vm20355_vm5 = vnez %v20354_v34  ;;  %v17979_v56 = vpop.permute.xlu1 %8186  ;;  %v20361_v34 = vld [vmem:[#allocation56_spill] sm:$0xff] }
 0x349   :  { %14119 = vmatpush1.msk.msra.mxu0 %vm14118_vm8, %v17958_v57  ;;  %14122 = vmatprep.subr.msk.mxu1 %vm14121_vm14, %v14643_v15  ;;  %vm14126_vm9 = vmneg %vm20353_vm0  ;;  %v17973_v57 = vpop.permute.xlu0 %8184  ;;  %vm20356_vm8 = vcmask 64512   ;;  %v20357_v15 = vld [vmem:[#allocation73_spill] sm:$0xff] }
 0x34a   :  { %14127 = vmatprep.subr.msk.mxu0 %vm14126_vm9, %v14644_v28  ;;  %vm14123_vm1 = vmneg %vm20355_vm5  ;;  %7630 = vmatprep.mubr.f32.mxu0 %v20025_v4  ;;  %vm20358_vm14 = vnez %v20357_v15  ;;  %v17986_v28 = vld [vmem:[%s19228_s2 + $0x90] sm:$0xff]  ;;  %vm20362_vm9 = vnez %v20361_v34  ;;  %v17994_v15 = vld [vmem:[%s19228_s2 + $0xa0] sm:$0xff] }
 0x34b   :  { %14115 = vmatmul.mubr.msk.f32.vlgmr.msra.gmra.mrb[6].mxu1 %vm20356_vm8, %v17793_v5  ;;  %vm14128_vm0 = vmneg %vm20358_vm14  ;;  %20360 = vst [vmem:[#allocation180_spill] sm:$0xff] %v17986_v28  ;;  %v14648_v34 = vld [vmem:[%s19228_s2 + $0xc8] sm:$0xff]  ;;  %vm20398_vm14 = vnez %v20181_v12 }
 0x34c   :  { %vm20359_vm2 = vmmov %vm20356_vm8  ;;  %14124 = vmatpush1.msk.msra.mxu1 %vm14123_vm1, %v17986_v28  ;;  %20363 = vst [vmem:[#allocation181_spill] sm:$0xff] %v17994_v15  ;;  %7701 = vmatprep.mubr.f32.mxu1 %v20025_v4  ;;  %v20365_v28 = vld [vmem:[#allocation55_spill] sm:$0xff]  ;;  %v18015_v3 = vpop.permute.xlu1 %8190 }
 0x34d   :  { %14120 = vmatmul.mubr.msk.f32.vlgmr.msra.gmra.mrb[8].mxu0 %vm20359_vm2, %v17793_v5  ;;  %vm14131_vm5 = vmneg %vm20362_vm9  ;;  %vm20366_vm1 = vnez %v20365_v28  ;;  %v20370_v28 = vld [vmem:[#allocation74_spill] sm:$0xff] }
 0x34e   :  { %14129 = vmatpush1.msk.msra.mxu0 %vm14128_vm0, %v17994_v15  ;;  %14132 = vmatprep.subr.msk.mxu1 %vm14131_vm5, %v14647_v53  ;;  %vm14136_vm2 = vmneg %vm16297_vm3  ;;  %v18009_v15 = vpop.permute.xlu0 %8188  ;;  %vm20367_vm0 = vcmask 64512   ;;  %v14651_v53 = vld [vmem:[%s19228_s2 + $0xd8] sm:$0xff] }
 0x34f   :  { %14137 = vmatprep.subr.msk.mxu0 %vm14136_vm2, %v14648_v34  ;;  %vm14133_vm8 = vmneg %vm20366_vm1  ;;  %7772 = vmatprep.mubr.f32.mxu0 %v20025_v4  ;;  %v14649_v34 = vld [vmem:[%s19228_s2 + $0xb0] sm:$0xff]  ;;  %vm20371_vm2 = vnez %v20370_v28  ;;  %v20374_v28 = vld [vmem:[#allocation50_spill] sm:$0xff] }
 0x350   :  { %14125 = vmatmul.mubr.msk.f32.vlgmr.msra.gmra.mrb[8].mxu1 %vm20367_vm0, %v17793_v5  ;;  %vm14138_vm5 = vmneg %vm16267_vm11 }
 0x351   :  { %vm20369_vm3 = vmmov %vm20367_vm0  ;;  %14134 = vmatpush1.msk.msra.mxu1 %vm14133_vm8, %v14649_v34  ;;  %v14652_v34 = vld [vmem:[%s19228_s2 + $0xe8] sm:$0xff]  ;;  %7843 = vmatprep.mubr.f32.mxu1 %v20025_v4  ;;  %vm20375_vm8 = vnez %v20374_v28  ;;  %v20380_v28 = vld [vmem:[#allocation61_spill] sm:$0xff] }
 0x352   :  { %14130 = vmatmul.mubr.msk.f32.vlgmr.msra.gmra.mrb[10].mxu0 %vm20369_vm3, %v17793_v5  ;;  %vm14141_vm9 = vmneg %vm20371_vm2  ;;  %vm20373_vm3 = vnez %v20372_v62  ;;  %v18046_v62 = vpop.permute.xlu1 %8194 }
 0x353   :  { %14139 = vmatpush1.msk.msra.mxu0 %vm14138_vm5, %v14650_v41  ;;  %14142 = vmatprep.subr.msk.mxu1 %vm14141_vm9, %v14651_v53  ;;  %vm14146_vm0 = vmneg %vm20373_vm3  ;;  %v18040_v41 = vpop.permute.xlu0 %8192  ;;  %vm20376_vm9 = vcmask 64512   ;;  %v20377_v53 = vld [vmem:[#allocation77_spill] sm:$0xff] }
 0x354   :  { %14147 = vmatprep.subr.msk.mxu0 %vm14146_vm0, %v14652_v34  ;;  %vm14143_vm5 = vmneg %vm20375_vm8  ;;  %7914 = vmatprep.mubr.f32.mxu0 %v20025_v4  ;;  %vm20378_vm3 = vnez %v20377_v53  ;;  %v14653_v34 = vld [vmem:[%s19228_s2 + $0xd0] sm:$0xff]  ;;  %vm20381_vm0 = vnez %v20380_v28  ;;  %v14654_v53 = vld [vmem:[%s19228_s2 + $0xe0] sm:$0xff] }
 0x355   :  { %14135 = vmatmul.mubr.msk.f32.vlgmr.msra.gmra.mrb[10].mxu1 %vm20376_vm9, %v17793_v5  ;;  %vm14148_vm11 = vmneg %vm20378_vm3  ;;  %v20383_v28 = vld [vmem:[#allocation80_spill] sm:$0xff] }
 0x356   :  { %vm20379_vm2 = vmmov %vm20376_vm9  ;;  %14144 = vmatpush1.msk.msra.mxu1 %vm14143_vm5, %v14653_v34  ;;  %vm20382_vm9 = vcmp.lt.s32.totalorder %v14821_v43, 127  ;;  %7985 = vmatprep.mubr.f32.mxu1 %v20025_v4  ;;  %vm20384_vm5 = vnez %v20383_v28 }
 0x357   :  { %14140 = vmatmul.mubr.msk.f32.vlgmr.msra.gmra.mrb[12].mxu0 %vm20379_vm2, %v17793_v5  ;;  %vm14151_vm8 = vmneg %vm20381_vm0  ;;  %v8260_v23 = vsel %vm20382_vm9, %v17766_v26, %v17807_v24  ;;  %v8197_v34 = vpop.permute.xlu0 %8196 }
 0x358   :  { %14149 = vmatpush1.msk.msra.mxu0 %vm14148_vm11, %v14654_v53  ;;  %14152 = vmatprep.subr.msk.mxu1 %vm14151_vm8, %v14655_v6  ;;  %vm14153_vm9 = vmneg %vm20384_vm5  ;;  %v8199_v53 = vpop.permute.xlu1 %8198  ;;  %vm20385_vm11 = vcmp.lt.s32.totalorder %v14821_v43, 127  ;;  %vm20390_vm5 = vnez %v20161_v40  ;;  %v20461_v43 = vld [vmem:[#allocation85_spill] sm:$0xff]  ;;  %v20584_v40 = vld [vmem:[#allocation143_spill] sm:$0xff] }
 0x359   :  { %14157 = vmatprep.subr.msk.mxu0 %vm17160_vm15, %v8260_v23  ;;  %8056 = vmatprep.mubr.f32.mxu0 %v20025_v4  ;;  %v8258_v6 = vsel %vm20385_vm11, %v17813_v50, %v17859_v11  ;;  %vm20386_vm8 = vmmov %vm20385_vm11  ;;  %vm20389_vm11 = vnez %v20157_v60  ;;  %v20582_v60 = vld [vmem:[#allocation138_spill] sm:$0xff] }
 0x35a   :  { %14145 = vmatmul.mubr.msk.f32.vlgmr.msra.gmra.mrb[12].mxu1 %vm20379_vm2, %v17793_v5  ;;  %v8261_v23 = vsel %vm20386_vm8, %v17865_v49, %v17766_v26  ;;  %vm20387_vm0 = vmmov %vm20379_vm2  ;;  %v18097_v26 = vld [vmem:[%s19229_s3 + $0x28] sm:$0xff] }
 0x35b   :  { %14150 = vmatmul.mubr.msk.f32.vlgmr.msra.gmra.mrb[14].mxu0 %vm20387_vm0, %v17793_v5  ;;  %14154 = vmatpush1.msk.msra.mxu1 %vm14153_vm9, %v14656_v13  ;;  %vm20388_vm2 = vmmov %vm20386_vm8  ;;  %vm20391_vm0 = vnez %v20172_v16  ;;  %vm20393_vm8 = vcmask 64512  }
 0x35c   :  { %v8256_v28 = vsel %vm20388_vm2, %v17901_v44, %v17907_v51  ;;  %14158 = vmatpush1.msk.msra.mxu0 %vm20389_vm11, %v8261_v23  ;;  %14160 = vmatprep.subr.msk.mxu1 %vm20390_vm5, %v8258_v6  ;;  %vm20392_vm9 = vmmov %vm20388_vm2  ;;  %v8201_v23 = vpop.permute.xlu0 %8200  ;;  %v8203_v6 = vpop.permute.xlu1 %8202  ;;  %v8257_v16 = vsel %vm20388_vm2, %v17859_v11, %v17901_v44 }
 0x35d   :  { %14163 = vmatprep.subr.msk.mxu0 %vm20391_vm0, %v8256_v28  ;;  %8127 = vmatprep.mubr.f32.mxu1 %v20025_v4  ;;  %v8259_v13 = vsel %vm20392_vm9, %v17807_v24, %v17813_v50  ;;  %vm20394_vm3 = vmmov %vm20388_vm2  ;;  %vm20396_vm9 = vnez %v20164_v27  ;;  %vm20400_vm0 = vcmp.lt.s32.totalorder %v20036_v30, 63 }
 0x35e   :  { %8428 = vmatprep.mubr.f32.mxu0 %v20025_v4  ;;  %14155 = vmatmul.mubr.msk.f32.vlgmr.msra.gmra.mrb[14].mxu1 %vm20393_vm8, %v17793_v5  ;;  %v8254_v28 = vsel %vm20394_vm3, %v17937_v0, %v17943_v2  ;;  %vm20395_vm1 = vmmov %vm20393_vm8 }
 0x35f   :  { %14159 = vmatmul.mubr.msk.f32.vlgmr.msra.gmra.mrb[0].mxu0 %vm20395_vm1, %v18097_v26  ;;  %14161 = vmatpush1.msk.msra.mxu1 %vm20396_vm9, %v8259_v13  ;;  %vm20397_vm8 = vmmov %vm20388_vm2  ;;  %vm20399_vm2 = vcmp.lt.s32.totalorder %v20024_v47, 63  ;;  %vm20410_vm9 = vcmp.lt.s32.totalorder %v20195_v45, 63 }
 0x360   :  { %v8252_v5 = vsel %vm20397_vm8, %v17973_v57, %v17979_v56  ;;  %14164 = vmatpush1.msk.msra.mxu0 %vm20398_vm14, %v8257_v16  ;;  %14166 = vmatprep.subr.msk.mxu1 %vm20399_vm2, %v8254_v28  ;;  %vm20401_vm1 = vmmov %vm20394_vm3  ;;  %v8205_v24 = vpop.permute.xlu0 %8204  ;;  %vm20402_vm3 = vcmask 64512   ;;  %v8207_v16 = vpop.permute.xlu1 %8206  ;;  %vm20408_vm14 = vcmp.lt.s32.totalorder %v20038_v38, 63 }
 0x361   :  { %14169 = vmatprep.subr.msk.mxu0 %vm20400_vm0, %v8252_v5  ;;  %8499 = vmatprep.mubr.f32.mxu1 %v20025_v4  ;;  %v8255_v11 = vsel %vm20401_vm1, %v17907_v51, %v17937_v0  ;;  %vm20403_vm8 = vmmov %vm20401_vm1 }
 0x362   :  { %8570 = vmatprep.mubr.f32.mxu0 %v20025_v4  ;;  %14162 = vmatmul.mubr.msk.f32.vlgmr.msra.gmra.mrb[0].mxu1 %vm20402_vm3, %v18097_v26  ;;  %v8253_v50 = vsel %vm20403_vm8, %v17943_v2, %v17973_v57  ;;  %vm20404_vm0 = vmmov %vm20401_vm1  ;;  %vm20406_vm1 = vcmp.lt.s32.totalorder %v20029_v14, 63  ;;  %vm20409_vm8 = vcmp.lt.s32.totalorder %v20042_v55, 63 }
 0x363   :  { %v8250_v44 = vsel %vm20404_vm0, %v18009_v15, %v18015_v3  ;;  %vm20405_vm2 = vmmov %vm20402_vm3  ;;  %14167 = vmatpush1.msk.msra.mxu1 %vm20406_vm1, %v8255_v11  ;;  %8641 = vmatprep.mubr.f32.mxu1 %v20025_v4  ;;  %v8251_v2 = vsel %vm20404_vm0, %v17979_v56, %v18009_v15 }
 0x364   :  { %14165 = vmatmul.mubr.msk.f32.vlgmr.msra.gmra.mrb[2].mxu0 %vm20405_vm2, %v18097_v26  ;;  %vm20407_vm3 = vmmov %vm20404_vm0  ;;  %14172 = vmatprep.subr.msk.mxu1 %vm20409_vm8, %v8250_v44  ;;  %v8209_v0 = vpop.permute.xlu0 %8208  ;;  %v8211_v57 = vpop.permute.xlu1 %8210 }
 0x365   :  { %v8248_v51 = vsel %vm20407_vm3, %v18040_v41, %v18046_v62  ;;  %14170 = vmatpush1.msk.msra.mxu0 %vm20408_vm14, %v8253_v50  ;;  %8712 = vmatprep.mubr.f32.mxu0 %v20025_v4  ;;  %vm20411_vm14 = vmmov %vm20404_vm0  ;;  %vm20414_vm3 = vcmp.lt.s32.totalorder %v20045_v25, 63 }
 0x366   :  { %14175 = vmatprep.subr.msk.mxu0 %vm20410_vm9, %v8248_v51  ;;  %14168 = vmatmul.mubr.msk.f32.vlgmr.msra.gmra.mrb[2].mxu1 %vm20405_vm2, %v18097_v26  ;;  %v8249_v13 = vsel %vm20411_vm14, %v18015_v3, %v18040_v41  ;;  %vm20412_vm9 = vmmov %vm20404_vm0  ;;  %vm20418_vm14 = vcmp.lt.s32.totalorder %v20208_v36, 63 }
 0x367   :  { %v8246_v28 = vsel %vm20412_vm9, %v8197_v34, %v8199_v53  ;;  %vm20413_vm1 = vmmov %vm20405_vm2  ;;  %14173 = vmatpush1.msk.msra.mxu1 %vm20414_vm3, %v8251_v2  ;;  %vm20417_vm2 = vcmp.lt.s32.totalorder %v20202_v58, 63  ;;  %8783 = vmatprep.mubr.f32.mxu1 %v20025_v4 }
 0x368   :  { %14171 = vmatmul.mubr.msk.f32.vlgmr.msra.gmra.mrb[4].mxu0 %vm20413_vm1, %v18097_v26  ;;  %vm20415_vm8 = vmmov %vm20404_vm0  ;;  %vm20416_vm0 = vcmp.lt.s32.totalorder %v20200_v20, 63  ;;  %14178 = vmatprep.subr.msk.mxu1 %vm20417_vm2, %v8246_v28  ;;  %v8213_v15 = vpop.permute.xlu0 %8212  ;;  %v8215_v41 = vpop.permute.xlu1 %8214  ;;  %vm20423_vm2 = vcmp.lt.s32.totalorder %v20206_v19, 63 }
 0x369   :  { %v8244_v56 = vsel %vm20415_vm8, %v8201_v23, %v8203_v6  ;;  %14176 = vmatpush1.msk.msra.mxu0 %vm20416_vm0, %v8249_v13  ;;  %vm20419_vm9 = vmmov %vm20415_vm8  ;;  %8854 = vmatprep.mubr.f32.mxu0 %v20025_v4 }
 0x36a   :  { %14181 = vmatprep.subr.msk.mxu0 %vm20418_vm14, %v8244_v56  ;;  %v8247_v3 = vsel %vm20419_vm9, %v18046_v62, %v8197_v34  ;;  %14174 = vmatmul.mubr.msk.f32.vlgmr.msra.gmra.mrb[4].mxu1 %vm20413_vm1, %v18097_v26  ;;  %vm20420_vm3 = vmmov %vm20415_vm8  ;;  %vm20425_vm9 = vcmp.lt.s32.totalorder %v20212_v8, 63 }
 0x36b   :  { %v8245_v5 = vsel %vm20420_vm3, %v8199_v53, %v8201_v23  ;;  %vm20421_vm8 = vmmov %vm20420_vm3  ;;  %14179 = vmatpush1.msk.msra.mxu1 %vm20423_vm2, %v8247_v3  ;;  %8925 = vmatprep.mubr.f32.mxu1 %v20025_v4 }
 0x36c   :  { %v8242_v11 = vsel %vm20421_vm8, %v8205_v24, %v8207_v16  ;;  %vm20422_vm0 = vmmov %vm20413_vm1  ;;  %vm20426_vm1 = vcmp.lt.s32.totalorder %v20214_v10, 63  ;;  %v8243_v34 = vsel %vm20421_vm8, %v8203_v6, %v8205_v24  ;;  %v8217_v53 = vpop.permute.xlu0 %8216  ;;  %v8219_v23 = vpop.permute.xlu1 %8218 }
 0x36d   :  { %14177 = vmatmul.mubr.msk.f32.vlgmr.msra.gmra.mrb[6].mxu0 %vm20422_vm0, %v18097_v26  ;;  %vm20424_vm14 = vmmov %vm20420_vm3  ;;  %14184 = vmatprep.subr.msk.mxu1 %vm20426_vm1, %v8242_v11  ;;  %vm20427_vm3 = vcmp.lt.s32.totalorder %v20221_v22, 63  ;;  %vm20431_vm1 = vcmp.lt.s32.totalorder %v20219_v21, 63 }
 0x36e   :  { %v8240_v62 = vsel %vm20424_vm14, %v8209_v0, %v8211_v57  ;;  %14182 = vmatpush1.msk.msra.mxu0 %vm20425_vm9, %v8245_v5  ;;  %8996 = vmatprep.mubr.f32.mxu0 %v20025_v4  ;;  %vm20428_vm2 = vmmov %vm20421_vm8  ;;  %vm20433_vm8 = vcmp.lt.s32.totalorder %v20225_v37, 63  ;;  %v20451_v5 = vld [vmem:[#allocation78_spill] sm:$0xff] }
 0x36f   :  { %14187 = vmatprep.subr.msk.mxu0 %vm20427_vm3, %v8240_v62  ;;  %14180 = vmatmul.mubr.msk.f32.vlgmr.msra.gmra.mrb[6].mxu1 %vm20422_vm0, %v18097_v26  ;;  %v8241_v50 = vsel %vm20428_vm2, %v8207_v16, %v8209_v0  ;;  %vm20429_vm14 = vmmov %vm20428_vm2 }
 0x370   :  { %v8238_v44 = vsel %vm20429_vm14, %v8213_v15, %v8215_v41  ;;  %vm20430_vm9 = vmmov %vm20422_vm0  ;;  %14185 = vmatpush1.msk.msra.mxu1 %vm20431_vm1, %v8243_v34  ;;  %vm20434_vm0 = vcmp.lt.s32.totalorder %v20227_v46, 63  ;;  %9067 = vmatprep.mubr.f32.mxu1 %v20025_v4  ;;  %v8221_v16 = vpop.permute.xlu0 %8220  ;;  %v8223_v51 = vpop.permute.xlu1 %8222  ;;  %v20455_v34 = vld [vmem:[#allocation76_spill] sm:$0xff] }
 0x371   :  { %14183 = vmatmul.mubr.msk.f32.vlgmr.msra.gmra.mrb[8].mxu0 %vm20430_vm9, %v18097_v26  ;;  %vm20432_vm3 = vmmov %vm20428_vm2  ;;  %14190 = vmatprep.subr.msk.mxu1 %vm20434_vm0, %v8238_v44  ;;  %vm20435_vm2 = vcmp.lt.s32.totalorder %v20086_v35, 63  ;;  %v20481_v44 = vld [vmem:[#allocation88_spill] sm:$0xff] }
 0x372   :  { %v8236_v6 = vsel %vm20432_vm3, %v8217_v53, %v8219_v23  ;;  %14188 = vmatpush1.msk.msra.mxu0 %vm20433_vm8, %v8241_v50  ;;  %vm20436_vm14 = vmmov %vm20432_vm3  ;;  %9138 = vmatprep.mubr.f32.mxu0 %v20025_v4  ;;  %vm20439_vm8 = vcmp.lt.s32.totalorder %v20232_v17, 63  ;;  %v20479_v50 = vld [vmem:[#allocation86_spill] sm:$0xff] }
 0x373   :  { %14193 = vmatprep.subr.msk.mxu0 %vm20435_vm2, %v8236_v6  ;;  %v8239_v24 = vsel %vm20436_vm14, %v8211_v57, %v8213_v15  ;;  %14186 = vmatmul.mubr.msk.f32.vlgmr.msra.gmra.mrb[8].mxu1 %vm20430_vm9, %v18097_v26  ;;  %vm20437_vm1 = vmmov %vm20432_vm3  ;;  %v1363_v57 = vld [vmem:[%s19230_s4] sm:$0xff]  ;;  %vm20441_vm2 = vcmp.lt.s32.totalorder %v20088_v31, 63  ;;  %vm20442_vm14 = vcmp.lt.s32.totalorder %v20091_v9, 63  ;;  %v20483_v6 = vld [vmem:[#allocation91_spill] sm:$0xff] }
 0x374   :  { %v8237_v2 = vsel %vm20437_vm1, %v8215_v41, %v8217_v53  ;;  %vm20438_vm3 = vmmov %vm20430_vm9  ;;  %14191 = vmatpush1.msk.msra.mxu1 %vm20439_vm8, %v8239_v24  ;;  %9209 = vmatprep.mubr.f32.mxu1 %v20025_v4  ;;  %v8225_v28 = vpop.permute.xlu0 %8224  ;;  %v8227_v56 = vpop.permute.xlu1 %8226  ;;  %v20457_v53 = vld [vmem:[#allocation44_spill] sm:$0xff]  ;;  %v20485_v24 = vld [vmem:[#allocation93_spill] sm:$0xff] }
 0x375   :  { %14189 = vmatmul.mubr.msk.f32.vlgmr.msra.gmra.mrb[10].mxu0 %vm20438_vm3, %v18097_v26  ;;  %vm20440_vm0 = vmmov %vm20437_vm1  ;;  %1366 = vperm.xlu1 %14623, %v1363_v57   ;;  %v20498_v57 = vld [vmem:[#allocation94_spill] sm:$0xff] }
 0x376   :  { %v8234_v0 = vsel %vm20440_vm0, %v8221_v16, %v8223_v51  ;;  %14194 = vmatpush1.msk.msra.mxu0 %vm20441_vm2, %v8237_v2  ;;  %9280 = vmatprep.mubr.f32.mxu0 %v20025_v4  ;;  %vm20443_vm9 = vmmov %vm20440_vm0  ;;  %v20493_v2 = vld [vmem:[#allocation95_spill] sm:$0xff] }
 0x377   :  { %14196 = vmatprep.subr.msk.mxu1 %vm20442_vm14, %v8234_v0  ;;  %v8235_v13 = vsel %vm20443_vm9, %v8219_v23, %v8221_v16  ;;  %vm20444_vm1 = vmmov %vm20438_vm3  ;;  %vm20449_vm14 = vcmp.lt.s32.totalorder %v19919_v39, 63  ;;  %vm20450_vm9 = vcmp.lt.s32.totalorder %v20248_v42, 63  ;;  %v20476_v23 = vld [vmem:[#allocation89_spill] sm:$0xff]  ;;  %v20489_v16 = vld [vmem:[#allocation90_spill] sm:$0xff] }
 0x378   :  { %14192 = vmatmul.mubr.msk.f32.vlgmr.msra.gmra.mrb[10].mxu1 %vm20444_vm1, %v18097_v26  ;;  %vm20445_vm3 = vmmov %vm20440_vm0  ;;  %vm20447_vm0 = vcmp.lt.s32.totalorder %v20242_v1, 63  ;;  %v8229_v41 = vpop.permute.xlu0 %8228  ;;  %v20495_v0 = vld [vmem:[#allocation97_spill] sm:$0xff] }
 0x379   :  { %v8233_v3 = vsel %vm20445_vm3, %v8223_v51, %v8225_v28  ;;  %vm20446_vm8 = vmmov %vm20444_vm1  ;;  %14197 = vmatpush1.msk.msra.mxu1 %vm20447_vm0, %v8235_v13  ;;  %9351 = vmatprep.mubr.f32.mxu1 %v20025_v4  ;;  %v20491_v51 = vld [vmem:[#allocation92_spill] sm:$0xff] }
 0x37a   :  { %14195 = vmatmul.mubr.msk.f32.vlgmr.msra.gmra.mrb[12].mxu0 %vm20446_vm8, %v18097_v26  ;;  %vm20448_vm2 = vmmov %vm20445_vm3  ;;  %v20500_v13 = vld [vmem:[#allocation96_spill] sm:$0xff] }
 0x37b   :  { %v8232_v15 = vsel %vm20448_vm2, %v8225_v28, %v8227_v56  ;;  %9422 = vmatprep.mubr.f32.mxu0 %v20025_v4  ;;  %vm20452_vm3 = vmmov %vm20448_vm2  ;;  %v20502_v28 = vld [vmem:[#allocation99_spill] sm:$0xff] }
 0x37c   :  { %14199 = vmatprep.subr.msk.mxu0 %vm20449_vm14, %v8232_v15  ;;  %14198 = vmatmul.mubr.msk.f32.vlgmr.msra.gmra.mrb[12].mxu1 %vm20444_vm1, %v18097_v26  ;;  %v8231_v11 = vsel %vm20452_vm3, %v8227_v56, %v8229_v41  ;;  %vm20453_vm8 = vmmov %vm20448_vm2  ;;  %vm20456_vm2 = vcmp.lt.s32.totalorder %v20102_v61, 63  ;;  %vm20475_vm3 = vcmp.ge.s32.totalorder %v20042_v55, 1  ;;  %v20504_v56 = vld [vmem:[#allocation101_spill] sm:$0xff]  ;;  %v20509_v15 = vld [vmem:[#allocation98_spill] sm:$0xff] }
 0x37d   :  { %14200 = vmatpush1.msk.msra.mxu0 %vm20450_vm9, %v8233_v3  ;;  %v8262_v62 = vsel %vm20453_vm8, %v8229_v41, %v17865_v49  ;;  %vm20454_vm0 = vmmov %vm20444_vm1  ;;  %9493 = vmatprep.mubr.f32.mxu1 %v20025_v4  ;;  %v20464_v49 = vld [vmem:[#allocation47_spill] sm:$0xff]  ;;  %vm20467_vm9 = vcmp.ge.s32.totalorder %v20024_v47, 1  ;;  %vm20473_vm1 = vcmp.ge.s32.totalorder %v20038_v38, 1  ;;  %vm20477_vm8 = vcmp.ge.s32.totalorder %v20195_v45, 1  ;;  %v20508_v3 = vld [vmem:[#allocation13_spill] sm:$0xff] }
 0x37e   :  { %14206 = vmatprep.subr.msk.mxu0 %vm16200_vm6, %v20451_v5  ;;  %14201 = vmatmul.mubr.msk.f32.vlgmr.msra.gmra.mrb[14].mxu0 %vm20454_vm0, %v18097_v26  ;;  %vm20458_vm6 = vcmp.lt.s32.totalorder %v19903_v48, 63  ;;  %vm20459_vm14 = vmmov %vm20454_vm0  ;;  %v20511_v41 = vld [vmem:[#allocation100_spill] sm:$0xff]  ;;  %v20513_v5 = vld [vmem:[#allocation103_spill] sm:$0xff] }
 0x37f   :  { %14207 = vmatpush1.msk.msra.mxu0 %vm16513_vm4, %v20455_v34  ;;  %14202 = vmatprep.subr.msk.mxu1 %vm20456_vm2, %v8262_v62  ;;  %vm20460_vm4 = vmmov %vm20454_vm0  ;;  %v20523_v62 = vld [vmem:[#allocation83_spill] sm:$0xff]  ;;  %v20526_v34 = vld [vmem:[#allocation106_spill] sm:$0xff] }
 0x380   :  { %14212 = vmatprep.subr.msk.mxu0 %vm16531_vm12, %v20457_v53  ;;  %14203 = vmatpush1.msk.msra.mxu1 %vm20458_vm6, %v8231_v11  ;;  %vm20465_vm12 = vcmp.ge.s32.totalorder %v20036_v30, 1  ;;  %vm20478_vm2 = vmmov %vm20454_vm0  ;;  %vm20480_vm6 = vcmp.ge.s32.totalorder %v20045_v25, 1  ;;  %v20519_v11 = vld [vmem:[#allocation102_spill] sm:$0xff]  ;;  %v20528_v53 = vld [vmem:[#allocation105_spill] sm:$0xff] }
 0x381   :  { %9761 = vmatprep.mubr.f32.mxu0 %v20025_v4  ;;  %14204 = vmatmul.mubr.msk.f32.vlgmr.msra.gmra.mrb[14].mxu1 %vm20459_vm14, %v18097_v26  ;;  %v20466_v26 = vld [vmem:[#allocation46_spill] sm:$0xff]  ;;  %vm20482_vm14 = vcmp.ge.s32.totalorder %v20200_v20, 1 }
 0x382   :  { %14208 = vmatmul.mubr.msk.f32.vlgmr.msra.gmra.mrb[0].mxu0 %vm20460_vm4, %v18294_v33  ;;  %14209 = vmatprep.subr.msk.mxu1 %vm16194_vm10, %v20461_v43  ;;  %vm20468_vm10 = vmmov %vm20454_vm0  ;;  %vm20484_vm4 = vcmp.ge.s32.totalorder %v20202_v58, 1  ;;  %v20529_v43 = vld [vmem:[#allocation110_spill] sm:$0xff] }
 0x383   :  { %14213 = vmatpush1.msk.msra.mxu0 %vm16543_vm7, %v20462_v54  ;;  %14210 = vmatpush1.msk.msra.mxu1 %vm16249_vm13, %v20463_v59  ;;  %vm20469_vm7 = vmmov %vm20454_vm0  ;;  %vm20471_vm13 = vcmp.ge.s32.totalorder %v20029_v14, 1  ;;  %v20530_v54 = vld [vmem:[#allocation112_spill] sm:$0xff]  ;;  %v20533_v59 = vld [vmem:[#allocation109_spill] sm:$0xff] }
 0x384   :  { %14218 = vmatprep.subr.msk.mxu0 %vm20465_vm12, %v20464_v49  ;;  %14215 = vmatprep.subr.msk.mxu1 %vm20467_vm9, %v20466_v26  ;;  %vm20486_vm12 = vcmp.ge.s32.totalorder %v20208_v36, 1  ;;  %vm20487_vm9 = vmmov %vm20454_vm0  ;;  %v20534_v49 = vld [vmem:[#allocation108_spill] sm:$0xff]  ;;  %v20535_v26 = vld [vmem:[#allocation114_spill] sm:$0xff] }
 0x385   :  { %9832 = vmatprep.mubr.f32.mxu1 %v20025_v4  ;;  %9903 = vmatprep.mubr.f32.mxu0 %v20025_v4 }
 0x386   :  { %14211 = vmatmul.mubr.msk.f32.vlgmr.msra.gmra.mrb[0].mxu1 %vm20468_vm10, %v18294_v33  ;;  %14214 = vmatmul.mubr.msk.f32.vlgmr.msra.gmra.mrb[2].mxu0 %vm20469_vm7, %v18294_v33  ;;  %vm20488_vm10 = vmmov %vm20454_vm0  ;;  %vm20490_vm7 = vcmp.ge.s32.totalorder %v20206_v19, 1 }
 0x387   :  { %14216 = vmatpush1.msk.msra.mxu1 %vm20471_vm13, %v20470_v18  ;;  %14219 = vmatpush1.msk.msra.mxu0 %vm20473_vm1, %v20472_v52  ;;  %vm20492_vm13 = vcmp.ge.s32.totalorder %v20212_v8, 1  ;;  %vm20494_vm1 = vcmp.ge.s32.totalorder %v20214_v10, 1  ;;  %v20536_v18 = vld [vmem:[#allocation116_spill] sm:$0xff]  ;;  %v20540_v52 = vld [vmem:[#allocation113_spill] sm:$0xff] }
 0x388   :  { %14221 = vmatprep.subr.msk.mxu1 %vm20475_vm3, %v20474_v32  ;;  %14224 = vmatprep.subr.msk.mxu0 %vm20477_vm8, %v20476_v23  ;;  %vm20496_vm3 = vcmp.ge.s32.totalorder %v20221_v22, 1  ;;  %vm20497_vm8 = vmmov %vm20454_vm0  ;;  %v20541_v32 = vld [vmem:[#allocation118_spill] sm:$0xff]  ;;  %v20542_v23 = vld [vmem:[#allocation120_spill] sm:$0xff] }
 0x389   :  { %9974 = vmatprep.mubr.f32.mxu1 %v20025_v4  ;;  %10045 = vmatprep.mubr.f32.mxu0 %v20025_v4 }
 0x38a   :  { %14217 = vmatmul.mubr.msk.f32.vlgmr.msra.gmra.mrb[2].mxu1 %vm20454_vm0, %v18294_v33  ;;  %14220 = vmatmul.mubr.msk.f32.vlgmr.msra.gmra.mrb[4].mxu0 %vm20478_vm2, %v18294_v33  ;;  %vm20499_vm2 = vcmp.ge.s32.totalorder %v20219_v21, 1 }
 0x38b   :  { %14222 = vmatpush1.msk.msra.mxu1 %vm20480_vm6, %v20479_v50  ;;  %14225 = vmatpush1.msk.msra.mxu0 %vm20482_vm14, %v20481_v44  ;;  %vm20501_vm6 = vcmp.ge.s32.totalorder %v20225_v37, 1  ;;  %vm20503_vm14 = vcmp.ge.s32.totalorder %v20227_v46, 1  ;;  %v20545_v50 = vld [vmem:[#allocation115_spill] sm:$0xff]  ;;  %v20546_v44 = vld [vmem:[#allocation117_spill] sm:$0xff] }
 0x38c   :  { %14227 = vmatprep.subr.msk.mxu1 %vm20484_vm4, %v20483_v6  ;;  %14230 = vmatprep.subr.msk.mxu0 %vm20486_vm12, %v20485_v24  ;;  %vm20505_vm4 = vcmp.ge.s32.totalorder %v20086_v35, 1  ;;  %vm20506_vm12 = vmmov %vm20454_vm0  ;;  %v20547_v6 = vld [vmem:[#allocation122_spill] sm:$0xff]  ;;  %v20548_v24 = vld [vmem:[#allocation124_spill] sm:$0xff] }
 0x38d   :  { %10116 = vmatprep.mubr.f32.mxu1 %v20025_v4  ;;  %10187 = vmatprep.mubr.f32.mxu0 %v20025_v4 }
 0x38e   :  { %14223 = vmatmul.mubr.msk.f32.vlgmr.msra.gmra.mrb[4].mxu1 %vm20487_vm9, %v18294_v33  ;;  %14226 = vmatmul.mubr.msk.f32.vlgmr.msra.gmra.mrb[6].mxu0 %vm20488_vm10, %v18294_v33  ;;  %vm20507_vm9 = vmmov %vm20454_vm0  ;;  %vm9563_vm10 = vcmp.lt.s32.totalorder %v20508_v3, 4032 }
 0x38f   :  { %14228 = vmatpush1.msk.msra.mxu1 %vm20490_vm7, %v20489_v16  ;;  %14231 = vmatpush1.msk.msra.mxu0 %vm20492_vm13, %v20491_v51  ;;  %vm20510_vm7 = vcmp.ge.s32.totalorder %v20232_v17, 1  ;;  %vm20512_vm13 = vcmp.ge.s32.totalorder %v20088_v31, 1  ;;  %v20551_v16 = vld [vmem:[#allocation119_spill] sm:$0xff]  ;;  %v20552_v51 = vld [vmem:[#allocation121_spill] sm:$0xff] }
 0x390   :  { %14233 = vmatprep.subr.msk.mxu1 %vm20494_vm1, %v20493_v2  ;;  %14236 = vmatprep.subr.msk.mxu0 %vm20496_vm3, %v20495_v0  ;;  %vm20514_vm1 = vcmp.ge.s32.totalorder %v20091_v9, 1  ;;  %vm20515_vm3 = vcmp.ge.s32.totalorder %v19919_v39, 1  ;;  %v20553_v2 = vld [vmem:[#allocation126_spill] sm:$0xff]  ;;  %v20554_v0 = vld [vmem:[#allocation128_spill] sm:$0xff] }
 0x391   :  { %10258 = vmatprep.mubr.f32.mxu1 %v20025_v4  ;;  %10329 = vmatprep.mubr.f32.mxu0 %v20025_v4 }
 0x392   :  { %14229 = vmatmul.mubr.msk.f32.vlgmr.msra.gmra.mrb[6].mxu1 %vm20497_vm8, %v18294_v33  ;;  %14232 = vmatmul.mubr.msk.f32.vlgmr.msra.gmra.mrb[8].mxu0 %vm20454_vm0, %v18294_v33  ;;  %vm20516_vm8 = vcmp.ge.s32.totalorder %v20102_v61, 1 }
 0x393   :  { %14234 = vmatpush1.msk.msra.mxu1 %vm20499_vm2, %v20498_v57  ;;  %14237 = vmatpush1.msk.msra.mxu0 %vm20501_vm6, %v20500_v13  ;;  %vm9595_vm0 = vmand %vm9563_vm10, %vm20516_vm8  ;;  %v20557_v57 = vld [vmem:[#allocation123_spill] sm:$0xff]  ;;  %v20558_v13 = vld [vmem:[#allocation125_spill] sm:$0xff] }
 0x394   :  { %14239 = vmatprep.subr.msk.mxu1 %vm20503_vm14, %v20502_v28  ;;  %14242 = vmatprep.subr.msk.mxu0 %vm20505_vm4, %v20504_v56  ;;  %vm20517_vm2 = vmmov %vm20507_vm9  ;;  %vm20520_vm14 = vcmp.ge.s32.totalorder %v20242_v1, 1  ;;  %vm20522_vm4 = vcmp.ge.s32.totalorder %v20248_v42, 1  ;;  %v20559_v28 = vld [vmem:[#allocation130_spill] sm:$0xff]  ;;  %v20560_v56 = vld [vmem:[#allocation132_spill] sm:$0xff] }
 0x395   :  { %10400 = vmatprep.mubr.f32.mxu1 %v20025_v4  ;;  %10471 = vmatprep.mubr.f32.mxu0 %v20025_v4  ;;  %vm20518_vm6 = vmmov %vm20517_vm2 }
 0x396   :  { %14235 = vmatmul.mubr.msk.f32.vlgmr.msra.gmra.mrb[8].mxu1 %vm20506_vm12, %v18294_v33  ;;  %14238 = vmatmul.mubr.msk.f32.vlgmr.msra.gmra.mrb[10].mxu0 %vm20507_vm9, %v18294_v33  ;;  %vm20524_vm12 = vmmov %vm20517_vm2 }
 0x397   :  { %14240 = vmatpush1.msk.msra.mxu1 %vm20510_vm7, %v20509_v15  ;;  %14243 = vmatpush1.msk.msra.mxu0 %vm20512_vm13, %v20511_v41  ;;  %vm20525_vm9 = vmmov %vm20517_vm2  ;;  %vm20527_vm7 = vcmp.ge.s32.totalorder %v19903_v48, 1  ;;  %v20563_v15 = vld [vmem:[#allocation127_spill] sm:$0xff]  ;;  %v20564_v41 = vld [vmem:[#allocation129_spill] sm:$0xff] }
 0x398   :  { %14245 = vmatprep.subr.msk.mxu1 %vm20514_vm1, %v20513_v5  ;;  %14248 = vmatprep.subr.msk.mxu0 %vm20515_vm3, %v16871_v29  ;;  %v20521_v29 = vld [vmem:[#allocation104_spill] sm:$0xff]  ;;  %vm20531_vm13 = vmmov %vm20517_vm2  ;;  %v20565_v5 = vld [vmem:[#allocation134_spill] sm:$0xff] }
 0x399   :  { %10542 = vmatprep.mubr.f32.mxu1 %v20025_v4  ;;  %10613 = vmatprep.mubr.f32.mxu0 %v20025_v4  ;;  %vm20532_vm1 = vmmov %vm20517_vm2 }
 0x39a   :  { %14241 = vmatmul.mubr.msk.f32.vlgmr.msra.gmra.mrb[10].mxu1 %vm20517_vm2, %v18294_v33  ;;  %14244 = vmatmul.mubr.msk.f32.vlgmr.msra.gmra.mrb[12].mxu0 %vm20518_vm6, %v18294_v33  ;;  %vm20537_vm3 = vmmov %vm20532_vm1 }
 0x39b   :  { %14246 = vmatpush1.msk.msra.mxu1 %vm20520_vm14, %v20519_v11  ;;  %14249 = vmatpush1.msk.msra.mxu0 %vm20522_vm4, %v20521_v29  ;;  %vm20538_vm8 = vmmov %vm20532_vm1  ;;  %v20566_v11 = vld [vmem:[#allocation135_spill] sm:$0xff] }
 0x39c   :  { %14251 = vmatprep.subr.msk.mxu1 %vm9595_vm0, %v20523_v62  ;;  %10966 = vmatprep.subr.mxu0 %v16932_v63  ;;  %v18443_v63 = vld [vmem:[%s19229_s3 + $0x38] sm:$0xff]  ;;  %vm20543_vm0 = vmmov %vm20532_vm1  ;;  %v20569_v29 = vld [vmem:[#allocation131_spill] sm:$0xff] }
 0x39d   :  { %10684 = vmatprep.mubr.f32.mxu1 %v20025_v4  ;;  %10755 = vmatprep.mubr.f32.mxu0 %v20025_v4  ;;  %vm20544_vm2 = vmmov %vm20543_vm0  ;;  %v20570_v62 = vld [vmem:[#allocation133_spill] sm:$0xff] }
 0x39e   :  { %14247 = vmatmul.mubr.msk.f32.vlgmr.msra.gmra.mrb[12].mxu1 %vm20524_vm12, %v18294_v33  ;;  %14250 = vmatmul.mubr.msk.f32.vlgmr.msra.gmra.mrb[14].mxu0 %vm20525_vm9, %v18294_v33  ;;  %vm20549_vm6 = vmmov %vm20543_vm0 }
 0x39f   :  { %14252 = vmatpush1.msk.msra.mxu1 %vm20527_vm7, %v20526_v34  ;;  %10967 = vmatpush1.msra.mxu0 %v20528_v53  ;;  %vm20550_vm14 = vmmov %vm20543_vm0  ;;  %v20571_v34 = vld [vmem:[#allocation107_spill] sm:$0xff] }
 0x3a0   :  { %11037 = vmatprep.subr.mxu1 %v20529_v43  ;;  %11108 = vmatprep.subr.mxu0 %v20530_v54  ;;  %vm20555_vm4 = vmmov %vm20543_vm0  ;;  %v20572_v53 = vld [vmem:[#allocation139_spill] sm:$0xff]  ;;  %v20575_v43 = vld [vmem:[#allocation136_spill] sm:$0xff] }
 0x3a1   :  { %10826 = vmatprep.mubr.f32.mxu1 %v20025_v4  ;;  %11030 = vmatprep.mubr.f32.mxu0 %v20025_v4  ;;  %vm20556_vm12 = vmmov %vm20543_vm0  ;;  %v20576_v54 = vld [vmem:[#allocation137_spill] sm:$0xff] }
 0x3a2   :  { %14253 = vmatmul.mubr.msk.f32.vlgmr.msra.gmra.mrb[14].mxu1 %vm20531_vm13, %v18294_v33  ;;  %14255 = vmatmul.mubr.msk.f32.vlgmr.msra.gmra.mrb[0].mxu0 %vm20532_vm1, %v18443_v63  ;;  %v20539_v33 = vld [vmem:[#allocation111_spill] sm:$0xff]  ;;  %vm20561_vm9 = vmmov %vm20543_vm0 }
 0x3a3   :  { %11038 = vmatpush1.msra.mxu1 %v20533_v59  ;;  %11109 = vmatpush1.msra.mxu0 %v20534_v49  ;;  %vm20562_vm7 = vmmov %vm20543_vm0  ;;  %v20577_v59 = vld [vmem:[#allocation142_spill] sm:$0xff]  ;;  %v20578_v49 = vld [vmem:[#allocation144_spill] sm:$0xff] }
 0x3a4   :  { %11179 = vmatprep.subr.mxu1 %v20535_v26  ;;  %11250 = vmatprep.subr.mxu0 %v20536_v18  ;;  %vm20567_vm13 = vmmov %vm20543_vm0  ;;  %v20579_v26 = vld [vmem:[#allocation141_spill] sm:$0xff]  ;;  %v20586_v18 = vld [vmem:[#allocation146_spill] sm:$0xff] }
 0x3a5   :  { %11101 = vmatprep.mubr.f32.mxu1 %v20025_v4  ;;  %11172 = vmatprep.mubr.f32.mxu0 %v20025_v4  ;;  %vm20568_vm1 = vmmov %vm20543_vm0 }
 0x3a6   :  { %14256 = vmatmul.mubr.msk.f32.vlgmr.msra.gmra.mrb[0].mxu1 %vm20537_vm3, %v18443_v63  ;;  %14257 = vmatmul.mubr.msk.f32.vlgmr.msra.gmra.mrb[2].mxu0 %vm20538_vm8, %v18443_v63  ;;  %vm20573_vm3 = vmmov %vm20543_vm0 }
 0x3a7   :  { %11180 = vmatpush1.msra.mxu1 %v20539_v33  ;;  %11251 = vmatpush1.msra.mxu0 %v20540_v52  ;;  %vm20574_vm8 = vmmov %vm20543_vm0  ;;  %v20588_v33 = vld [vmem:[#allocation148_spill] sm:$0xff] }
 0x3a8   :  { %11321 = vmatprep.subr.mxu1 %v20541_v32  ;;  %11392 = vmatprep.subr.mxu0 %v20542_v23 }
 0x3a9   :  { %11243 = vmatprep.mubr.f32.mxu1 %v20025_v4  ;;  %11314 = vmatprep.mubr.f32.mxu0 %v20025_v4 }
 0x3aa   :  { %14258 = vmatmul.mubr.msk.f32.vlgmr.msra.gmra.mrb[2].mxu1 %vm20543_vm0, %v18443_v63  ;;  %14259 = vmatmul.mubr.msk.f32.vlgmr.msra.gmra.mrb[4].mxu0 %vm20544_vm2, %v18443_v63  ;;  %vm20583_vm2 = vnez %v20164_v27  ;;  %v20592_v27 = vld [vmem:[#allocation145_spill] sm:$0xff] }
 0x3ab   :  { %11322 = vmatpush1.msra.mxu1 %v20545_v50  ;;  %11393 = vmatpush1.msra.mxu0 %v20546_v44 }
 0x3ac   :  { %11463 = vmatprep.subr.mxu1 %v20547_v6  ;;  %11534 = vmatprep.subr.mxu0 %v20548_v24 }
 0x3ad   :  { %11385 = vmatprep.mubr.f32.mxu1 %v20025_v4  ;;  %11456 = vmatprep.mubr.f32.mxu0 %v20025_v4 }
 0x3ae   :  { %14260 = vmatmul.mubr.msk.f32.vlgmr.msra.gmra.mrb[4].mxu1 %vm20549_vm6, %v18443_v63  ;;  %14261 = vmatmul.mubr.msk.f32.vlgmr.msra.gmra.mrb[6].mxu0 %vm20550_vm14, %v18443_v63  ;;  %vm20587_vm6 = vcmp.lt.s32.totalorder %v20024_v47, 63  ;;  %vm20589_vm14 = vcmp.lt.s32.totalorder %v20036_v30, 63  ;;  %v20594_v47 = vld [vmem:[#allocation147_spill] sm:$0xff]  ;;  %v20596_v30 = vld [vmem:[#allocation150_spill] sm:$0xff] }
 0x3af   :  { %11464 = vmatpush1.msra.mxu1 %v20551_v16  ;;  %11535 = vmatpush1.msra.mxu0 %v20552_v51 }
 0x3b0   :  { %11605 = vmatprep.subr.mxu1 %v20553_v2  ;;  %11676 = vmatprep.subr.mxu0 %v20554_v0  ;;  %v20653_v0 = vld [vmem:[#allocation81_spill] sm:$0xff] }
 0x3b1   :  { %11527 = vmatprep.mubr.f32.mxu1 %v20025_v4  ;;  %11598 = vmatprep.mubr.f32.mxu0 %v20025_v4 }
 0x3b2   :  { %14262 = vmatmul.mubr.msk.f32.vlgmr.msra.gmra.mrb[6].mxu1 %vm20555_vm4, %v18443_v63  ;;  %14263 = vmatmul.mubr.msk.f32.vlgmr.msra.gmra.mrb[8].mxu0 %vm20556_vm12, %v18443_v63  ;;  %vm20590_vm4 = vmmov %vm20543_vm0 }
 0x3b3   :  { %11606 = vmatpush1.msra.mxu1 %v20557_v57  ;;  %11677 = vmatpush1.msra.mxu0 %v20558_v13  ;;  %vm20591_vm12 = vmmov %vm20543_vm0  ;;  %v20654_v57 = vld [vmem:[#allocation42_spill] sm:$0xff] }
 0x3b4   :  { %11747 = vmatprep.subr.mxu1 %v20559_v28  ;;  %11818 = vmatprep.subr.mxu0 %v20560_v56 }
 0x3b5   :  { %11669 = vmatprep.mubr.f32.mxu1 %v20025_v4  ;;  %11740 = vmatprep.mubr.f32.mxu0 %v20025_v4 }
 0x3b6   :  { %14264 = vmatmul.mubr.msk.f32.vlgmr.msra.gmra.mrb[8].mxu1 %vm20561_vm9, %v18443_v63  ;;  %14265 = vmatmul.mubr.msk.f32.vlgmr.msra.gmra.mrb[10].mxu0 %vm20562_vm7, %v18443_v63  ;;  %vm20593_vm9 = vcmp.lt.s32.totalorder %v20029_v14, 63  ;;  %vm20595_vm7 = vcmp.lt.s32.totalorder %v20038_v38, 63  ;;  %v20602_v38 = vld [vmem:[#allocation149_spill] sm:$0xff]  ;;  %v20604_v14 = vld [vmem:[#allocation151_spill] sm:$0xff] }
 0x3b7   :  { %11748 = vmatpush1.msra.mxu1 %v20563_v15  ;;  %11819 = vmatpush1.msra.mxu0 %v20564_v41  ;;  %v20656_v15 = vld [vmem:[#allocation41_spill] sm:$0xff] }
 0x3b8   :  { %11889 = vmatprep.subr.mxu1 %v20565_v5  ;;  %11960 = vmatprep.subr.mxu0 %v20566_v11  ;;  %v20658_v5 = vld [vmem:[#allocation49_spill] sm:$0xff] }
 0x3b9   :  { %11811 = vmatprep.mubr.f32.mxu1 %v20025_v4  ;;  %11882 = vmatprep.mubr.f32.mxu0 %v20025_v4 }
 0x3ba   :  { %14266 = vmatmul.mubr.msk.f32.vlgmr.msra.gmra.mrb[10].mxu1 %vm20567_vm13, %v18443_v63  ;;  %14267 = vmatmul.mubr.msk.f32.vlgmr.msra.gmra.mrb[12].mxu0 %vm20568_vm1, %v18443_v63  ;;  %vm20597_vm13 = vcmp.lt.s32.totalorder %v20042_v55, 63  ;;  %vm20599_vm1 = vcmp.lt.s32.totalorder %v20195_v45, 63  ;;  %v20606_v55 = vld [vmem:[#allocation154_spill] sm:$0xff]  ;;  %v20608_v45 = vld [vmem:[#allocation156_spill] sm:$0xff] }
 0x3bb   :  { %11890 = vmatpush1.msra.mxu1 %v20569_v29  ;;  %11961 = vmatpush1.msra.mxu0 %v20570_v62 }
 0x3bc   :  { %14270 = vmatprep.subr.msk.mxu1 %vm9563_vm10, %v20571_v34  ;;  %14273 = vmatprep.subr.msk.mxu0 %vm17160_vm15, %v20572_v53  ;;  %vm20580_vm15 = vnez %v20579_v26 }
 0x3bd   :  { %11953 = vmatprep.mubr.f32.mxu1 %v20025_v4  ;;  %12024 = vmatprep.mubr.f32.mxu0 %v20025_v4 }
 0x3be   :  { %14268 = vmatmul.mubr.msk.f32.vlgmr.msra.gmra.mrb[12].mxu1 %vm20573_vm3, %v18443_v63  ;;  %14269 = vmatmul.mubr.msk.f32.vlgmr.msra.gmra.mrb[14].mxu0 %vm20574_vm8, %v18443_v63  ;;  %vm20600_vm3 = vmmov %vm20543_vm0 }
 0x3bf   :  { %12032 = vmatpush1.msra.mxu1 %v20575_v43  ;;  %14274 = vmatpush1.msk.msra.mxu0 %vm20389_vm11, %v20576_v54  ;;  %vm20581_vm11 = vmmov %vm20543_vm0 }
 0x3c0   :  { %14276 = vmatprep.subr.msk.mxu1 %vm20390_vm5, %v20577_v59  ;;  %14279 = vmatprep.subr.msk.mxu0 %vm20580_vm15, %v20578_v49  ;;  %vm20585_vm5 = vnez %v20181_v12  ;;  %v20598_v12 = vld [vmem:[#allocation152_spill] sm:$0xff]  ;;  %vm20601_vm8 = vmmov %vm20543_vm0  ;;  %vm20603_vm15 = vcmp.lt.s32.totalorder %v20045_v25, 63  ;;  %v20612_v25 = vld [vmem:[#allocation153_spill] sm:$0xff] }
 0x3c1   :  { %12095 = vmatprep.mubr.f32.mxu1 %v20025_v4  ;;  %12331 = vmatprep.mubr.f32.mxu0 %v20025_v4 }
 0x3c2   :  { %14271 = vmatmul.mubr.msk.f32.vlgmr.msra.gmra.mrb[14].mxu1 %vm20543_vm0, %v18443_v63  ;;  %14275 = vmatmul.mubr.msk.f32.vlgmr.msra.gmra.mrb[0].mxu0 %vm20581_vm11, %v18534_v7  ;;  %vm20605_vm0 = vcmp.lt.s32.totalorder %v20200_v20, 63  ;;  %vm20607_vm11 = vcmp.lt.s32.totalorder %v20202_v58, 63  ;;  %v20614_v20 = vld [vmem:[#allocation155_spill] sm:$0xff]  ;;  %v20616_v58 = vld [vmem:[#allocation158_spill] sm:$0xff] }
 0x3c3   :  { %14277 = vmatpush1.msk.msra.mxu1 %vm20583_vm2, %v20582_v60  ;;  %14280 = vmatpush1.msk.msra.mxu0 %vm20585_vm5, %v20584_v40  ;;  %vm20609_vm2 = vcmp.lt.s32.totalorder %v20208_v36, 63  ;;  %vm20610_vm5 = vmmov %vm20600_vm3  ;;  %v20618_v36 = vld [vmem:[#allocation160_spill] sm:$0xff] }
 0x3c4   :  { %14282 = vmatprep.subr.msk.mxu1 %vm20587_vm6, %v20586_v18  ;;  %14285 = vmatprep.subr.msk.mxu0 %vm20589_vm14, %v20588_v33  ;;  %vm20611_vm6 = vmmov %vm20600_vm3  ;;  %vm20613_vm14 = vcmp.lt.s32.totalorder %v20206_v19, 63  ;;  %v20622_v19 = vld [vmem:[#allocation157_spill] sm:$0xff] }
 0x3c5   :  { %12402 = vmatprep.mubr.f32.mxu1 %v20025_v4  ;;  %12473 = vmatprep.mubr.f32.mxu0 %v20025_v4 }
 0x3c6   :  { %14278 = vmatmul.mubr.msk.f32.vlgmr.msra.gmra.mrb[0].mxu1 %vm20590_vm4, %v18534_v7  ;;  %14281 = vmatmul.mubr.msk.f32.vlgmr.msra.gmra.mrb[2].mxu0 %vm20591_vm12, %v18534_v7  ;;  %vm20615_vm4 = vcmp.lt.s32.totalorder %v20212_v8, 63  ;;  %vm20617_vm12 = vcmp.lt.s32.totalorder %v20214_v10, 63  ;;  %v20624_v8 = vld [vmem:[#allocation159_spill] sm:$0xff]  ;;  %v20626_v10 = vld [vmem:[#allocation162_spill] sm:$0xff] }
 0x3c7   :  { %14283 = vmatpush1.msk.msra.mxu1 %vm20593_vm9, %v20592_v27  ;;  %14286 = vmatpush1.msk.msra.mxu0 %vm20595_vm7, %v20594_v47  ;;  %vm20619_vm9 = vcmp.lt.s32.totalorder %v20221_v22, 63  ;;  %vm20620_vm7 = vmmov %vm20600_vm3  ;;  %v20628_v22 = vld [vmem:[#allocation164_spill] sm:$0xff] }
 0x3c8   :  { %14288 = vmatprep.subr.msk.mxu1 %vm20597_vm13, %v20596_v30  ;;  %14291 = vmatprep.subr.msk.mxu0 %vm20599_vm1, %v20598_v12  ;;  %vm20621_vm13 = vmmov %vm20600_vm3  ;;  %vm20623_vm1 = vcmp.lt.s32.totalorder %v20219_v21, 63  ;;  %v20632_v21 = vld [vmem:[#allocation161_spill] sm:$0xff]  ;;  %v20661_v27 = vld [vmem:[#allocation84_spill] sm:$0xff] }
 0x3c9   :  { %12544 = vmatprep.mubr.f32.mxu1 %v20025_v4  ;;  %12615 = vmatprep.mubr.f32.mxu0 %v20025_v4  ;;  %v20663_v30 = vld [vmem:[#allocation82_spill] sm:$0xff] }
 0x3ca   :  { %14284 = vmatmul.mubr.msk.f32.vlgmr.msra.gmra.mrb[2].mxu1 %vm20600_vm3, %v18534_v7  ;;  %14287 = vmatmul.mubr.msk.f32.vlgmr.msra.gmra.mrb[4].mxu0 %vm20601_vm8, %v18534_v7  ;;  %vm20625_vm3 = vcmp.lt.s32.totalorder %v20225_v37, 63  ;;  %vm20627_vm8 = vcmp.lt.s32.totalorder %v20227_v46, 63  ;;  %v20634_v37 = vld [vmem:[#allocation163_spill] sm:$0xff]  ;;  %v20638_v46 = vld [vmem:[#allocation169_spill] sm:$0xff] }
 0x3cb   :  { %14289 = vmatpush1.msk.msra.mxu1 %vm20603_vm15, %v20602_v38  ;;  %14292 = vmatpush1.msk.msra.mxu0 %vm20605_vm0, %v20604_v14  ;;  %vm20629_vm15 = vcmp.lt.s32.totalorder %v20086_v35, 63  ;;  %vm20630_vm0 = vmmov %vm20610_vm5  ;;  %v20636_v35 = vld [vmem:[#allocation166_spill] sm:$0xff] }
 0x3cc   :  { %14294 = vmatprep.subr.msk.mxu1 %vm20607_vm11, %v20606_v55  ;;  %14297 = vmatprep.subr.msk.mxu0 %vm20609_vm2, %v20608_v45  ;;  %vm20631_vm11 = vmmov %vm20630_vm0  ;;  %vm20633_vm2 = vcmp.lt.s32.totalorder %v20232_v17, 63 }
 0x3cd   :  { %12686 = vmatprep.mubr.f32.mxu1 %v20025_v4  ;;  %12757 = vmatprep.mubr.f32.mxu0 %v20025_v4 }
 0x3ce   :  { %14290 = vmatmul.mubr.msk.f32.vlgmr.msra.gmra.mrb[4].mxu1 %vm20610_vm5, %v18534_v7  ;;  %14293 = vmatmul.mubr.msk.f32.vlgmr.msra.gmra.mrb[6].mxu0 %vm20611_vm6, %v18534_v7  ;;  %vm20635_vm5 = vcmp.lt.s32.totalorder %v20088_v31, 63  ;;  %vm20637_vm6 = vcmp.lt.s32.totalorder %v20091_v9, 63  ;;  %v20643_v31 = vld [vmem:[#allocation165_spill] sm:$0xff]  ;;  %v20647_v9 = vld [vmem:[#allocation140_spill] sm:$0xff] }
 0x3cf   :  { %14295 = vmatpush1.msk.msra.mxu1 %vm20613_vm14, %v20612_v25  ;;  %14298 = vmatpush1.msk.msra.mxu0 %vm20615_vm4, %v20614_v20  ;;  %vm20639_vm14 = vcmp.lt.s32.totalorder %v19919_v39, 63  ;;  %vm20640_vm4 = vcmp.lt.s32.totalorder %v20102_v61, 63  ;;  %v20645_v39 = vld [vmem:[#allocation167_spill] sm:$0xff]  ;;  %v20650_v61 = vld [vmem:[#allocation168_spill] sm:$0xff]  ;;  %v20667_v25 = vld [vmem:[#allocation57_spill] sm:$0xff] }
 0x3d0   :  { %14300 = vmatprep.subr.msk.mxu1 %vm20617_vm12, %v20616_v58  ;;  %14303 = vmatprep.subr.msk.mxu0 %vm20619_vm9, %v20618_v36  ;;  %vm12165_vm12 = vmand %vm9563_vm10, %vm20640_vm4  ;;  %v20669_v58 = vld [vmem:[#allocation58_spill] sm:$0xff] }
 0x3d1   :  { %12828 = vmatprep.mubr.f32.mxu1 %v20025_v4  ;;  %12899 = vmatprep.mubr.f32.mxu0 %v20025_v4  ;;  %vm20641_vm9 = vmmov %vm20630_vm0 }
 0x3d2   :  { %14296 = vmatmul.mubr.msk.f32.vlgmr.msra.gmra.mrb[6].mxu1 %vm20620_vm7, %v18534_v7  ;;  %14299 = vmatmul.mubr.msk.f32.vlgmr.msra.gmra.mrb[8].mxu0 %vm20621_vm13, %v18534_v7  ;;  %vm20642_vm7 = vmmov %vm20630_vm0  ;;  %vm20644_vm13 = vcmp.lt.s32.totalorder %v20242_v1, 63 }
 0x3d3   :  { %14301 = vmatpush1.msk.msra.mxu1 %vm20623_vm1, %v20622_v19  ;;  %14304 = vmatpush1.msk.msra.mxu0 %vm20625_vm3, %v20624_v8  ;;  %vm20646_vm1 = vcmp.lt.s32.totalorder %v20248_v42, 63  ;;  %vm20648_vm10 = vmmov %vm20630_vm0 }
 0x3d4   :  { %14306 = vmatprep.subr.msk.mxu1 %vm20627_vm8, %v20626_v10  ;;  %14309 = vmatprep.subr.msk.mxu0 %vm20629_vm15, %v20628_v22  ;;  %vm20649_vm3 = vmmov %vm20630_vm0  ;;  %vm20651_vm8 = vcmp.lt.s32.totalorder %v19903_v48, 63 }
 0x3d5   :  { %12970 = vmatprep.mubr.f32.mxu1 %v20025_v4  ;;  %13041 = vmatprep.mubr.f32.mxu0 %v20025_v4  ;;  %vm20652_vm15 = vmmov %vm20630_vm0 }
 0x3d6   :  { %14302 = vmatmul.mubr.msk.f32.vlgmr.msra.gmra.mrb[8].mxu1 %vm20630_vm0, %v18534_v7  ;;  %14305 = vmatmul.mubr.msk.f32.vlgmr.msra.gmra.mrb[10].mxu0 %vm20631_vm11, %v18534_v7  ;;  %vm20655_vm0 = vcmp.eq.s32.totalorder %v20654_v57, 1  ;;  %vm20657_vm11 = vcmp.le.f32.partialorder %v20656_v15, 0.5 }
 0x3d7   :  { %14307 = vmatpush1.msk.msra.mxu1 %vm20633_vm2, %v20632_v21  ;;  %14310 = vmatpush1.msk.msra.mxu0 %vm20635_vm5, %v20634_v37  ;;  %vm20659_vm2 = vmmov %vm20655_vm0 }
 0x3d8   :  { %14312 = vmatprep.subr.msk.mxu1 %vm20637_vm6, %v20636_v35  ;;  %14315 = vmatprep.subr.msk.mxu0 %vm20639_vm14, %v20638_v46  ;;  %vm20660_vm5 = vmmov %vm20657_vm11 }
 0x3d9   :  { %13112 = vmatprep.mubr.f32.mxu1 %v20025_v4  ;;  %13183 = vmatprep.mubr.f32.mxu0 %v20025_v4  ;;  %vm20662_vm6 = vmmov %vm20655_vm0 }
 0x3da   :  { %14308 = vmatmul.mubr.msk.f32.vlgmr.msra.gmra.mrb[10].mxu1 %vm20641_vm9, %v18534_v7  ;;  %14311 = vmatmul.mubr.msk.f32.vlgmr.msra.gmra.mrb[12].mxu0 %vm20642_vm7, %v18534_v7  ;;  %vm20664_vm14 = vmmov %vm20655_vm0 }
 0x3db   :  { %14313 = vmatpush1.msk.msra.mxu1 %vm20644_vm13, %v20643_v31  ;;  %14316 = vmatpush1.msk.msra.mxu0 %vm20646_vm1, %v20645_v39  ;;  %vm20665_vm4 = vmmov %vm20660_vm5 }
 0x3dc   :  { %14318 = vmatprep.subr.msk.mxu1 %vm12165_vm12, %v20647_v9  ;;  %13254 = vmatprep.mubr.f32.mxu1 %v20025_v4  ;;  %vm20666_vm12 = vmmov %vm20665_vm4 }
 0x3dd   :  { %13325 = vmatprep.mubr.f32.mxu0 %v20025_v4  ;;  %vm20668_vm9 = vmmov %vm20655_vm0 }
 0x3de   :  { %14314 = vmatmul.mubr.msk.f32.vlgmr.msra.gmra.mrb[12].mxu1 %vm20648_vm10, %v18534_v7  ;;  %14317 = vmatmul.mubr.msk.f32.vlgmr.msra.gmra.mrb[14].mxu0 %vm20649_vm3, %v18534_v7  ;;  %vm20670_vm7 = vmmov %vm20655_vm0 }
 0x3df   :  { %14319 = vmatpush1.msk.msra.mxu1 %vm20651_vm8, %v20650_v61  ;;  %13396 = vmatprep.mubr.f32.mxu1 %v20025_v4  ;;  %vm20671_vm13 = vmmov %vm20665_vm4 }
 0x3e0   :  { %vm20672_vm1 = vmmov %vm20665_vm4 }
 0x3e1   :  { %vm20676_vm3 = vmmov %vm20672_vm1 }
 0x3e2   :  { %14320 = vmatmul.mubr.msk.f32.vlgmr.msra.gmra.mrb[14].mxu1 %vm20652_vm15, %v18534_v7  ;;  %vm20680_vm15 = vmmov %vm20672_vm1 }
 0x3f4   :  { %v18679_v17 = vpop.permute.xlu1 %1366 }
 0x495   :  { %v12333_v1 = vpop.f32.mrb[0].mxu0 }
 0x496   :  { %v14321_v42 = vadd.f32 %v12333_v1, %v18679_v17  ;;  %v12335_v3 = vpop.f32.mrb[1].mxu0  ;;  %v20673_v1 = vld [vmem:[#allocation172_spill] sm:$0xff] }
 0x497   :  { %v14322_v63 = vadd.f32 %v12335_v3, %v18679_v17 }
 0x498   :  { %v13435_v52 = vmax.f32 %v14321_v42, 0.0  ;;  %v20674_v42 = vld [vmem:[#allocation62_spill] sm:$0xff] }
 0x499   :  { %v13436_v32 = vmax.f32 %v14322_v63, 0.0  ;;  %v12404_v23 = vpop.f32.mrb[0].mxu1  ;;  %v12475_v50 = vpop.f32.mrb[2].mxu0  ;;  %vm20675_vm10 = vnez %v20674_v42 }
 0x49a   :  { %v13467_v44 = vmin.f32 %v13435_v52, 1.0  ;;  %v14323_v48 = vadd.f32 %v12404_v23, %v18679_v17  ;;  %v14325_v4 = vadd.f32 %v12475_v50, %v18679_v17  ;;  %v12406_v6 = vpop.f32.mrb[1].mxu1  ;;  %v12477_v24 = vpop.f32.mrb[3].mxu0 }
 0x49b   :  { %v13468_v16 = vmin.f32 %v13436_v32, 1.0  ;;  %v14324_v51 = vadd.f32 %v12406_v6, %v18679_v17  ;;  %v14326_v2 = vadd.f32 %v12477_v24, %v18679_v17  ;;  %v20677_v24 = vld [vmem:[#allocation173_spill] sm:$0xff] }
 0x49c   :  { %v13499_v13 = vsel %vm20655_vm0, %v13467_v44, %v20653_v0  ;;  %v13437_v28 = vmax.f32 %v14323_v48, 0.0  ;;  %v13439_v56 = vmax.f32 %v14325_v4, 0.0 }
 0x49d   :  { %v13534_v41 = vsel %vm20657_vm11, %v13499_v13, %v20653_v0  ;;  %v13500_v11 = vsel %vm20659_vm2, %v13468_v16, %v20658_v5  ;;  %v13438_v29 = vmax.f32 %v14324_v51, 0.0  ;;  %v13440_v62 = vmax.f32 %v14326_v2, 0.0  ;;  %v12546_v34 = vpop.f32.mrb[2].mxu1  ;;  %v12617_v53 = vpop.f32.mrb[4].mxu0  ;;  %v20678_v16 = vld [vmem:[#allocation64_spill] sm:$0xff]  ;;  %vm20687_vm2 = vmmov %vm20672_vm1 }
 0x49e   :  { %13566 = vst [vmem:[%s19231_s5] sm:$0xff] %v13534_v41  ;;  %v13535_v43 = vsel %vm20660_vm5, %v13500_v11, %v20658_v5  ;;  %v13469_v54 = vmin.f32 %v13437_v28, 1.0  ;;  %v13471_v7 = vmin.f32 %v13439_v56, 1.0  ;;  %v14327_v59 = vadd.f32 %v12546_v34, %v18679_v17  ;;  %v12548_v49 = vpop.f32.mrb[3].mxu1  ;;  %v12619_v26 = vpop.f32.mrb[5].mxu0  ;;  %v20681_v41 = vld [vmem:[#allocation171_spill] sm:$0xff]  ;;  %vm20688_vm5 = vmmov %vm20672_vm1 }
 0x49f   :  { %13567 = vst [vmem:[%s19231_s5 + $0x8] sm:$0xff] %v13535_v43  ;;  %v13470_v60 = vmin.f32 %v13438_v29, 1.0  ;;  %v13472_v40 = vmin.f32 %v13440_v62, 1.0  ;;  %v14329_v18 = vadd.f32 %v12617_v53, %v18679_v17  ;;  %v14328_v33 = vadd.f32 %v12548_v49, %v18679_v17  ;;  %v20682_v5 = vld [vmem:[#allocation63_spill] sm:$0xff]  ;;  %v20684_v29 = vld [vmem:[#allocation170_spill] sm:$0xff]  ;;  %v20685_v62 = vld [vmem:[#allocation65_spill] sm:$0xff] }
 0x4a0   :  { %v13501_v47 = vsel %vm20662_vm6, %v13469_v54, %v20661_v27  ;;  %v13503_v12 = vsel %vm20664_vm14, %v13471_v7, %v20663_v30  ;;  %v13441_v38 = vmax.f32 %v14327_v59, 0.0  ;;  %v14330_v14 = vadd.f32 %v12619_v26, %v18679_v17  ;;  %v20689_v49 = vld [vmem:[#allocation176_spill] sm:$0xff]  ;;  %v20690_v26 = vld [vmem:[#allocation66_spill] sm:$0xff]  ;;  %vm20692_vm14 = vmmov %vm20672_vm1 }
 0x4a1   :  { %v13536_v55 = vsel %vm20665_vm4, %v13501_v47, %v20661_v27  ;;  %v13538_v45 = vsel %vm20666_vm12, %v13503_v12, %v20663_v30  ;;  %v13502_v20 = vsel %vm20668_vm9, %v13470_v60, %v20667_v25  ;;  %v13504_v36 = vsel %vm20670_vm7, %v13472_v40, %v20669_v58  ;;  %v12688_v19 = vpop.f32.mrb[4].mxu1  ;;  %v12759_v8 = vpop.f32.mrb[6].mxu0  ;;  %v20693_v12 = vld [vmem:[#allocation177_spill] sm:$0xff]  ;;  %vm20699_vm9 = vmmov %vm20672_vm1 }
 0x4a2   :  { %13568 = vst [vmem:[%s19231_s5 + $0x10] sm:$0xff] %v13536_v55  ;;  %13570 = vst [vmem:[%s19231_s5 + $0x20] sm:$0xff] %v13538_v45  ;;  %v13537_v10 = vsel %vm20671_vm13, %v13502_v20, %v20667_v25  ;;  %v13539_v22 = vsel %vm20672_vm1, %v13504_v36, %v20669_v58  ;;  %v13473_v21 = vmin.f32 %v13441_v38, 1.0  ;;  %v13443_v37 = vmax.f32 %v14329_v18, 0.0  ;;  %v12690_v35 = vpop.f32.mrb[5].mxu1  ;;  %v12761_v46 = vpop.f32.mrb[7].mxu0 }
 0x4a3   :  { %13569 = vst [vmem:[%s19231_s5 + $0x18] sm:$0xff] %v13537_v10  ;;  %13571 = vst [vmem:[%s19231_s5 + $0x28] sm:$0xff] %v13539_v22  ;;  %v13442_v31 = vmax.f32 %v14328_v33, 0.0  ;;  %v13444_v39 = vmax.f32 %v14330_v14, 0.0  ;;  %v14331_v9 = vadd.f32 %v12688_v19, %v18679_v17  ;;  %v14333_v61 = vadd.f32 %v12759_v8, %v18679_v17  ;;  %v20694_v38 = vld [vmem:[#allocation68_spill] sm:$0xff]  ;;  %v20696_v55 = vld [vmem:[#allocation174_spill] sm:$0xff] }
 0x4a4   :  { %v13505_v3 = vsel %vm20675_vm10, %v13473_v21, %v20673_v1  ;;  %v13475_v63 = vmin.f32 %v13443_v37, 1.0  ;;  %v14332_v52 = vadd.f32 %v12690_v35, %v18679_v17  ;;  %v14334_v32 = vadd.f32 %v12761_v46, %v18679_v17  ;;  %v20697_v45 = vld [vmem:[#allocation67_spill] sm:$0xff]  ;;  %vm20700_vm7 = vmmov %vm20672_vm1  ;;  %v20702_v22 = vld [vmem:[#allocation69_spill] sm:$0xff] }
 0x4a5   :  { %v13540_v23 = vsel %vm20676_vm3, %v13505_v3, %v20673_v1  ;;  %v13474_v50 = vmin.f32 %v13442_v31, 1.0  ;;  %v13476_v44 = vmin.f32 %v13444_v39, 1.0  ;;  %v13445_v48 = vmax.f32 %v14331_v9, 0.0  ;;  %v12830_v4 = vpop.f32.mrb[6].mxu1  ;;  %v12901_v6 = vpop.f32.mrb[8].mxu0  ;;  %v20701_v10 = vld [vmem:[#allocation175_spill] sm:$0xff]  ;;  %vm20707_vm3 = vmmov %vm20672_vm1 }
 0x4a6   :  { %13572 = vst [vmem:[%s19231_s5 + $0x30] sm:$0xff] %v13540_v23  ;;  %vm20679_vm8 = vnez %v20678_v16  ;;  %v13447_v2 = vmax.f32 %v14333_v61, 0.0  ;;  %v13446_v0 = vmax.f32 %v14332_v52, 0.0  ;;  %v13448_v57 = vmax.f32 %v14334_v32, 0.0  ;;  %v12832_v13 = vpop.f32.mrb[7].mxu1  ;;  %v12903_v28 = vpop.f32.mrb[9].mxu0 }
 0x4a7   :  { %v13507_v51 = vsel %vm20679_vm8, %v13475_v63, %v20677_v24  ;;  %vm20683_vm0 = vnez %v20682_v5  ;;  %vm20686_vm11 = vnez %v20685_v62  ;;  %v13477_v53 = vmin.f32 %v13445_v48, 1.0 }
 0x4a8   :  { %v13542_v56 = vsel %vm20680_vm15, %v13507_v51, %v20677_v24  ;;  %v13506_v11 = vsel %vm20683_vm0, %v13474_v50, %v20681_v41  ;;  %v13508_v34 = vsel %vm20686_vm11, %v13476_v44, %v20684_v29  ;;  %v13479_v7 = vmin.f32 %v13447_v2, 1.0  ;;  %vm20713_vm0 = vmmov %vm20672_vm1 }
 0x4a9   :  { %13574 = vst [vmem:[%s19231_s5 + $0x40] sm:$0xff] %v13542_v56  ;;  %v13541_v43 = vsel %vm20687_vm2, %v13506_v11, %v20681_v41  ;;  %v13543_v54 = vsel %vm20688_vm5, %v13508_v34, %v20684_v29  ;;  %v13478_v59 = vmin.f32 %v13446_v0, 1.0  ;;  %vm20691_vm6 = vnez %v20690_v26  ;;  %v12972_v27 = vpop.f32.mrb[8].mxu1  ;;  %v13043_v47 = vpop.f32.mrb[10].mxu0  ;;  %v20711_v41 = vld [vmem:[#allocation71_spill] sm:$0xff]  ;;  %vm20714_vm11 = vmmov %vm20713_vm0 }
 0x4aa   :  { %13573 = vst [vmem:[%s19231_s5 + $0x38] sm:$0xff] %v13541_v43  ;;  %13575 = vst [vmem:[%s19231_s5 + $0x48] sm:$0xff] %v13543_v54  ;;  %v13509_v60 = vsel %vm20691_vm6, %v13477_v53, %v20689_v49  ;;  %v13480_v40 = vmin.f32 %v13448_v57, 1.0  ;;  %v14335_v18 = vadd.f32 %v12830_v4, %v18679_v17  ;;  %v14337_v33 = vadd.f32 %v12901_v6, %v18679_v17  ;;  %v12974_v58 = vpop.f32.mrb[9].mxu1  ;;  %v13045_v36 = vpop.f32.mrb[11].mxu0  ;;  %v20704_v4 = vld [vmem:[#allocation178_spill] sm:$0xff] }
 0x4ab   :  { %v13544_v30 = vsel %vm20692_vm14, %v13509_v60, %v20689_v49  ;;  %vm20695_vm4 = vnez %v20694_v38  ;;  %vm20698_vm12 = vnez %v20697_v45  ;;  %v14336_v20 = vadd.f32 %v12832_v13, %v18679_v17  ;;  %v20705_v6 = vld [vmem:[#allocation70_spill] sm:$0xff]  ;;  %v20708_v57 = vld [vmem:[#allocation179_spill] sm:$0xff]  ;;  %vm20717_vm5 = vmmov %vm20713_vm0 }
 0x4ac   :  { %v13511_v14 = vsel %vm20695_vm4, %v13479_v7, %v20693_v12  ;;  %v13510_v25 = vsel %vm20698_vm12, %v13478_v59, %v20696_v55  ;;  %13576 = vst [vmem:[%s19231_s5 + $0x50] sm:$0xff] %v13544_v30  ;;  %vm20703_vm13 = vnez %v20702_v22  ;;  %v13449_v37 = vmax.f32 %v14335_v18, 0.0  ;;  %v20709_v13 = vld [vmem:[#allocation51_spill] sm:$0xff]  ;;  %v20715_v59 = vld [vmem:[#allocation52_spill] sm:$0xff]  ;;  %v20719_v30 = vld [vmem:[#allocation53_spill] sm:$0xff] }
 0x4ad   :  { %v13546_v19 = vsel %vm20699_vm9, %v13511_v14, %v20693_v12  ;;  %v13545_v8 = vsel %vm20700_vm7, %v13510_v25, %v20696_v55  ;;  %v13512_v21 = vsel %vm20703_vm13, %v13480_v40, %v20701_v10  ;;  %v13451_v46 = vmax.f32 %v14337_v33, 0.0  ;;  %v13114_v3 = vpop.f32.mrb[10].mxu1  ;;  %v13185_v63 = vpop.f32.mrb[12].mxu0  ;;  %v20721_v38 = vld [vmem:[#allocation181_spill] sm:$0xff]  ;;  %vm20724_vm4 = vmmov %vm20713_vm0 }
 0x4ae   :  { %13578 = vst [vmem:[%s19231_s5 + $0x60] sm:$0xff] %v13546_v19  ;;  %13577 = vst [vmem:[%s19231_s5 + $0x58] sm:$0xff] %v13545_v8  ;;  %v13547_v35 = vsel %vm20672_vm1, %v13512_v21, %v20701_v10  ;;  %v13450_v31 = vmax.f32 %v14336_v20, 0.0  ;;  %v14338_v39 = vadd.f32 %v12903_v28, %v18679_v17  ;;  %v13481_v9 = vmin.f32 %v13449_v37, 1.0  ;;  %v13116_v44 = vpop.f32.mrb[11].mxu1  ;;  %v13187_v48 = vpop.f32.mrb[13].mxu0 }
 0x4af   :  { %13579 = vst [vmem:[%s19231_s5 + $0x68] sm:$0xff] %v13547_v35  ;;  %v14339_v61 = vadd.f32 %v12972_v27, %v18679_v17  ;;  %v14341_v1 = vadd.f32 %v13043_v47, %v18679_v17  ;;  %v14340_v42 = vadd.f32 %v12974_v58, %v18679_v17  ;;  %v13483_v52 = vmin.f32 %v13451_v46, 1.0  ;;  %v20718_v47 = vld [vmem:[#allocation180_spill] sm:$0xff]  ;;  %v20722_v14 = vld [vmem:[#allocation73_spill] sm:$0xff]  ;;  %vm20725_vm12 = vmmov %vm20713_vm0 }
 0x4b0   :  { %v13482_v32 = vmin.f32 %v13450_v31, 1.0  ;;  %v13452_v23 = vmax.f32 %v14338_v39, 0.0  ;;  %v14342_v50 = vadd.f32 %v13045_v36, %v18679_v17  ;;  %vm20706_vm10 = vnez %v20705_v6  ;;  %v20726_v36 = vld [vmem:[#allocation72_spill] sm:$0xff]  ;;  %vm20728_vm7 = vmmov %vm20713_vm0  ;;  %v20729_v31 = vld [vmem:[#allocation54_spill] sm:$0xff] }
 0x4b1   :  { %v13513_v24 = vsel %vm20706_vm10, %v13481_v9, %v20704_v4  ;;  %v13453_v16 = vmax.f32 %v14339_v61, 0.0  ;;  %v13455_v51 = vmax.f32 %v14341_v1, 0.0  ;;  %v13454_v2 = vmax.f32 %v14340_v42, 0.0  ;;  %v13256_v43 = vpop.f32.mrb[12].mxu1  ;;  %v13327_v54 = vpop.f32.mrb[14].mxu0  ;;  %vm20731_vm1 = vmmov %vm20713_vm0  ;;  %v20732_v6 = vld [vmem:[#allocation55_spill] sm:$0xff] }
 0x4b2   :  { %v13548_v0 = vsel %vm20707_vm3, %v13513_v24, %v20704_v4  ;;  %vm20710_vm8 = vnez %v20709_v13  ;;  %vm20712_vm15 = vnez %v20711_v41  ;;  %v13484_v11 = vmin.f32 %v13452_v23, 1.0  ;;  %v13258_v18 = vpop.f32.mrb[13].mxu1  ;;  %v13329_v33 = vpop.f32.mrb[15].mxu0 }
 0x4b3   :  { %v13515_v28 = vsel %vm20710_vm8, %v13483_v52, %v20708_v57  ;;  %v13485_v34 = vmin.f32 %v13453_v16, 1.0  ;;  %v13487_v53 = vmin.f32 %v13455_v51, 1.0  ;;  %vm20716_vm2 = vnez %v20715_v59  ;;  %v20734_v51 = vld [vmem:[#allocation59_spill] sm:$0xff]  ;;  %vm20736_vm8 = vmmov %vm20713_vm0 }
 0x4b4   :  { %v13550_v29 = vsel %vm20713_vm0, %v13515_v28, %v20708_v57  ;;  %v13486_v26 = vmin.f32 %v13454_v2, 1.0  ;;  %v13456_v60 = vmax.f32 %v14342_v50, 0.0  ;;  %v14343_v40 = vadd.f32 %v13114_v3, %v18679_v17 }
 0x4b5   :  { %vm20720_vm6 = vnez %v20719_v30  ;;  %vm20723_vm14 = vnez %v20722_v14  ;;  %v14345_v45 = vadd.f32 %v13185_v63, %v18679_v17  ;;  %vm20727_vm9 = vnez %v20726_v36  ;;  %v13398_v35 = vpop.f32.mrb[14].mxu1 }
 0x4b6   :  { %v14657_v56 = vld [vmem:[%s19228_s2 + $0x78] sm:$0xff]  ;;  %v13517_v12 = vsel %vm20720_vm6, %v13485_v34, %v20718_v47  ;;  %v13519_v55 = vsel %vm20723_vm14, %v13487_v53, %v20721_v38  ;;  %v13488_v8 = vmin.f32 %v13456_v60, 1.0  ;;  %v13457_v22 = vmax.f32 %v14343_v40, 0.0  ;;  %v13400_v42 = vpop.f32.mrb[15].mxu1  ;;  %vm20745_vm6 = vmmov %vm20731_vm1 }
 0x4b7   :  { %v13514_v5 = vsel %vm20712_vm15, %v13482_v32, %v14657_v56  ;;  %13580 = vst [vmem:[%s19231_s5 + $0x70] sm:$0xff] %v13548_v0  ;;  %13582 = vst [vmem:[%s19231_s5 + $0x80] sm:$0xff] %v13550_v29  ;;  %v13552_v25 = vsel %vm20724_vm4, %v13517_v12, %v20718_v47  ;;  %v13554_v20 = vsel %vm20725_vm12, %v13519_v55, %v20721_v38  ;;  %v13459_v21 = vmax.f32 %v14345_v45, 0.0  ;;  %v20747_v47 = vld [vmem:[#allocation77_spill] sm:$0xff] }
 0x4b8   :  { %v13549_v62 = vsel %vm20714_vm11, %v13514_v5, %v14657_v56  ;;  %v14344_v37 = vadd.f32 %v13116_v44, %v18679_v17  ;;  %vm20730_vm13 = vnez %v20729_v31  ;;  %v14346_v9 = vadd.f32 %v13187_v48, %v18679_v17  ;;  %vm20737_vm15 = vmmov %vm20713_vm0 }
 0x4b9   :  { %13581 = vst [vmem:[%s19231_s5 + $0x78] sm:$0xff] %v13549_v62  ;;  %v14347_v61 = vadd.f32 %v13256_v43, %v18679_v17  ;;  %v14349_v1 = vadd.f32 %v13327_v54, %v18679_v17  ;;  %v13489_v63 = vmin.f32 %v13457_v22, 1.0  ;;  %v13491_v52 = vmin.f32 %v13459_v21, 1.0  ;;  %vm20740_vm11 = vmmov %vm20731_vm1 }
 0x4ba   :  { %v13458_v32 = vmax.f32 %v14344_v37, 0.0  ;;  %v13460_v23 = vmax.f32 %v14346_v9, 0.0  ;;  %v14348_v48 = vadd.f32 %v13258_v18, %v18679_v17  ;;  %vm20733_vm10 = vnez %v20732_v6  ;;  %vm20746_vm14 = vmmov %vm20731_vm1 }
 0x4bb   :  { %v13461_v50 = vmax.f32 %v14347_v61, 0.0  ;;  %v13463_v44 = vmax.f32 %v14349_v1, 0.0  ;;  %vm20735_vm3 = vnez %v20734_v51  ;;  %v14350_v57 = vadd.f32 %v13329_v33, %v18679_v17  ;;  %vm20749_vm12 = vmmov %vm20731_vm1  ;;  %v20758_v61 = vld [vmem:[#allocation61_spill] sm:$0xff] }
 0x4bc   :  { %v13490_v0 = vmin.f32 %v13458_v32, 1.0  ;;  %v13492_v56 = vmin.f32 %v13460_v23, 1.0  ;;  %v13462_v34 = vmax.f32 %v14348_v48, 0.0  ;;  %v14351_v40 = vadd.f32 %v13398_v35, %v18679_v17  ;;  %v20755_v35 = vld [vmem:[#allocation80_spill] sm:$0xff] }
 0x4bd   :  { %v13493_v41 = vmin.f32 %v13461_v50, 1.0  ;;  %v13495_v62 = vmin.f32 %v13463_v44, 1.0  ;;  %v13464_v53 = vmax.f32 %v14350_v57, 0.0  ;;  %vm20748_vm4 = vnez %v20747_v47 }
 0x4be   :  { %v13494_v12 = vmin.f32 %v13462_v34, 1.0  ;;  %v13465_v55 = vmax.f32 %v14351_v40, 0.0  ;;  %v14352_v45 = vadd.f32 %v13400_v42, %v18679_v17 }
 0x4bf   :  { %v13496_v14 = vmin.f32 %v13464_v53, 1.0 }
 0x4c0   :  { %v14658_v7 = vld [vmem:[%s19228_s2 + $0x88] sm:$0xff]  ;;  %v13466_v22 = vmax.f32 %v14352_v45, 0.0 }
 0x4c1   :  { %v13516_v49 = vsel %vm20716_vm2, %v13484_v11, %v14658_v7  ;;  %v20738_v11 = vld [vmem:[#allocation56_spill] sm:$0xff] }
 0x4c2   :  { %v13551_v27 = vsel %vm20717_vm5, %v13516_v49, %v14658_v7  ;;  %vm20739_vm0 = vnez %v20738_v11  ;;  %v20741_v7 = vld [vmem:[#allocation60_spill] sm:$0xff]  ;;  %v13498_v31 = vmin.f32 %v13466_v22, 1.0 }
 0x4c3   :  { %13583 = vst [vmem:[%s19231_s5 + $0x88] sm:$0xff] %v13551_v27  ;;  %vm20742_vm2 = vnez %v20741_v7 }
 0x4ca   :  { %v14659_v58 = vld [vmem:[%s19228_s2 + $0x98] sm:$0xff] }
 0x4cb   :  { %v13518_v19 = vsel %vm20727_vm9, %v13486_v26, %v14659_v58  ;;  %13584 = vst [vmem:[%s19231_s5 + $0x90] sm:$0xff] %v13552_v25  ;;  %13586 = vst [vmem:[%s19231_s5 + $0xa0] sm:$0xff] %v13554_v20  ;;  %v20743_v26 = vld [vmem:[#allocation50_spill] sm:$0xff] }
 0x4cc   :  { %v13553_v10 = vsel %vm20728_vm7, %v13518_v19, %v14659_v58  ;;  %vm20744_vm5 = vnez %v20743_v26  ;;  %v20750_v20 = vld [vmem:[#allocation74_spill] sm:$0xff]  ;;  %vm20752_vm7 = vmmov %vm20731_vm1 }
 0x4cd   :  { %13585 = vst [vmem:[%s19231_s5 + $0x98] sm:$0xff] %v13553_v10  ;;  %vm20751_vm9 = vnez %v20750_v20  ;;  %v13497_v10 = vmin.f32 %v13465_v55, 1.0 }
 0x4d4   :  { %v14660_v46 = vld [vmem:[%s19228_s2 + $0xa8] sm:$0xff] }
 0x4d5   :  { %v13520_v39 = vsel %vm20730_vm13, %v13488_v8, %v14660_v46  ;;  %v20753_v8 = vld [vmem:[#allocation79_spill] sm:$0xff] }
 0x4d6   :  { %v13555_v3 = vsel %vm20731_vm1, %v13520_v39, %v14660_v46  ;;  %vm20754_vm13 = vnez %v20753_v8 }
 0x4d7   :  { %13587 = vst [vmem:[%s19231_s5 + $0xa8] sm:$0xff] %v13555_v3 }
 0x4de   :  { %v14661_v4 = vld [vmem:[%s19228_s2 + $0xb0] sm:$0xff]  ;;  %v14662_v16 = vld [vmem:[%s19228_s2 + $0xc0] sm:$0xff] }
 0x4df   :  { %v13521_v24 = vsel %vm20733_vm10, %v13489_v63, %v14661_v4  ;;  %v13523_v2 = vsel %vm20735_vm3, %v13491_v52, %v14662_v16  ;;  %vm20756_vm10 = vnez %v20755_v35  ;;  %vm20757_vm3 = vmmov %vm20731_vm1 }
 0x4e0   :  { %v13556_v13 = vsel %vm20736_vm8, %v13521_v24, %v14661_v4  ;;  %v13558_v28 = vsel %vm20737_vm15, %v13523_v2, %v14662_v16  ;;  %vm20759_vm8 = vnez %v20758_v61  ;;  %vm20760_vm15 = vmmov %vm20731_vm1 }
 0x4e1   :  { %13588 = vst [vmem:[%s19231_s5 + $0xb0] sm:$0xff] %v13556_v13  ;;  %13590 = vst [vmem:[%s19231_s5 + $0xc0] sm:$0xff] %v13558_v28 }
 0x4e8   :  { %v14663_v5 = vld [vmem:[%s19228_s2 + $0xb8] sm:$0xff]  ;;  %v14664_v54 = vld [vmem:[%s19228_s2 + $0xc8] sm:$0xff]  ;;  %v14665_v49 = vld [vmem:[%s19228_s2 + $0xd0] sm:$0xff] }
 0x4e9   :  { %v13522_v29 = vsel %vm20739_vm0, %v13490_v0, %v14663_v5  ;;  %v13524_v59 = vsel %vm20742_vm2, %v13492_v56, %v14664_v54  ;;  %v13525_v60 = vsel %vm20744_vm5, %v13493_v41, %v14665_v49 }
 0x4ea   :  { %v13557_v43 = vsel %vm20740_vm11, %v13522_v29, %v14663_v5  ;;  %v13559_v18 = vsel %vm20745_vm6, %v13524_v59, %v14664_v54  ;;  %v13560_v33 = vsel %vm20746_vm14, %v13525_v60, %v14665_v49 }
 0x4eb   :  { %13589 = vst [vmem:[%s19231_s5 + $0xb8] sm:$0xff] %v13557_v43 }
 0x4f2   :  { %v14666_v27 = vld [vmem:[%s19228_s2 + $0xe0] sm:$0xff] }
 0x4f3   :  { %v13527_v30 = vsel %vm20748_vm4, %v13495_v62, %v14666_v27  ;;  %13591 = vst [vmem:[%s19231_s5 + $0xc8] sm:$0xff] %v13559_v18  ;;  %13592 = vst [vmem:[%s19231_s5 + $0xd0] sm:$0xff] %v13560_v33 }
 0x4f4   :  { %v13562_v38 = vsel %vm20749_vm12, %v13527_v30, %v14666_v27 }
 0x4f5   :  { %13594 = vst [vmem:[%s19231_s5 + $0xe0] sm:$0xff] %v13562_v38 }
 0x4fc   :  { %v14667_v25 = vld [vmem:[%s19228_s2 + $0xd8] sm:$0xff]  ;;  %v14668_v19 = vld [vmem:[%s19228_s2 + $0xe8] sm:$0xff] }
 0x4fd   :  { %v13526_v58 = vsel %vm20751_vm9, %v13494_v12, %v14667_v25  ;;  %v13528_v17 = vsel %vm20754_vm13, %v13496_v14, %v14668_v19 }
 0x4fe   :  { %v13561_v36 = vsel %vm20752_vm7, %v13526_v58, %v14667_v25  ;;  %v13563_v21 = vsel %vm20731_vm1, %v13528_v17, %v14668_v19 }
 0x4ff   :  { %13593 = vst [vmem:[%s19231_s5 + $0xd8] sm:$0xff] %v13561_v36  ;;  %13595 = vst [vmem:[%s19231_s5 + $0xe8] sm:$0xff] %v13563_v21 }
 0x506   :  { %v14669_v37 = vld [vmem:[%s19228_s2 + $0xf0] sm:$0xff] }
 0x507   :  { %v13529_v46 = vsel %vm20756_vm10, %v13497_v10, %v14669_v37 }
 0x508   :  { %v13564_v39 = vsel %vm20757_vm3, %v13529_v46, %v14669_v37 }
 0x509   :  { %13596 = vst [vmem:[%s19231_s5 + $0xf0] sm:$0xff] %v13564_v39 }
 0x510   :  { %v14670_v9 = vld [vmem:[%s19228_s2 + $0xf8] sm:$0xff] }
 0x511   :  { %v13530_v1 = vsel %vm20759_vm8, %v13498_v31, %v14670_v9 }
 0x512   :  { %v13565_v42 = vsel %vm20760_vm15, %v13530_v1, %v14670_v9 }
 0x513   :  { %13597 = vst [vmem:[%s19231_s5 + $0xf8] sm:$0xff] %v13565_v42 }
 0x514 PF:  { %13832 = sbr.rel (%p37_p5) target bundleno = 1398 (0x576), region = 33  ;;  %v20761_v52 = vld [vmem:[#allocation5_spill] sm:$0xff] (!%p37_p5)  ;;  %v20762_v32 = vld [vmem:[#allocation6_spill] sm:$0xff] (!%p37_p5)  ;;  %v20763_v23 = vld [vmem:[#allocation7_spill] sm:$0xff] (!%p37_p5) }
 0x515   :  { %13897 = vst [vmem:[%s19232_s6] sm:$0xff] (!%p37_p5), %v20761_v52  ;;  %13898 = vst [vmem:[%s19232_s6 + $0x8] sm:$0xff] (!%p37_p5), %v20762_v32  ;;  %v20764_v50 = vld [vmem:[#allocation40_spill] sm:$0xff] (!%p37_p5) }
 0x516   :  { %13899 = vst [vmem:[%s19232_s6 + $0x10] sm:$0xff] (!%p37_p5), %v20763_v23  ;;  %13900 = vst [vmem:[%s19232_s6 + $0x18] sm:$0xff] (!%p37_p5), %v20764_v50 }
 0x51a   :  { %v13833_v3 = vld [vmem:[%s19228_s2] sm:$0xff] (!%p37_p5)  ;;  %v13834_v63 = vld [vmem:[%s19228_s2 + $0x8] sm:$0xff] (!%p37_p5)  ;;  %v13835_v15 = vld [vmem:[%s19228_s2 + $0x10] sm:$0xff] (!%p37_p5) }
 0x51b   :  { %13865 = vst [vmem:[%s19231_s5] sm:$0xff] %v13833_v3  ;;  %13866 = vst [vmem:[%s19231_s5 + $0x8] sm:$0xff] %v13834_v63 }
 0x51c   :  { %13867 = vst [vmem:[%s19231_s5 + $0x10] sm:$0xff] %v13835_v15 }
 0x523   :  { %v13836_v44 = vld [vmem:[%s19228_s2 + $0x18] sm:$0xff]  ;;  %v13837_v48 = vld [vmem:[%s19228_s2 + $0x20] sm:$0xff]  ;;  %v13838_v4 = vld [vmem:[%s19228_s2 + $0x28] sm:$0xff] }
 0x524   :  { %13868 = vst [vmem:[%s19231_s5 + $0x18] sm:$0xff] %v13836_v44  ;;  %13869 = vst [vmem:[%s19231_s5 + $0x20] sm:$0xff] %v13837_v48 }
 0x525   :  { %13870 = vst [vmem:[%s19231_s5 + $0x28] sm:$0xff] %v13838_v4 }
 0x52c   :  { %v13839_v6 = vld [vmem:[%s19228_s2 + $0x30] sm:$0xff]  ;;  %v13840_v24 = vld [vmem:[%s19228_s2 + $0x38] sm:$0xff]  ;;  %v13841_v16 = vld [vmem:[%s19228_s2 + $0x40] sm:$0xff] }
 0x52d   :  { %13871 = vst [vmem:[%s19231_s5 + $0x30] sm:$0xff] %v13839_v6  ;;  %13872 = vst [vmem:[%s19231_s5 + $0x38] sm:$0xff] %v13840_v24 }
 0x52e   :  { %13873 = vst [vmem:[%s19231_s5 + $0x40] sm:$0xff] %v13841_v16 }
 0x535   :  { %v13842_v51 = vld [vmem:[%s19228_s2 + $0x48] sm:$0xff]  ;;  %v13843_v2 = vld [vmem:[%s19228_s2 + $0x50] sm:$0xff]  ;;  %v13844_v0 = vld [vmem:[%s19228_s2 + $0x58] sm:$0xff] }
 0x536   :  { %13874 = vst [vmem:[%s19231_s5 + $0x48] sm:$0xff] %v13842_v51  ;;  %13875 = vst [vmem:[%s19231_s5 + $0x50] sm:$0xff] %v13843_v2 }
 0x537   :  { %13876 = vst [vmem:[%s19231_s5 + $0x58] sm:$0xff] %v13844_v0 }
 0x53e   :  { %v13845_v57 = vld [vmem:[%s19228_s2 + $0x60] sm:$0xff]  ;;  %v13846_v13 = vld [vmem:[%s19228_s2 + $0x68] sm:$0xff]  ;;  %v13847_v28 = vld [vmem:[%s19228_s2 + $0x70] sm:$0xff] }
 0x53f   :  { %13877 = vst [vmem:[%s19231_s5 + $0x60] sm:$0xff] %v13845_v57  ;;  %13878 = vst [vmem:[%s19231_s5 + $0x68] sm:$0xff] %v13846_v13 }
 0x540   :  { %13879 = vst [vmem:[%s19231_s5 + $0x70] sm:$0xff] %v13847_v28 }
 0x547   :  { %v13848_v56 = vld [vmem:[%s19228_s2 + $0x78] sm:$0xff]  ;;  %v13849_v41 = vld [vmem:[%s19228_s2 + $0x80] sm:$0xff]  ;;  %v13850_v5 = vld [vmem:[%s19228_s2 + $0x88] sm:$0xff] }
 0x548   :  { %13880 = vst [vmem:[%s19231_s5 + $0x78] sm:$0xff] %v13848_v56  ;;  %13881 = vst [vmem:[%s19231_s5 + $0x80] sm:$0xff] %v13849_v41 }
 0x549   :  { %13882 = vst [vmem:[%s19231_s5 + $0x88] sm:$0xff] %v13850_v5 }
 0x550   :  { %v13851_v11 = vld [vmem:[%s19228_s2 + $0x90] sm:$0xff]  ;;  %v13852_v29 = vld [vmem:[%s19228_s2 + $0x98] sm:$0xff]  ;;  %v13853_v62 = vld [vmem:[%s19228_s2 + $0xa0] sm:$0xff] }
 0x551   :  { %13883 = vst [vmem:[%s19231_s5 + $0x90] sm:$0xff] %v13851_v11  ;;  %13884 = vst [vmem:[%s19231_s5 + $0x98] sm:$0xff] %v13852_v29 }
 0x552   :  { %13885 = vst [vmem:[%s19231_s5 + $0xa0] sm:$0xff] %v13853_v62 }
 0x559   :  { %v13854_v34 = vld [vmem:[%s19228_s2 + $0xa8] sm:$0xff]  ;;  %v13855_v53 = vld [vmem:[%s19228_s2 + $0xb0] sm:$0xff]  ;;  %v13856_v43 = vld [vmem:[%s19228_s2 + $0xb8] sm:$0xff] }
 0x55a   :  { %13886 = vst [vmem:[%s19231_s5 + $0xa8] sm:$0xff] %v13854_v34  ;;  %13887 = vst [vmem:[%s19231_s5 + $0xb0] sm:$0xff] %v13855_v53 }
 0x55b   :  { %13888 = vst [vmem:[%s19231_s5 + $0xb8] sm:$0xff] %v13856_v43 }
 0x562   :  { %v13857_v54 = vld [vmem:[%s19228_s2 + $0xc0] sm:$0xff]  ;;  %v13858_v7 = vld [vmem:[%s19228_s2 + $0xc8] sm:$0xff]  ;;  %v13859_v59 = vld [vmem:[%s19228_s2 + $0xd0] sm:$0xff] }
 0x563   :  { %13889 = vst [vmem:[%s19231_s5 + $0xc0] sm:$0xff] %v13857_v54  ;;  %13890 = vst [vmem:[%s19231_s5 + $0xc8] sm:$0xff] %v13858_v7 }
 0x564   :  { %13891 = vst [vmem:[%s19231_s5 + $0xd0] sm:$0xff] %v13859_v59 }
 0x56b   :  { %v13860_v49 = vld [vmem:[%s19228_s2 + $0xd8] sm:$0xff]  ;;  %v13861_v26 = vld [vmem:[%s19228_s2 + $0xe0] sm:$0xff]  ;;  %v13862_v60 = vld [vmem:[%s19228_s2 + $0xe8] sm:$0xff] }
 0x56c   :  { %13892 = vst [vmem:[%s19231_s5 + $0xd8] sm:$0xff] %v13860_v49  ;;  %13893 = vst [vmem:[%s19231_s5 + $0xe0] sm:$0xff] %v13861_v26 }
 0x56d   :  { %13894 = vst [vmem:[%s19231_s5 + $0xe8] sm:$0xff] %v13862_v60 }
 0x574   :  { %v13863_v40 = vld [vmem:[%s19228_s2 + $0xf0] sm:$0xff]  ;;  %v13864_v18 = vld [vmem:[%s19228_s2 + $0xf8] sm:$0xff] }
 0x575   :  { %13895 = vst [vmem:[%s19231_s5 + $0xf0] sm:$0xff] %v13863_v40  ;;  %13896 = vst [vmem:[%s19231_s5 + $0xf8] sm:$0xff] %v13864_v18 }
 0x576 PF:  { %13909 = vsyncpa [#allocation3], 1 }

</bundles_post_ra>
